<compile_context>
chip_gen: v7x
topology: tpu7x:2x2x1
jax: 0.10.0
libtpu: 0.0.40
codegen_flags: <defaults>
</compile_context>

<pallas_src>
import jax
import jax.numpy as jnp
from jax.experimental import pallas as pl
from jax.experimental.pallas import tpu as pltpu


def basic_block_kernel(x_ref, w1_ref, b1_ref, w2_ref, b2_ref, out_ref,
                       pad1_ref, pad2_ref):
    """One batch-tile of the BasicBlock.

    x_ref    : (Bt, H, W, C)     f32   input tile (also the residual), NHWC
    w1_ref   : (9, C, P)         bf16  conv1 weight, tap-major, BN1 scale folded
    b1_ref   : (1, P)            f32   folded BN1 bias
    w2_ref   : (9, P, P)         bf16  conv2 weight, tap-major, BN2 scale folded
    b2_ref   : (1, P)            f32   folded BN2 bias
    out_ref  : (Bt, H, W, P)     f32
    pad1_ref : (Bt, H+2, WP, C)  bf16  padded conv1 input, interior at col COL
    pad2_ref : (Bt, H+2, WP, P)  bf16  padded conv2 input, interior at col COL
    """
    Bt, H, W, C = x_ref.shape
    P = out_ref.shape[-1]
    WP = pad1_ref.shape[2]
    COL = 8                      # sublane-aligned interior start column
    RB = 8                       # output-row band -> M = RB*W rows per matmul
    n_bands = H // RB

    # ---- zero the padding of both scratches with aligned column-band /
    #      full-row stores (kept per grid step: scratch is per-core under
    #      megacore, so a program_id==0 gate would be wrong). ----
    for ref, ch in ((pad1_ref, C), (pad2_ref, P)):
        zrow = jnp.zeros((Bt, 1, WP, ch), ref.dtype)
        ref[:, 0:1, :, :] = zrow                      # top halo row
        ref[:, H + 1:H + 2, :, :] = zrow              # bottom halo row
        zleft = jnp.zeros((Bt, H + 2, COL, ch), ref.dtype)
        zright = jnp.zeros((Bt, H + 2, WP - (COL + W), ch), ref.dtype)
        ref[:, :, 0:COL, :] = zleft                   # covers left halo col
        ref[:, :, COL + W:WP, :] = zright             # covers right halo col

    # ---- conv1 input: interior write is sublane-aligned (col 8, width W) ----
    pad1_ref[:, 1:H + 1, COL:COL + W, :] = x_ref[...].astype(pad1_ref.dtype)

    def conv_band(pad_ref, w_ref, b, r0):
        """3x3 conv over output rows [r0, r0+RB) of image b: nine accumulating
        MXU matmuls (M=RB*W, K=Cin, N=P); the f32 accumulator stays in vregs."""
        cin = pad_ref.shape[-1]
        acc = jnp.zeros((RB * W, P), jnp.float32)
        for dx in range(3):
            # one (possibly sublane-shifted) slab load per dx; dy offsets are
            # free leading-dim slices of the loaded value.
            slab = pad_ref[b, r0:r0 + RB + 2, COL - 1 + dx:COL - 1 + dx + W, :]
            for dy in range(3):
                tap = slab[dy:dy + RB].reshape(RB * W, cin)
                acc = acc + jnp.dot(tap, w_ref[3 * dy + dx],
                                    preferred_element_type=jnp.float32)
        return acc

    # ---- conv1 (+folded BN1) + ReLU; write all bands of the mid activation
    #      before conv2 starts (so no band-order read/write hazards) ----
    for b in range(Bt):
        for r in range(n_bands):
            r0 = r * RB
            out1 = jnp.maximum(conv_band(pad1_ref, w1_ref, b, r0) + b1_ref[...], 0.0)
            pad2_ref[b, 1 + r0:1 + r0 + RB, COL:COL + W, :] = (
                out1.reshape(RB, W, P).astype(pad2_ref.dtype))

    # ---- conv2 (+folded BN2) + residual + ReLU ----
    for b in range(Bt):
        for r in range(n_bands):
            r0 = r * RB
            out2 = conv_band(pad2_ref, w2_ref, b, r0) + b2_ref[...]
            residual = x_ref[b, r0:r0 + RB, :, :].reshape(RB * W, C)   # re-read late
            out2 = out2 + residual
            out_ref[b, r0:r0 + RB, :, :] = jnp.maximum(out2, 0.0).reshape(RB, W, P)


def fold_basic_block_params(w1, gamma1, beta1, mean1, var1,
                            w2, gamma2, beta2, mean2, var2, eps=1e-5):
    """Fold eval-mode BatchNorm into conv weights/bias. Do this ONCE at init
    (static in eval mode), not per forward call."""
    P, Cin = w1.shape[0], w1.shape[1]
    inv1 = gamma1 / jnp.sqrt(var1 + eps)
    inv2 = gamma2 / jnp.sqrt(var2 + eps)
    b1 = (beta1 - mean1 * inv1).reshape(1, P).astype(jnp.float32)
    b2 = (beta2 - mean2 * inv2).reshape(1, P).astype(jnp.float32)
    # (out,in,kh,kw) -> (kh,kw,in,out) -> (9, in, out); tap index t = ky*3 + kx
    w1_t = (jnp.transpose(w1, (2, 3, 1, 0)) * inv1).reshape(9, Cin, P).astype(jnp.bfloat16)
    w2_t = (jnp.transpose(w2, (2, 3, 1, 0)) * inv2).reshape(9, P, P).astype(jnp.bfloat16)
    return w1_t, b1, w2_t, b2


def basic_block_nhwc(x_nhwc, w1_t, b1, w2_t, b2, *, batch_tile=1):
    """BasicBlock forward on NHWC activations with pre-folded params."""
    B, H, W, Cin = x_nhwc.shape
    P = w1_t.shape[-1]
    assert Cin == P, "residual add requires inplanes == planes (downsample=None)"
    assert H % 8 == 0 and W % 8 == 0, "kernel assumes H, W multiples of 8"
    bt = batch_tile
    assert B % bt == 0
    COL = 8
    WP = ((COL + W + 1 + 7) // 8) * 8      # interior at col 8, halos at 7 / 8+W

    flops = 2 * B * H * W * 9 * (Cin * P + P * P)
    bytes_accessed = (4 * x_nhwc.size + 2 * (w1_t.size + w2_t.size)
                      + 4 * (b1.size + b2.size) + 4 * B * H * W * P)
    cost = pl.CostEstimate(flops=flops, transcendentals=0,
                           bytes_accessed=bytes_accessed)

    return pl.pallas_call(
        basic_block_kernel,
        out_shape=jax.ShapeDtypeStruct((B, H, W, P), jnp.float32),
        grid=(B // bt,),
        in_specs=[
            pl.BlockSpec((bt, H, W, Cin), lambda i: (i, 0, 0, 0)),   # per-step batch tile
            pl.BlockSpec((9, Cin, P), lambda i: (0, 0, 0)),          # VMEM-resident weights
            pl.BlockSpec((1, P), lambda i: (0, 0)),
            pl.BlockSpec((9, P, P), lambda i: (0, 0, 0)),
            pl.BlockSpec((1, P), lambda i: (0, 0)),
        ],
        out_specs=pl.BlockSpec((bt, H, W, P), lambda i: (i, 0, 0, 0)),
        scratch_shapes=[
            pltpu.VMEM((bt, H + 2, WP, Cin), jnp.bfloat16),          # padded conv1 input
            pltpu.VMEM((bt, H + 2, WP, P), jnp.bfloat16),            # padded conv2 input
        ],
        compiler_params=pltpu.CompilerParams(
            dimension_semantics=("parallel",),       # megacore split over batch
            vmem_limit_bytes=32 * 1024 * 1024),      # ~2 MiB used; safe on v5e/v6e/v7x
        cost_estimate=cost,
    )(x_nhwc, w1_t, b1, w2_t, b2)


def basic_block(x_nchw, w1, gamma1, beta1, mean1, var1,
                w2, gamma2, beta2, mean2, var2, eps=1e-5):
    """PyTorch-parity entry (NCHW in/out, eval-mode BN, stride=1, no downsample).
    Layout transposes and BN folding live here so production code can hoist them
    (call basic_block_nhwc with NHWC activations + prefolded params instead)."""
    params = fold_basic_block_params(w1, gamma1, beta1, mean1, var1,
                                     w2, gamma2, beta2, mean2, var2, eps)
    x = jnp.transpose(x_nchw, (0, 2, 3, 1)).astype(jnp.float32)      # NHWC
    out = basic_block_nhwc(x, *params, batch_tile=1)
    return jnp.transpose(out, (0, 3, 1, 2))                          # back to NCHW


def basic_block_ref(x, w1, g1, be1, m1, v1, w2, g2, be2, m2, v2, eps=1e-5):
    """Pure-JAX reference (matches PyTorch eval-mode BasicBlock)."""
    def conv(x, w):
        return jax.lax.conv_general_dilated(
            x, w, window_strides=(1, 1), padding=((1, 1), (1, 1)),
            dimension_numbers=('NCHW', 'OIHW', 'NCHW'),
            precision=jax.lax.Precision.HIGHEST)

    def bn(x, g, b, m, v):
        sh = (1, -1, 1, 1)
        return (x - m.reshape(sh)) / jnp.sqrt(v.reshape(sh) + eps) * g.reshape(sh) + b.reshape(sh)

    out = jax.nn.relu(bn(conv(x, w1), g1, be1, m1, v1))
    out = bn(conv(out, w2), g2, be2, m2, v2)
    return jax.nn.relu(out + x)


if __name__ == "__main__":
    key = jax.random.PRNGKey(0)
    ks = jax.random.split(key, 12)

    # inplanes == planes == 128 (downsample=None); 128 channels keep the lane
    # dim fully dense while the problem stays small.
    B, C, H, W = 2, 128, 16, 16
    P = C

    x = jax.random.normal(ks[0], (B, C, H, W), dtype=jnp.float32)

    w1 = 0.1 * jax.random.normal(ks[1], (P, C, 3, 3), dtype=jnp.float32)
    w2 = 0.1 * jax.random.normal(ks[2], (P, P, 3, 3), dtype=jnp.float32)

    gamma1 = 1.0 + 0.1 * jax.random.normal(ks[3], (P,), dtype=jnp.float32)
    beta1 = 0.1 * jax.random.normal(ks[4], (P,), dtype=jnp.float32)
    mean1 = 0.1 * jax.random.normal(ks[5], (P,), dtype=jnp.float32)
    var1 = 0.5 + jnp.abs(jax.random.normal(ks[6], (P,), dtype=jnp.float32))

    gamma2 = 1.0 + 0.1 * jax.random.normal(ks[7], (P,), dtype=jnp.float32)
    beta2 = 0.1 * jax.random.normal(ks[8], (P,), dtype=jnp.float32)
    mean2 = 0.1 * jax.random.normal(ks[9], (P,), dtype=jnp.float32)
    var2 = 0.5 + jnp.abs(jax.random.normal(ks[10], (P,), dtype=jnp.float32))

    out = basic_block(x, w1, gamma1, beta1, mean1, var1,
                      w2, gamma2, beta2, mean2, var2)
    out = jax.block_until_ready(out)

    ref = basic_block_ref(x, w1, gamma1, beta1, mean1, var1,
                          w2, gamma2, beta2, mean2, var2)
    assert out.shape == (B, P, H, W)

    # The MXU runs bf16 operands (with f32 accumulation / f32 epilogue), while
    # the reference runs Precision.HIGHEST f32 convs, so compare with a bf16-aware
    # metric: an algorithmic bug (wrong tap/halo/bias/residual) would be O(1)
    # relative, far above these thresholds.
    ref_rms = float(jnp.sqrt(jnp.mean(ref * ref)))
    max_err = float(jnp.max(jnp.abs(out - ref)))
    mean_err = float(jnp.mean(jnp.abs(out - ref)))
    assert max_err / ref_rms < 5e-2, ("max error too large", max_err, ref_rms)
    assert mean_err / ref_rms < 1e-2, ("mean error too large", mean_err, ref_rms)

    print("KERNEL_OK")
</pallas_src>

<mosaic_0001>
module attributes {stable_mosaic.version = 11 : i64} {
  func.func @basic_block_kernel(%arg0: i32, %arg1: memref<1x16x16x128xf32, #tpu.memory_space<vmem>>, %arg2: memref<9x128x128xbf16, #tpu.memory_space<vmem>>, %arg3: memref<1x128xf32, #tpu.memory_space<vmem>>, %arg4: memref<9x128x128xbf16, #tpu.memory_space<vmem>>, %arg5: memref<1x128xf32, #tpu.memory_space<vmem>>, %arg6: memref<1x16x16x128xf32, #tpu.memory_space<vmem>>, %arg7: memref<1x18x32x128xbf16, #tpu.memory_space<vmem>>, %arg8: memref<1x18x32x128xbf16, #tpu.memory_space<vmem>>) attributes {dimension_semantics = [#tpu.dimension_semantics<parallel>], iteration_bounds = array<i64: 2>, scalar_prefetch = 0 : i64, scratch_operands = 2 : i64, tpu.core_type = #tpu.core_type<tc>, window_params = [{transform_indices = @transform_0, window_bounds = array<i64: 1, 16, 16, 128>}, {pipeline_mode = #tpu.pipeline_mode<synchronous>, transform_indices = @transform_1, window_bounds = array<i64: 9, 128, 128>}, {pipeline_mode = #tpu.pipeline_mode<synchronous>, transform_indices = @transform_2, window_bounds = array<i64: 1, 128>}, {pipeline_mode = #tpu.pipeline_mode<synchronous>, transform_indices = @transform_3, window_bounds = array<i64: 9, 128, 128>}, {pipeline_mode = #tpu.pipeline_mode<synchronous>, transform_indices = @transform_4, window_bounds = array<i64: 1, 128>}, {transform_indices = @transform_5, window_bounds = array<i64: 1, 16, 16, 128>}]} {
    %cst = arith.constant 0.000000e+00 : bf16
    %0 = vector.broadcast %cst : bf16 to vector<1x1x32x128xbf16>
    %c0 = arith.constant 0 : index
    %c0_0 = arith.constant 0 : index
    %c0_1 = arith.constant 0 : index
    %c0_2 = arith.constant 0 : index
    %1 = vector.load %arg7[%c0, %c0_0, %c0_1, %c0_2] : memref<1x18x32x128xbf16, #tpu.memory_space<vmem>>, vector<1x1x32x128xbf16>
    tpu.vector_store %arg7[%c0, %c0_0, %c0_1, %c0_2], %0 {strides = array<i32>} : memref<1x18x32x128xbf16, #tpu.memory_space<vmem>>, vector<1x1x32x128xbf16>,
    %c0_3 = arith.constant 0 : index
    %c17 = arith.constant 17 : index
    %c0_4 = arith.constant 0 : index
    %c0_5 = arith.constant 0 : index
    %2 = vector.load %arg7[%c0_3, %c17, %c0_4, %c0_5] : memref<1x18x32x128xbf16, #tpu.memory_space<vmem>>, vector<1x1x32x128xbf16>
    tpu.vector_store %arg7[%c0_3, %c17, %c0_4, %c0_5], %0 {strides = array<i32>} : memref<1x18x32x128xbf16, #tpu.memory_space<vmem>>, vector<1x1x32x128xbf16>,
    %cst_6 = arith.constant 0.000000e+00 : bf16
    %3 = vector.broadcast %cst_6 : bf16 to vector<1x18x8x128xbf16>
    %cst_7 = arith.constant 0.000000e+00 : bf16
    %4 = vector.broadcast %cst_7 : bf16 to vector<1x18x8x128xbf16>
    %c0_8 = arith.constant 0 : index
    %c0_9 = arith.constant 0 : index
    %c0_10 = arith.constant 0 : index
    %c0_11 = arith.constant 0 : index
    %5 = vector.load %arg7[%c0_8, %c0_9, %c0_10, %c0_11] : memref<1x18x32x128xbf16, #tpu.memory_space<vmem>>, vector<1x18x8x128xbf16>
    tpu.vector_store %arg7[%c0_8, %c0_9, %c0_10, %c0_11], %3 {strides = array<i32>} : memref<1x18x32x128xbf16, #tpu.memory_space<vmem>>, vector<1x18x8x128xbf16>,
    %c0_12 = arith.constant 0 : index
    %c0_13 = arith.constant 0 : index
    %c24 = arith.constant 24 : index
    %c0_14 = arith.constant 0 : index
    %6 = vector.load %arg7[%c0_12, %c0_13, %c24, %c0_14] : memref<1x18x32x128xbf16, #tpu.memory_space<vmem>>, vector<1x18x8x128xbf16>
    tpu.vector_store %arg7[%c0_12, %c0_13, %c24, %c0_14], %4 {strides = array<i32>} : memref<1x18x32x128xbf16, #tpu.memory_space<vmem>>, vector<1x18x8x128xbf16>,
    %cst_15 = arith.constant 0.000000e+00 : bf16
    %7 = vector.broadcast %cst_15 : bf16 to vector<1x1x32x128xbf16>
    %c0_16 = arith.constant 0 : index
    %c0_17 = arith.constant 0 : index
    %c0_18 = arith.constant 0 : index
    %c0_19 = arith.constant 0 : index
    %8 = vector.load %arg8[%c0_16, %c0_17, %c0_18, %c0_19] : memref<1x18x32x128xbf16, #tpu.memory_space<vmem>>, vector<1x1x32x128xbf16>
    tpu.vector_store %arg8[%c0_16, %c0_17, %c0_18, %c0_19], %7 {strides = array<i32>} : memref<1x18x32x128xbf16, #tpu.memory_space<vmem>>, vector<1x1x32x128xbf16>,
    %c0_20 = arith.constant 0 : index
    %c17_21 = arith.constant 17 : index
    %c0_22 = arith.constant 0 : index
    %c0_23 = arith.constant 0 : index
    %9 = vector.load %arg8[%c0_20, %c17_21, %c0_22, %c0_23] : memref<1x18x32x128xbf16, #tpu.memory_space<vmem>>, vector<1x1x32x128xbf16>
    tpu.vector_store %arg8[%c0_20, %c17_21, %c0_22, %c0_23], %7 {strides = array<i32>} : memref<1x18x32x128xbf16, #tpu.memory_space<vmem>>, vector<1x1x32x128xbf16>,
    %cst_24 = arith.constant 0.000000e+00 : bf16
    %10 = vector.broadcast %cst_24 : bf16 to vector<1x18x8x128xbf16>
    %cst_25 = arith.constant 0.000000e+00 : bf16
    %11 = vector.broadcast %cst_25 : bf16 to vector<1x18x8x128xbf16>
    %c0_26 = arith.constant 0 : index
    %c0_27 = arith.constant 0 : index
    %c0_28 = arith.constant 0 : index
    %c0_29 = arith.constant 0 : index
    %12 = vector.load %arg8[%c0_26, %c0_27, %c0_28, %c0_29] : memref<1x18x32x128xbf16, #tpu.memory_space<vmem>>, vector<1x18x8x128xbf16>
    tpu.vector_store %arg8[%c0_26, %c0_27, %c0_28, %c0_29], %10 {strides = array<i32>} : memref<1x18x32x128xbf16, #tpu.memory_space<vmem>>, vector<1x18x8x128xbf16>,
    %c0_30 = arith.constant 0 : index
    %c0_31 = arith.constant 0 : index
    %c24_32 = arith.constant 24 : index
    %c0_33 = arith.constant 0 : index
    %13 = vector.load %arg8[%c0_30, %c0_31, %c24_32, %c0_33] : memref<1x18x32x128xbf16, #tpu.memory_space<vmem>>, vector<1x18x8x128xbf16>
    tpu.vector_store %arg8[%c0_30, %c0_31, %c24_32, %c0_33], %11 {strides = array<i32>} : memref<1x18x32x128xbf16, #tpu.memory_space<vmem>>, vector<1x18x8x128xbf16>,
    %c0_34 = arith.constant 0 : index
    %c0_35 = arith.constant 0 : index
    %c0_36 = arith.constant 0 : index
    %c0_37 = arith.constant 0 : index
    %14 = vector.load %arg1[%c0_34, %c0_35, %c0_36, %c0_37] : memref<1x16x16x128xf32, #tpu.memory_space<vmem>>, vector<1x16x16x128xf32>
    %15 = arith.truncf %14 : vector<1x16x16x128xf32> to vector<1x16x16x128xbf16>
    %c0_38 = arith.constant 0 : index
    %c1 = arith.constant 1 : index
    %c8 = arith.constant 8 : index
    %c0_39 = arith.constant 0 : index
    %16 = vector.load %arg7[%c0_38, %c1, %c8, %c0_39] : memref<1x18x32x128xbf16, #tpu.memory_space<vmem>>, vector<1x16x16x128xbf16>
    tpu.vector_store %arg7[%c0_38, %c1, %c8, %c0_39], %15 {strides = array<i32>} : memref<1x18x32x128xbf16, #tpu.memory_space<vmem>>, vector<1x16x16x128xbf16>,
    %cst_40 = arith.constant 0.000000e+00 : f32
    %17 = vector.broadcast %cst_40 : f32 to vector<128x128xf32>
    %c0_41 = arith.constant 0 : index
    %c0_42 = arith.constant 0 : index
    %c7 = arith.constant 7 : index
    %c0_43 = arith.constant 0 : index
    %18 = vector.load %arg7[%c0_41, %c0_42, %c7, %c0_43] : memref<1x18x32x128xbf16, #tpu.memory_space<vmem>>, vector<1x10x16x128xbf16>
    %19 = vector.shape_cast %18 : vector<1x10x16x128xbf16> to vector<10x16x128xbf16>
    %20 = vector.extract_strided_slice %19 {offsets = [0, 0, 0], sizes = [8, 16, 128], strides = [1, 1, 1]} : vector<10x16x128xbf16> to vector<8x16x128xbf16>
    %21 = vector.shape_cast %20 : vector<8x16x128xbf16> to vector<128x128xbf16>
    %c0_44 = arith.constant 0 : index
    %c0_45 = arith.constant 0 : index
    %c0_46 = arith.constant 0 : index
    %22 = vector.load %arg2[%c0_44, %c0_45, %c0_46] : memref<9x128x128xbf16, #tpu.memory_space<vmem>>, vector<1x128x128xbf16>
    %23 = vector.shape_cast %22 : vector<1x128x128xbf16> to vector<128x128xbf16>
    %cst_47 = arith.constant dense<0.000000e+00> : vector<128x128xf32>
    %24 = tpu.matmul %21, %23, %cst_47 {dimension_numbers = #tpu.dot_dimension_numbers<[1], [0], [0], [1], [0, 0, 1, 1], [], []>} : vector<128x128xbf16>, vector<128x128xbf16>, vector<128x128xf32> -> vector<128x128xf32>
    %25 = arith.addf %17, %24 : vector<128x128xf32>
    %26 = vector.extract_strided_slice %19 {offsets = [1, 0, 0], sizes = [8, 16, 128], strides = [1, 1, 1]} : vector<10x16x128xbf16> to vector<8x16x128xbf16>
    %27 = vector.shape_cast %26 : vector<8x16x128xbf16> to vector<128x128xbf16>
    %c3 = arith.constant 3 : index
    %c0_48 = arith.constant 0 : index
    %c0_49 = arith.constant 0 : index
    %28 = vector.load %arg2[%c3, %c0_48, %c0_49] : memref<9x128x128xbf16, #tpu.memory_space<vmem>>, vector<1x128x128xbf16>
    %29 = vector.shape_cast %28 : vector<1x128x128xbf16> to vector<128x128xbf16>
    %cst_50 = arith.constant dense<0.000000e+00> : vector<128x128xf32>
    %30 = tpu.matmul %27, %29, %cst_50 {dimension_numbers = #tpu.dot_dimension_numbers<[1], [0], [0], [1], [0, 0, 1, 1], [], []>} : vector<128x128xbf16>, vector<128x128xbf16>, vector<128x128xf32> -> vector<128x128xf32>
    %31 = arith.addf %25, %30 : vector<128x128xf32>
    %32 = vector.extract_strided_slice %19 {offsets = [2, 0, 0], sizes = [8, 16, 128], strides = [1, 1, 1]} : vector<10x16x128xbf16> to vector<8x16x128xbf16>
    %33 = vector.shape_cast %32 : vector<8x16x128xbf16> to vector<128x128xbf16>
    %c6 = arith.constant 6 : index
    %c0_51 = arith.constant 0 : index
    %c0_52 = arith.constant 0 : index
    %34 = vector.load %arg2[%c6, %c0_51, %c0_52] : memref<9x128x128xbf16, #tpu.memory_space<vmem>>, vector<1x128x128xbf16>
    %35 = vector.shape_cast %34 : vector<1x128x128xbf16> to vector<128x128xbf16>
    %cst_53 = arith.constant dense<0.000000e+00> : vector<128x128xf32>
    %36 = tpu.matmul %33, %35, %cst_53 {dimension_numbers = #tpu.dot_dimension_numbers<[1], [0], [0], [1], [0, 0, 1, 1], [], []>} : vector<128x128xbf16>, vector<128x128xbf16>, vector<128x128xf32> -> vector<128x128xf32>
    %37 = arith.addf %31, %36 : vector<128x128xf32>
    %c0_54 = arith.constant 0 : index
    %c0_55 = arith.constant 0 : index
    %c8_56 = arith.constant 8 : index
    %c0_57 = arith.constant 0 : index
    %38 = vector.load %arg7[%c0_54, %c0_55, %c8_56, %c0_57] : memref<1x18x32x128xbf16, #tpu.memory_space<vmem>>, vector<1x10x16x128xbf16>
    %39 = vector.shape_cast %38 : vector<1x10x16x128xbf16> to vector<10x16x128xbf16>
    %40 = vector.extract_strided_slice %39 {offsets = [0, 0, 0], sizes = [8, 16, 128], strides = [1, 1, 1]} : vector<10x16x128xbf16> to vector<8x16x128xbf16>
    %41 = vector.shape_cast %40 : vector<8x16x128xbf16> to vector<128x128xbf16>
    %c1_58 = arith.constant 1 : index
    %c0_59 = arith.constant 0 : index
    %c0_60 = arith.constant 0 : index
    %42 = vector.load %arg2[%c1_58, %c0_59, %c0_60] : memref<9x128x128xbf16, #tpu.memory_space<vmem>>, vector<1x128x128xbf16>
    %43 = vector.shape_cast %42 : vector<1x128x128xbf16> to vector<128x128xbf16>
    %cst_61 = arith.constant dense<0.000000e+00> : vector<128x128xf32>
    %44 = tpu.matmul %41, %43, %cst_61 {dimension_numbers = #tpu.dot_dimension_numbers<[1], [0], [0], [1], [0, 0, 1, 1], [], []>} : vector<128x128xbf16>, vector<128x128xbf16>, vector<128x128xf32> -> vector<128x128xf32>
    %45 = arith.addf %37, %44 : vector<128x128xf32>
    %46 = vector.extract_strided_slice %39 {offsets = [1, 0, 0], sizes = [8, 16, 128], strides = [1, 1, 1]} : vector<10x16x128xbf16> to vector<8x16x128xbf16>
    %47 = vector.shape_cast %46 : vector<8x16x128xbf16> to vector<128x128xbf16>
    %c4 = arith.constant 4 : index
    %c0_62 = arith.constant 0 : index
    %c0_63 = arith.constant 0 : index
    %48 = vector.load %arg2[%c4, %c0_62, %c0_63] : memref<9x128x128xbf16, #tpu.memory_space<vmem>>, vector<1x128x128xbf16>
    %49 = vector.shape_cast %48 : vector<1x128x128xbf16> to vector<128x128xbf16>
    %cst_64 = arith.constant dense<0.000000e+00> : vector<128x128xf32>
    %50 = tpu.matmul %47, %49, %cst_64 {dimension_numbers = #tpu.dot_dimension_numbers<[1], [0], [0], [1], [0, 0, 1, 1], [], []>} : vector<128x128xbf16>, vector<128x128xbf16>, vector<128x128xf32> -> vector<128x128xf32>
    %51 = arith.addf %45, %50 : vector<128x128xf32>
    %52 = vector.extract_strided_slice %39 {offsets = [2, 0, 0], sizes = [8, 16, 128], strides = [1, 1, 1]} : vector<10x16x128xbf16> to vector<8x16x128xbf16>
    %53 = vector.shape_cast %52 : vector<8x16x128xbf16> to vector<128x128xbf16>
    %c7_65 = arith.constant 7 : index
    %c0_66 = arith.constant 0 : index
    %c0_67 = arith.constant 0 : index
    %54 = vector.load %arg2[%c7_65, %c0_66, %c0_67] : memref<9x128x128xbf16, #tpu.memory_space<vmem>>, vector<1x128x128xbf16>
    %55 = vector.shape_cast %54 : vector<1x128x128xbf16> to vector<128x128xbf16>
    %cst_68 = arith.constant dense<0.000000e+00> : vector<128x128xf32>
    %56 = tpu.matmul %53, %55, %cst_68 {dimension_numbers = #tpu.dot_dimension_numbers<[1], [0], [0], [1], [0, 0, 1, 1], [], []>} : vector<128x128xbf16>, vector<128x128xbf16>, vector<128x128xf32> -> vector<128x128xf32>
    %57 = arith.addf %51, %56 : vector<128x128xf32>
    %c0_69 = arith.constant 0 : index
    %c0_70 = arith.constant 0 : index
    %c9 = arith.constant 9 : index
    %c0_71 = arith.constant 0 : index
    %58 = vector.load %arg7[%c0_69, %c0_70, %c9, %c0_71] : memref<1x18x32x128xbf16, #tpu.memory_space<vmem>>, vector<1x10x16x128xbf16>
    %59 = vector.shape_cast %58 : vector<1x10x16x128xbf16> to vector<10x16x128xbf16>
    %60 = vector.extract_strided_slice %59 {offsets = [0, 0, 0], sizes = [8, 16, 128], strides = [1, 1, 1]} : vector<10x16x128xbf16> to vector<8x16x128xbf16>
    %61 = vector.shape_cast %60 : vector<8x16x128xbf16> to vector<128x128xbf16>
    %c2 = arith.constant 2 : index
    %c0_72 = arith.constant 0 : index
    %c0_73 = arith.constant 0 : index
    %62 = vector.load %arg2[%c2, %c0_72, %c0_73] : memref<9x128x128xbf16, #tpu.memory_space<vmem>>, vector<1x128x128xbf16>
    %63 = vector.shape_cast %62 : vector<1x128x128xbf16> to vector<128x128xbf16>
    %cst_74 = arith.constant dense<0.000000e+00> : vector<128x128xf32>
    %64 = tpu.matmul %61, %63, %cst_74 {dimension_numbers = #tpu.dot_dimension_numbers<[1], [0], [0], [1], [0, 0, 1, 1], [], []>} : vector<128x128xbf16>, vector<128x128xbf16>, vector<128x128xf32> -> vector<128x128xf32>
    %65 = arith.addf %57, %64 : vector<128x128xf32>
    %66 = vector.extract_strided_slice %59 {offsets = [1, 0, 0], sizes = [8, 16, 128], strides = [1, 1, 1]} : vector<10x16x128xbf16> to vector<8x16x128xbf16>
    %67 = vector.shape_cast %66 : vector<8x16x128xbf16> to vector<128x128xbf16>
    %c5 = arith.constant 5 : index
    %c0_75 = arith.constant 0 : index
    %c0_76 = arith.constant 0 : index
    %68 = vector.load %arg2[%c5, %c0_75, %c0_76] : memref<9x128x128xbf16, #tpu.memory_space<vmem>>, vector<1x128x128xbf16>
    %69 = vector.shape_cast %68 : vector<1x128x128xbf16> to vector<128x128xbf16>
    %cst_77 = arith.constant dense<0.000000e+00> : vector<128x128xf32>
    %70 = tpu.matmul %67, %69, %cst_77 {dimension_numbers = #tpu.dot_dimension_numbers<[1], [0], [0], [1], [0, 0, 1, 1], [], []>} : vector<128x128xbf16>, vector<128x128xbf16>, vector<128x128xf32> -> vector<128x128xf32>
    %71 = arith.addf %65, %70 : vector<128x128xf32>
    %72 = vector.extract_strided_slice %59 {offsets = [2, 0, 0], sizes = [8, 16, 128], strides = [1, 1, 1]} : vector<10x16x128xbf16> to vector<8x16x128xbf16>
    %73 = vector.shape_cast %72 : vector<8x16x128xbf16> to vector<128x128xbf16>
    %c8_78 = arith.constant 8 : index
    %c0_79 = arith.constant 0 : index
    %c0_80 = arith.constant 0 : index
    %74 = vector.load %arg2[%c8_78, %c0_79, %c0_80] : memref<9x128x128xbf16, #tpu.memory_space<vmem>>, vector<1x128x128xbf16>
    %75 = vector.shape_cast %74 : vector<1x128x128xbf16> to vector<128x128xbf16>
    %cst_81 = arith.constant dense<0.000000e+00> : vector<128x128xf32>
    %76 = tpu.matmul %73, %75, %cst_81 {dimension_numbers = #tpu.dot_dimension_numbers<[1], [0], [0], [1], [0, 0, 1, 1], [], []>} : vector<128x128xbf16>, vector<128x128xbf16>, vector<128x128xf32> -> vector<128x128xf32>
    %77 = arith.addf %71, %76 : vector<128x128xf32>
    %c0_82 = arith.constant 0 : index
    %c0_83 = arith.constant 0 : index
    %78 = vector.load %arg3[%c0_82, %c0_83] : memref<1x128xf32, #tpu.memory_space<vmem>>, vector<1x128xf32>
    %79 = vector.broadcast %78 : vector<1x128xf32> to vector<128x128xf32>
    %80 = arith.addf %77, %79 : vector<128x128xf32>
    %cst_84 = arith.constant 0.000000e+00 : f32
    %81 = vector.broadcast %cst_84 : f32 to vector<128x128xf32>
    %82 = arith.maximumf %80, %81 : vector<128x128xf32>
    %83 = vector.shape_cast %82 : vector<128x128xf32> to vector<8x16x128xf32>
    %84 = arith.truncf %83 : vector<8x16x128xf32> to vector<8x16x128xbf16>
    %c0_85 = arith.constant 0 : index
    %c1_86 = arith.constant 1 : index
    %c8_87 = arith.constant 8 : index
    %c0_88 = arith.constant 0 : index
    %85 = vector.load %arg8[%c0_85, %c1_86, %c8_87, %c0_88] : memref<1x18x32x128xbf16, #tpu.memory_space<vmem>>, vector<1x8x16x128xbf16>
    %86 = vector.shape_cast %85 : vector<1x8x16x128xbf16> to vector<8x16x128xbf16>
    %87 = vector.shape_cast %84 : vector<8x16x128xbf16> to vector<1x8x16x128xbf16>
    tpu.vector_store %arg8[%c0_85, %c1_86, %c8_87, %c0_88], %87 {strides = array<i32>} : memref<1x18x32x128xbf16, #tpu.memory_space<vmem>>, vector<1x8x16x128xbf16>,
    %cst_89 = arith.constant 0.000000e+00 : f32
    %88 = vector.broadcast %cst_89 : f32 to vector<128x128xf32>
    %c0_90 = arith.constant 0 : index
    %c8_91 = arith.constant 8 : index
    %c7_92 = arith.constant 7 : index
    %c0_93 = arith.constant 0 : index
    %89 = vector.load %arg7[%c0_90, %c8_91, %c7_92, %c0_93] : memref<1x18x32x128xbf16, #tpu.memory_space<vmem>>, vector<1x10x16x128xbf16>
    %90 = vector.shape_cast %89 : vector<1x10x16x128xbf16> to vector<10x16x128xbf16>
    %91 = vector.extract_strided_slice %90 {offsets = [0, 0, 0], sizes = [8, 16, 128], strides = [1, 1, 1]} : vector<10x16x128xbf16> to vector<8x16x128xbf16>
    %92 = vector.shape_cast %91 : vector<8x16x128xbf16> to vector<128x128xbf16>
    %c0_94 = arith.constant 0 : index
    %c0_95 = arith.constant 0 : index
    %c0_96 = arith.constant 0 : index
    %93 = vector.load %arg2[%c0_94, %c0_95, %c0_96] : memref<9x128x128xbf16, #tpu.memory_space<vmem>>, vector<1x128x128xbf16>
    %94 = vector.shape_cast %93 : vector<1x128x128xbf16> to vector<128x128xbf16>
    %cst_97 = arith.constant dense<0.000000e+00> : vector<128x128xf32>
    %95 = tpu.matmul %92, %94, %cst_97 {dimension_numbers = #tpu.dot_dimension_numbers<[1], [0], [0], [1], [0, 0, 1, 1], [], []>} : vector<128x128xbf16>, vector<128x128xbf16>, vector<128x128xf32> -> vector<128x128xf32>
    %96 = arith.addf %88, %95 : vector<128x128xf32>
    %97 = vector.extract_strided_slice %90 {offsets = [1, 0, 0], sizes = [8, 16, 128], strides = [1, 1, 1]} : vector<10x16x128xbf16> to vector<8x16x128xbf16>
    %98 = vector.shape_cast %97 : vector<8x16x128xbf16> to vector<128x128xbf16>
    %c3_98 = arith.constant 3 : index
    %c0_99 = arith.constant 0 : index
    %c0_100 = arith.constant 0 : index
    %99 = vector.load %arg2[%c3_98, %c0_99, %c0_100] : memref<9x128x128xbf16, #tpu.memory_space<vmem>>, vector<1x128x128xbf16>
    %100 = vector.shape_cast %99 : vector<1x128x128xbf16> to vector<128x128xbf16>
    %cst_101 = arith.constant dense<0.000000e+00> : vector<128x128xf32>
    %101 = tpu.matmul %98, %100, %cst_101 {dimension_numbers = #tpu.dot_dimension_numbers<[1], [0], [0], [1], [0, 0, 1, 1], [], []>} : vector<128x128xbf16>, vector<128x128xbf16>, vector<128x128xf32> -> vector<128x128xf32>
    %102 = arith.addf %96, %101 : vector<128x128xf32>
    %103 = vector.extract_strided_slice %90 {offsets = [2, 0, 0], sizes = [8, 16, 128], strides = [1, 1, 1]} : vector<10x16x128xbf16> to vector<8x16x128xbf16>
    %104 = vector.shape_cast %103 : vector<8x16x128xbf16> to vector<128x128xbf16>
    %c6_102 = arith.constant 6 : index
    %c0_103 = arith.constant 0 : index
    %c0_104 = arith.constant 0 : index
    %105 = vector.load %arg2[%c6_102, %c0_103, %c0_104] : memref<9x128x128xbf16, #tpu.memory_space<vmem>>, vector<1x128x128xbf16>
    %106 = vector.shape_cast %105 : vector<1x128x128xbf16> to vector<128x128xbf16>
    %cst_105 = arith.constant dense<0.000000e+00> : vector<128x128xf32>
    %107 = tpu.matmul %104, %106, %cst_105 {dimension_numbers = #tpu.dot_dimension_numbers<[1], [0], [0], [1], [0, 0, 1, 1], [], []>} : vector<128x128xbf16>, vector<128x128xbf16>, vector<128x128xf32> -> vector<128x128xf32>
    %108 = arith.addf %102, %107 : vector<128x128xf32>
    %c0_106 = arith.constant 0 : index
    %c8_107 = arith.constant 8 : index
    %c8_108 = arith.constant 8 : index
    %c0_109 = arith.constant 0 : index
    %109 = vector.load %arg7[%c0_106, %c8_107, %c8_108, %c0_109] : memref<1x18x32x128xbf16, #tpu.memory_space<vmem>>, vector<1x10x16x128xbf16>
    %110 = vector.shape_cast %109 : vector<1x10x16x128xbf16> to vector<10x16x128xbf16>
    %111 = vector.extract_strided_slice %110 {offsets = [0, 0, 0], sizes = [8, 16, 128], strides = [1, 1, 1]} : vector<10x16x128xbf16> to vector<8x16x128xbf16>
    %112 = vector.shape_cast %111 : vector<8x16x128xbf16> to vector<128x128xbf16>
    %c1_110 = arith.constant 1 : index
    %c0_111 = arith.constant 0 : index
    %c0_112 = arith.constant 0 : index
    %113 = vector.load %arg2[%c1_110, %c0_111, %c0_112] : memref<9x128x128xbf16, #tpu.memory_space<vmem>>, vector<1x128x128xbf16>
    %114 = vector.shape_cast %113 : vector<1x128x128xbf16> to vector<128x128xbf16>
    %cst_113 = arith.constant dense<0.000000e+00> : vector<128x128xf32>
    %115 = tpu.matmul %112, %114, %cst_113 {dimension_numbers = #tpu.dot_dimension_numbers<[1], [0], [0], [1], [0, 0, 1, 1], [], []>} : vector<128x128xbf16>, vector<128x128xbf16>, vector<128x128xf32> -> vector<128x128xf32>
    %116 = arith.addf %108, %115 : vector<128x128xf32>
    %117 = vector.extract_strided_slice %110 {offsets = [1, 0, 0], sizes = [8, 16, 128], strides = [1, 1, 1]} : vector<10x16x128xbf16> to vector<8x16x128xbf16>
    %118 = vector.shape_cast %117 : vector<8x16x128xbf16> to vector<128x128xbf16>
    %c4_114 = arith.constant 4 : index
    %c0_115 = arith.constant 0 : index
    %c0_116 = arith.constant 0 : index
    %119 = vector.load %arg2[%c4_114, %c0_115, %c0_116] : memref<9x128x128xbf16, #tpu.memory_space<vmem>>, vector<1x128x128xbf16>
    %120 = vector.shape_cast %119 : vector<1x128x128xbf16> to vector<128x128xbf16>
    %cst_117 = arith.constant dense<0.000000e+00> : vector<128x128xf32>
    %121 = tpu.matmul %118, %120, %cst_117 {dimension_numbers = #tpu.dot_dimension_numbers<[1], [0], [0], [1], [0, 0, 1, 1], [], []>} : vector<128x128xbf16>, vector<128x128xbf16>, vector<128x128xf32> -> vector<128x128xf32>
    %122 = arith.addf %116, %121 : vector<128x128xf32>
    %123 = vector.extract_strided_slice %110 {offsets = [2, 0, 0], sizes = [8, 16, 128], strides = [1, 1, 1]} : vector<10x16x128xbf16> to vector<8x16x128xbf16>
    %124 = vector.shape_cast %123 : vector<8x16x128xbf16> to vector<128x128xbf16>
    %c7_118 = arith.constant 7 : index
    %c0_119 = arith.constant 0 : index
    %c0_120 = arith.constant 0 : index
    %125 = vector.load %arg2[%c7_118, %c0_119, %c0_120] : memref<9x128x128xbf16, #tpu.memory_space<vmem>>, vector<1x128x128xbf16>
    %126 = vector.shape_cast %125 : vector<1x128x128xbf16> to vector<128x128xbf16>
    %cst_121 = arith.constant dense<0.000000e+00> : vector<128x128xf32>
    %127 = tpu.matmul %124, %126, %cst_121 {dimension_numbers = #tpu.dot_dimension_numbers<[1], [0], [0], [1], [0, 0, 1, 1], [], []>} : vector<128x128xbf16>, vector<128x128xbf16>, vector<128x128xf32> -> vector<128x128xf32>
    %128 = arith.addf %122, %127 : vector<128x128xf32>
    %c0_122 = arith.constant 0 : index
    %c8_123 = arith.constant 8 : index
    %c9_124 = arith.constant 9 : index
    %c0_125 = arith.constant 0 : index
    %129 = vector.load %arg7[%c0_122, %c8_123, %c9_124, %c0_125] : memref<1x18x32x128xbf16, #tpu.memory_space<vmem>>, vector<1x10x16x128xbf16>
    %130 = vector.shape_cast %129 : vector<1x10x16x128xbf16> to vector<10x16x128xbf16>
    %131 = vector.extract_strided_slice %130 {offsets = [0, 0, 0], sizes = [8, 16, 128], strides = [1, 1, 1]} : vector<10x16x128xbf16> to vector<8x16x128xbf16>
    %132 = vector.shape_cast %131 : vector<8x16x128xbf16> to vector<128x128xbf16>
    %c2_126 = arith.constant 2 : index
    %c0_127 = arith.constant 0 : index
    %c0_128 = arith.constant 0 : index
    %133 = vector.load %arg2[%c2_126, %c0_127, %c0_128] : memref<9x128x128xbf16, #tpu.memory_space<vmem>>, vector<1x128x128xbf16>
    %134 = vector.shape_cast %133 : vector<1x128x128xbf16> to vector<128x128xbf16>
    %cst_129 = arith.constant dense<0.000000e+00> : vector<128x128xf32>
    %135 = tpu.matmul %132, %134, %cst_129 {dimension_numbers = #tpu.dot_dimension_numbers<[1], [0], [0], [1], [0, 0, 1, 1], [], []>} : vector<128x128xbf16>, vector<128x128xbf16>, vector<128x128xf32> -> vector<128x128xf32>
    %136 = arith.addf %128, %135 : vector<128x128xf32>
    %137 = vector.extract_strided_slice %130 {offsets = [1, 0, 0], sizes = [8, 16, 128], strides = [1, 1, 1]} : vector<10x16x128xbf16> to vector<8x16x128xbf16>
    %138 = vector.shape_cast %137 : vector<8x16x128xbf16> to vector<128x128xbf16>
    %c5_130 = arith.constant 5 : index
    %c0_131 = arith.constant 0 : index
    %c0_132 = arith.constant 0 : index
    %139 = vector.load %arg2[%c5_130, %c0_131, %c0_132] : memref<9x128x128xbf16, #tpu.memory_space<vmem>>, vector<1x128x128xbf16>
    %140 = vector.shape_cast %139 : vector<1x128x128xbf16> to vector<128x128xbf16>
    %cst_133 = arith.constant dense<0.000000e+00> : vector<128x128xf32>
    %141 = tpu.matmul %138, %140, %cst_133 {dimension_numbers = #tpu.dot_dimension_numbers<[1], [0], [0], [1], [0, 0, 1, 1], [], []>} : vector<128x128xbf16>, vector<128x128xbf16>, vector<128x128xf32> -> vector<128x128xf32>
    %142 = arith.addf %136, %141 : vector<128x128xf32>
    %143 = vector.extract_strided_slice %130 {offsets = [2, 0, 0], sizes = [8, 16, 128], strides = [1, 1, 1]} : vector<10x16x128xbf16> to vector<8x16x128xbf16>
    %144 = vector.shape_cast %143 : vector<8x16x128xbf16> to vector<128x128xbf16>
    %c8_134 = arith.constant 8 : index
    %c0_135 = arith.constant 0 : index
    %c0_136 = arith.constant 0 : index
    %145 = vector.load %arg2[%c8_134, %c0_135, %c0_136] : memref<9x128x128xbf16, #tpu.memory_space<vmem>>, vector<1x128x128xbf16>
    %146 = vector.shape_cast %145 : vector<1x128x128xbf16> to vector<128x128xbf16>
    %cst_137 = arith.constant dense<0.000000e+00> : vector<128x128xf32>
    %147 = tpu.matmul %144, %146, %cst_137 {dimension_numbers = #tpu.dot_dimension_numbers<[1], [0], [0], [1], [0, 0, 1, 1], [], []>} : vector<128x128xbf16>, vector<128x128xbf16>, vector<128x128xf32> -> vector<128x128xf32>
    %148 = arith.addf %142, %147 : vector<128x128xf32>
    %c0_138 = arith.constant 0 : index
    %c0_139 = arith.constant 0 : index
    %149 = vector.load %arg3[%c0_138, %c0_139] : memref<1x128xf32, #tpu.memory_space<vmem>>, vector<1x128xf32>
    %150 = vector.broadcast %149 : vector<1x128xf32> to vector<128x128xf32>
    %151 = arith.addf %148, %150 : vector<128x128xf32>
    %cst_140 = arith.constant 0.000000e+00 : f32
    %152 = vector.broadcast %cst_140 : f32 to vector<128x128xf32>
    %153 = arith.maximumf %151, %152 : vector<128x128xf32>
    %154 = vector.shape_cast %153 : vector<128x128xf32> to vector<8x16x128xf32>
    %155 = arith.truncf %154 : vector<8x16x128xf32> to vector<8x16x128xbf16>
    %c0_141 = arith.constant 0 : index
    %c9_142 = arith.constant 9 : index
    %c8_143 = arith.constant 8 : index
    %c0_144 = arith.constant 0 : index
    %156 = vector.load %arg8[%c0_141, %c9_142, %c8_143, %c0_144] : memref<1x18x32x128xbf16, #tpu.memory_space<vmem>>, vector<1x8x16x128xbf16>
    %157 = vector.shape_cast %156 : vector<1x8x16x128xbf16> to vector<8x16x128xbf16>
    %158 = vector.shape_cast %155 : vector<8x16x128xbf16> to vector<1x8x16x128xbf16>
    tpu.vector_store %arg8[%c0_141, %c9_142, %c8_143, %c0_144], %158 {strides = array<i32>} : memref<1x18x32x128xbf16, #tpu.memory_space<vmem>>, vector<1x8x16x128xbf16>,
    %cst_145 = arith.constant 0.000000e+00 : f32
    %159 = vector.broadcast %cst_145 : f32 to vector<128x128xf32>
    %c0_146 = arith.constant 0 : index
    %c0_147 = arith.constant 0 : index
    %c7_148 = arith.constant 7 : index
    %c0_149 = arith.constant 0 : index
    %160 = vector.load %arg8[%c0_146, %c0_147, %c7_148, %c0_149] : memref<1x18x32x128xbf16, #tpu.memory_space<vmem>>, vector<1x10x16x128xbf16>
    %161 = vector.shape_cast %160 : vector<1x10x16x128xbf16> to vector<10x16x128xbf16>
    %162 = vector.extract_strided_slice %161 {offsets = [0, 0, 0], sizes = [8, 16, 128], strides = [1, 1, 1]} : vector<10x16x128xbf16> to vector<8x16x128xbf16>
    %163 = vector.shape_cast %162 : vector<8x16x128xbf16> to vector<128x128xbf16>
    %c0_150 = arith.constant 0 : index
    %c0_151 = arith.constant 0 : index
    %c0_152 = arith.constant 0 : index
    %164 = vector.load %arg4[%c0_150, %c0_151, %c0_152] : memref<9x128x128xbf16, #tpu.memory_space<vmem>>, vector<1x128x128xbf16>
    %165 = vector.shape_cast %164 : vector<1x128x128xbf16> to vector<128x128xbf16>
    %cst_153 = arith.constant dense<0.000000e+00> : vector<128x128xf32>
    %166 = tpu.matmul %163, %165, %cst_153 {dimension_numbers = #tpu.dot_dimension_numbers<[1], [0], [0], [1], [0, 0, 1, 1], [], []>} : vector<128x128xbf16>, vector<128x128xbf16>, vector<128x128xf32> -> vector<128x128xf32>
    %167 = arith.addf %159, %166 : vector<128x128xf32>
    %168 = vector.extract_strided_slice %161 {offsets = [1, 0, 0], sizes = [8, 16, 128], strides = [1, 1, 1]} : vector<10x16x128xbf16> to vector<8x16x128xbf16>
    %169 = vector.shape_cast %168 : vector<8x16x128xbf16> to vector<128x128xbf16>
    %c3_154 = arith.constant 3 : index
    %c0_155 = arith.constant 0 : index
    %c0_156 = arith.constant 0 : index
    %170 = vector.load %arg4[%c3_154, %c0_155, %c0_156] : memref<9x128x128xbf16, #tpu.memory_space<vmem>>, vector<1x128x128xbf16>
    %171 = vector.shape_cast %170 : vector<1x128x128xbf16> to vector<128x128xbf16>
    %cst_157 = arith.constant dense<0.000000e+00> : vector<128x128xf32>
    %172 = tpu.matmul %169, %171, %cst_157 {dimension_numbers = #tpu.dot_dimension_numbers<[1], [0], [0], [1], [0, 0, 1, 1], [], []>} : vector<128x128xbf16>, vector<128x128xbf16>, vector<128x128xf32> -> vector<128x128xf32>
    %173 = arith.addf %167, %172 : vector<128x128xf32>
    %174 = vector.extract_strided_slice %161 {offsets = [2, 0, 0], sizes = [8, 16, 128], strides = [1, 1, 1]} : vector<10x16x128xbf16> to vector<8x16x128xbf16>
    %175 = vector.shape_cast %174 : vector<8x16x128xbf16> to vector<128x128xbf16>
    %c6_158 = arith.constant 6 : index
    %c0_159 = arith.constant 0 : index
    %c0_160 = arith.constant 0 : index
    %176 = vector.load %arg4[%c6_158, %c0_159, %c0_160] : memref<9x128x128xbf16, #tpu.memory_space<vmem>>, vector<1x128x128xbf16>
    %177 = vector.shape_cast %176 : vector<1x128x128xbf16> to vector<128x128xbf16>
    %cst_161 = arith.constant dense<0.000000e+00> : vector<128x128xf32>
    %178 = tpu.matmul %175, %177, %cst_161 {dimension_numbers = #tpu.dot_dimension_numbers<[1], [0], [0], [1], [0, 0, 1, 1], [], []>} : vector<128x128xbf16>, vector<128x128xbf16>, vector<128x128xf32> -> vector<128x128xf32>
    %179 = arith.addf %173, %178 : vector<128x128xf32>
    %c0_162 = arith.constant 0 : index
    %c0_163 = arith.constant 0 : index
    %c8_164 = arith.constant 8 : index
    %c0_165 = arith.constant 0 : index
    %180 = vector.load %arg8[%c0_162, %c0_163, %c8_164, %c0_165] : memref<1x18x32x128xbf16, #tpu.memory_space<vmem>>, vector<1x10x16x128xbf16>
    %181 = vector.shape_cast %180 : vector<1x10x16x128xbf16> to vector<10x16x128xbf16>
    %182 = vector.extract_strided_slice %181 {offsets = [0, 0, 0], sizes = [8, 16, 128], strides = [1, 1, 1]} : vector<10x16x128xbf16> to vector<8x16x128xbf16>
    %183 = vector.shape_cast %182 : vector<8x16x128xbf16> to vector<128x128xbf16>
    %c1_166 = arith.constant 1 : index
    %c0_167 = arith.constant 0 : index
    %c0_168 = arith.constant 0 : index
    %184 = vector.load %arg4[%c1_166, %c0_167, %c0_168] : memref<9x128x128xbf16, #tpu.memory_space<vmem>>, vector<1x128x128xbf16>
    %185 = vector.shape_cast %184 : vector<1x128x128xbf16> to vector<128x128xbf16>
    %cst_169 = arith.constant dense<0.000000e+00> : vector<128x128xf32>
    %186 = tpu.matmul %183, %185, %cst_169 {dimension_numbers = #tpu.dot_dimension_numbers<[1], [0], [0], [1], [0, 0, 1, 1], [], []>} : vector<128x128xbf16>, vector<128x128xbf16>, vector<128x128xf32> -> vector<128x128xf32>
    %187 = arith.addf %179, %186 : vector<128x128xf32>
    %188 = vector.extract_strided_slice %181 {offsets = [1, 0, 0], sizes = [8, 16, 128], strides = [1, 1, 1]} : vector<10x16x128xbf16> to vector<8x16x128xbf16>
    %189 = vector.shape_cast %188 : vector<8x16x128xbf16> to vector<128x128xbf16>
    %c4_170 = arith.constant 4 : index
    %c0_171 = arith.constant 0 : index
    %c0_172 = arith.constant 0 : index
    %190 = vector.load %arg4[%c4_170, %c0_171, %c0_172] : memref<9x128x128xbf16, #tpu.memory_space<vmem>>, vector<1x128x128xbf16>
    %191 = vector.shape_cast %190 : vector<1x128x128xbf16> to vector<128x128xbf16>
    %cst_173 = arith.constant dense<0.000000e+00> : vector<128x128xf32>
    %192 = tpu.matmul %189, %191, %cst_173 {dimension_numbers = #tpu.dot_dimension_numbers<[1], [0], [0], [1], [0, 0, 1, 1], [], []>} : vector<128x128xbf16>, vector<128x128xbf16>, vector<128x128xf32> -> vector<128x128xf32>
    %193 = arith.addf %187, %192 : vector<128x128xf32>
    %194 = vector.extract_strided_slice %181 {offsets = [2, 0, 0], sizes = [8, 16, 128], strides = [1, 1, 1]} : vector<10x16x128xbf16> to vector<8x16x128xbf16>
    %195 = vector.shape_cast %194 : vector<8x16x128xbf16> to vector<128x128xbf16>
    %c7_174 = arith.constant 7 : index
    %c0_175 = arith.constant 0 : index
    %c0_176 = arith.constant 0 : index
    %196 = vector.load %arg4[%c7_174, %c0_175, %c0_176] : memref<9x128x128xbf16, #tpu.memory_space<vmem>>, vector<1x128x128xbf16>
    %197 = vector.shape_cast %196 : vector<1x128x128xbf16> to vector<128x128xbf16>
    %cst_177 = arith.constant dense<0.000000e+00> : vector<128x128xf32>
    %198 = tpu.matmul %195, %197, %cst_177 {dimension_numbers = #tpu.dot_dimension_numbers<[1], [0], [0], [1], [0, 0, 1, 1], [], []>} : vector<128x128xbf16>, vector<128x128xbf16>, vector<128x128xf32> -> vector<128x128xf32>
    %199 = arith.addf %193, %198 : vector<128x128xf32>
    %c0_178 = arith.constant 0 : index
    %c0_179 = arith.constant 0 : index
    %c9_180 = arith.constant 9 : index
    %c0_181 = arith.constant 0 : index
    %200 = vector.load %arg8[%c0_178, %c0_179, %c9_180, %c0_181] : memref<1x18x32x128xbf16, #tpu.memory_space<vmem>>, vector<1x10x16x128xbf16>
    %201 = vector.shape_cast %200 : vector<1x10x16x128xbf16> to vector<10x16x128xbf16>
    %202 = vector.extract_strided_slice %201 {offsets = [0, 0, 0], sizes = [8, 16, 128], strides = [1, 1, 1]} : vector<10x16x128xbf16> to vector<8x16x128xbf16>
    %203 = vector.shape_cast %202 : vector<8x16x128xbf16> to vector<128x128xbf16>
    %c2_182 = arith.constant 2 : index
    %c0_183 = arith.constant 0 : index
    %c0_184 = arith.constant 0 : index
    %204 = vector.load %arg4[%c2_182, %c0_183, %c0_184] : memref<9x128x128xbf16, #tpu.memory_space<vmem>>, vector<1x128x128xbf16>
    %205 = vector.shape_cast %204 : vector<1x128x128xbf16> to vector<128x128xbf16>
    %cst_185 = arith.constant dense<0.000000e+00> : vector<128x128xf32>
    %206 = tpu.matmul %203, %205, %cst_185 {dimension_numbers = #tpu.dot_dimension_numbers<[1], [0], [0], [1], [0, 0, 1, 1], [], []>} : vector<128x128xbf16>, vector<128x128xbf16>, vector<128x128xf32> -> vector<128x128xf32>
    %207 = arith.addf %199, %206 : vector<128x128xf32>
    %208 = vector.extract_strided_slice %201 {offsets = [1, 0, 0], sizes = [8, 16, 128], strides = [1, 1, 1]} : vector<10x16x128xbf16> to vector<8x16x128xbf16>
    %209 = vector.shape_cast %208 : vector<8x16x128xbf16> to vector<128x128xbf16>
    %c5_186 = arith.constant 5 : index
    %c0_187 = arith.constant 0 : index
    %c0_188 = arith.constant 0 : index
    %210 = vector.load %arg4[%c5_186, %c0_187, %c0_188] : memref<9x128x128xbf16, #tpu.memory_space<vmem>>, vector<1x128x128xbf16>
    %211 = vector.shape_cast %210 : vector<1x128x128xbf16> to vector<128x128xbf16>
    %cst_189 = arith.constant dense<0.000000e+00> : vector<128x128xf32>
    %212 = tpu.matmul %209, %211, %cst_189 {dimension_numbers = #tpu.dot_dimension_numbers<[1], [0], [0], [1], [0, 0, 1, 1], [], []>} : vector<128x128xbf16>, vector<128x128xbf16>, vector<128x128xf32> -> vector<128x128xf32>
    %213 = arith.addf %207, %212 : vector<128x128xf32>
    %214 = vector.extract_strided_slice %201 {offsets = [2, 0, 0], sizes = [8, 16, 128], strides = [1, 1, 1]} : vector<10x16x128xbf16> to vector<8x16x128xbf16>
    %215 = vector.shape_cast %214 : vector<8x16x128xbf16> to vector<128x128xbf16>
    %c8_190 = arith.constant 8 : index
    %c0_191 = arith.constant 0 : index
    %c0_192 = arith.constant 0 : index
    %216 = vector.load %arg4[%c8_190, %c0_191, %c0_192] : memref<9x128x128xbf16, #tpu.memory_space<vmem>>, vector<1x128x128xbf16>
    %217 = vector.shape_cast %216 : vector<1x128x128xbf16> to vector<128x128xbf16>
    %cst_193 = arith.constant dense<0.000000e+00> : vector<128x128xf32>
    %218 = tpu.matmul %215, %217, %cst_193 {dimension_numbers = #tpu.dot_dimension_numbers<[1], [0], [0], [1], [0, 0, 1, 1], [], []>} : vector<128x128xbf16>, vector<128x128xbf16>, vector<128x128xf32> -> vector<128x128xf32>
    %219 = arith.addf %213, %218 : vector<128x128xf32>
    %c0_194 = arith.constant 0 : index
    %c0_195 = arith.constant 0 : index
    %220 = vector.load %arg5[%c0_194, %c0_195] : memref<1x128xf32, #tpu.memory_space<vmem>>, vector<1x128xf32>
    %221 = vector.broadcast %220 : vector<1x128xf32> to vector<128x128xf32>
    %222 = arith.addf %219, %221 : vector<128x128xf32>
    %c0_196 = arith.constant 0 : index
    %c0_197 = arith.constant 0 : index
    %c0_198 = arith.constant 0 : index
    %c0_199 = arith.constant 0 : index
    %223 = vector.load %arg1[%c0_196, %c0_197, %c0_198, %c0_199] : memref<1x16x16x128xf32, #tpu.memory_space<vmem>>, vector<1x8x16x128xf32>
    %224 = vector.shape_cast %223 : vector<1x8x16x128xf32> to vector<8x16x128xf32>
    %225 = vector.shape_cast %224 : vector<8x16x128xf32> to vector<128x128xf32>
    %226 = arith.addf %222, %225 : vector<128x128xf32>
    %cst_200 = arith.constant 0.000000e+00 : f32
    %227 = vector.broadcast %cst_200 : f32 to vector<128x128xf32>
    %228 = arith.maximumf %226, %227 : vector<128x128xf32>
    %229 = vector.shape_cast %228 : vector<128x128xf32> to vector<8x16x128xf32>
    %c0_201 = arith.constant 0 : index
    %c0_202 = arith.constant 0 : index
    %c0_203 = arith.constant 0 : index
    %c0_204 = arith.constant 0 : index
    %230 = vector.load %arg6[%c0_201, %c0_202, %c0_203, %c0_204] : memref<1x16x16x128xf32, #tpu.memory_space<vmem>>, vector<1x8x16x128xf32>
    %231 = vector.shape_cast %230 : vector<1x8x16x128xf32> to vector<8x16x128xf32>
    %232 = vector.shape_cast %229 : vector<8x16x128xf32> to vector<1x8x16x128xf32>
    tpu.vector_store %arg6[%c0_201, %c0_202, %c0_203, %c0_204], %232 {strides = array<i32>} : memref<1x16x16x128xf32, #tpu.memory_space<vmem>>, vector<1x8x16x128xf32>,
    %cst_205 = arith.constant 0.000000e+00 : f32
    %233 = vector.broadcast %cst_205 : f32 to vector<128x128xf32>
    %c0_206 = arith.constant 0 : index
    %c8_207 = arith.constant 8 : index
    %c7_208 = arith.constant 7 : index
    %c0_209 = arith.constant 0 : index
    %234 = vector.load %arg8[%c0_206, %c8_207, %c7_208, %c0_209] : memref<1x18x32x128xbf16, #tpu.memory_space<vmem>>, vector<1x10x16x128xbf16>
    %235 = vector.shape_cast %234 : vector<1x10x16x128xbf16> to vector<10x16x128xbf16>
    %236 = vector.extract_strided_slice %235 {offsets = [0, 0, 0], sizes = [8, 16, 128], strides = [1, 1, 1]} : vector<10x16x128xbf16> to vector<8x16x128xbf16>
    %237 = vector.shape_cast %236 : vector<8x16x128xbf16> to vector<128x128xbf16>
    %c0_210 = arith.constant 0 : index
    %c0_211 = arith.constant 0 : index
    %c0_212 = arith.constant 0 : index
    %238 = vector.load %arg4[%c0_210, %c0_211, %c0_212] : memref<9x128x128xbf16, #tpu.memory_space<vmem>>, vector<1x128x128xbf16>
    %239 = vector.shape_cast %238 : vector<1x128x128xbf16> to vector<128x128xbf16>
    %cst_213 = arith.constant dense<0.000000e+00> : vector<128x128xf32>
    %240 = tpu.matmul %237, %239, %cst_213 {dimension_numbers = #tpu.dot_dimension_numbers<[1], [0], [0], [1], [0, 0, 1, 1], [], []>} : vector<128x128xbf16>, vector<128x128xbf16>, vector<128x128xf32> -> vector<128x128xf32>
    %241 = arith.addf %233, %240 : vector<128x128xf32>
    %242 = vector.extract_strided_slice %235 {offsets = [1, 0, 0], sizes = [8, 16, 128], strides = [1, 1, 1]} : vector<10x16x128xbf16> to vector<8x16x128xbf16>
    %243 = vector.shape_cast %242 : vector<8x16x128xbf16> to vector<128x128xbf16>
    %c3_214 = arith.constant 3 : index
    %c0_215 = arith.constant 0 : index
    %c0_216 = arith.constant 0 : index
    %244 = vector.load %arg4[%c3_214, %c0_215, %c0_216] : memref<9x128x128xbf16, #tpu.memory_space<vmem>>, vector<1x128x128xbf16>
    %245 = vector.shape_cast %244 : vector<1x128x128xbf16> to vector<128x128xbf16>
    %cst_217 = arith.constant dense<0.000000e+00> : vector<128x128xf32>
    %246 = tpu.matmul %243, %245, %cst_217 {dimension_numbers = #tpu.dot_dimension_numbers<[1], [0], [0], [1], [0, 0, 1, 1], [], []>} : vector<128x128xbf16>, vector<128x128xbf16>, vector<128x128xf32> -> vector<128x128xf32>
    %247 = arith.addf %241, %246 : vector<128x128xf32>
    %248 = vector.extract_strided_slice %235 {offsets = [2, 0, 0], sizes = [8, 16, 128], strides = [1, 1, 1]} : vector<10x16x128xbf16> to vector<8x16x128xbf16>
    %249 = vector.shape_cast %248 : vector<8x16x128xbf16> to vector<128x128xbf16>
    %c6_218 = arith.constant 6 : index
    %c0_219 = arith.constant 0 : index
    %c0_220 = arith.constant 0 : index
    %250 = vector.load %arg4[%c6_218, %c0_219, %c0_220] : memref<9x128x128xbf16, #tpu.memory_space<vmem>>, vector<1x128x128xbf16>
    %251 = vector.shape_cast %250 : vector<1x128x128xbf16> to vector<128x128xbf16>
    %cst_221 = arith.constant dense<0.000000e+00> : vector<128x128xf32>
    %252 = tpu.matmul %249, %251, %cst_221 {dimension_numbers = #tpu.dot_dimension_numbers<[1], [0], [0], [1], [0, 0, 1, 1], [], []>} : vector<128x128xbf16>, vector<128x128xbf16>, vector<128x128xf32> -> vector<128x128xf32>
    %253 = arith.addf %247, %252 : vector<128x128xf32>
    %c0_222 = arith.constant 0 : index
    %c8_223 = arith.constant 8 : index
    %c8_224 = arith.constant 8 : index
    %c0_225 = arith.constant 0 : index
    %254 = vector.load %arg8[%c0_222, %c8_223, %c8_224, %c0_225] : memref<1x18x32x128xbf16, #tpu.memory_space<vmem>>, vector<1x10x16x128xbf16>
    %255 = vector.shape_cast %254 : vector<1x10x16x128xbf16> to vector<10x16x128xbf16>
    %256 = vector.extract_strided_slice %255 {offsets = [0, 0, 0], sizes = [8, 16, 128], strides = [1, 1, 1]} : vector<10x16x128xbf16> to vector<8x16x128xbf16>
    %257 = vector.shape_cast %256 : vector<8x16x128xbf16> to vector<128x128xbf16>
    %c1_226 = arith.constant 1 : index
    %c0_227 = arith.constant 0 : index
    %c0_228 = arith.constant 0 : index
    %258 = vector.load %arg4[%c1_226, %c0_227, %c0_228] : memref<9x128x128xbf16, #tpu.memory_space<vmem>>, vector<1x128x128xbf16>
    %259 = vector.shape_cast %258 : vector<1x128x128xbf16> to vector<128x128xbf16>
    %cst_229 = arith.constant dense<0.000000e+00> : vector<128x128xf32>
    %260 = tpu.matmul %257, %259, %cst_229 {dimension_numbers = #tpu.dot_dimension_numbers<[1], [0], [0], [1], [0, 0, 1, 1], [], []>} : vector<128x128xbf16>, vector<128x128xbf16>, vector<128x128xf32> -> vector<128x128xf32>
    %261 = arith.addf %253, %260 : vector<128x128xf32>
    %262 = vector.extract_strided_slice %255 {offsets = [1, 0, 0], sizes = [8, 16, 128], strides = [1, 1, 1]} : vector<10x16x128xbf16> to vector<8x16x128xbf16>
    %263 = vector.shape_cast %262 : vector<8x16x128xbf16> to vector<128x128xbf16>
    %c4_230 = arith.constant 4 : index
    %c0_231 = arith.constant 0 : index
    %c0_232 = arith.constant 0 : index
    %264 = vector.load %arg4[%c4_230, %c0_231, %c0_232] : memref<9x128x128xbf16, #tpu.memory_space<vmem>>, vector<1x128x128xbf16>
    %265 = vector.shape_cast %264 : vector<1x128x128xbf16> to vector<128x128xbf16>
    %cst_233 = arith.constant dense<0.000000e+00> : vector<128x128xf32>
    %266 = tpu.matmul %263, %265, %cst_233 {dimension_numbers = #tpu.dot_dimension_numbers<[1], [0], [0], [1], [0, 0, 1, 1], [], []>} : vector<128x128xbf16>, vector<128x128xbf16>, vector<128x128xf32> -> vector<128x128xf32>
    %267 = arith.addf %261, %266 : vector<128x128xf32>
    %268 = vector.extract_strided_slice %255 {offsets = [2, 0, 0], sizes = [8, 16, 128], strides = [1, 1, 1]} : vector<10x16x128xbf16> to vector<8x16x128xbf16>
    %269 = vector.shape_cast %268 : vector<8x16x128xbf16> to vector<128x128xbf16>
    %c7_234 = arith.constant 7 : index
    %c0_235 = arith.constant 0 : index
    %c0_236 = arith.constant 0 : index
    %270 = vector.load %arg4[%c7_234, %c0_235, %c0_236] : memref<9x128x128xbf16, #tpu.memory_space<vmem>>, vector<1x128x128xbf16>
    %271 = vector.shape_cast %270 : vector<1x128x128xbf16> to vector<128x128xbf16>
    %cst_237 = arith.constant dense<0.000000e+00> : vector<128x128xf32>
    %272 = tpu.matmul %269, %271, %cst_237 {dimension_numbers = #tpu.dot_dimension_numbers<[1], [0], [0], [1], [0, 0, 1, 1], [], []>} : vector<128x128xbf16>, vector<128x128xbf16>, vector<128x128xf32> -> vector<128x128xf32>
    %273 = arith.addf %267, %272 : vector<128x128xf32>
    %c0_238 = arith.constant 0 : index
    %c8_239 = arith.constant 8 : index
    %c9_240 = arith.constant 9 : index
    %c0_241 = arith.constant 0 : index
    %274 = vector.load %arg8[%c0_238, %c8_239, %c9_240, %c0_241] : memref<1x18x32x128xbf16, #tpu.memory_space<vmem>>, vector<1x10x16x128xbf16>
    %275 = vector.shape_cast %274 : vector<1x10x16x128xbf16> to vector<10x16x128xbf16>
    %276 = vector.extract_strided_slice %275 {offsets = [0, 0, 0], sizes = [8, 16, 128], strides = [1, 1, 1]} : vector<10x16x128xbf16> to vector<8x16x128xbf16>
    %277 = vector.shape_cast %276 : vector<8x16x128xbf16> to vector<128x128xbf16>
    %c2_242 = arith.constant 2 : index
    %c0_243 = arith.constant 0 : index
    %c0_244 = arith.constant 0 : index
    %278 = vector.load %arg4[%c2_242, %c0_243, %c0_244] : memref<9x128x128xbf16, #tpu.memory_space<vmem>>, vector<1x128x128xbf16>
    %279 = vector.shape_cast %278 : vector<1x128x128xbf16> to vector<128x128xbf16>
    %cst_245 = arith.constant dense<0.000000e+00> : vector<128x128xf32>
    %280 = tpu.matmul %277, %279, %cst_245 {dimension_numbers = #tpu.dot_dimension_numbers<[1], [0], [0], [1], [0, 0, 1, 1], [], []>} : vector<128x128xbf16>, vector<128x128xbf16>, vector<128x128xf32> -> vector<128x128xf32>
    %281 = arith.addf %273, %280 : vector<128x128xf32>
    %282 = vector.extract_strided_slice %275 {offsets = [1, 0, 0], sizes = [8, 16, 128], strides = [1, 1, 1]} : vector<10x16x128xbf16> to vector<8x16x128xbf16>
    %283 = vector.shape_cast %282 : vector<8x16x128xbf16> to vector<128x128xbf16>
    %c5_246 = arith.constant 5 : index
    %c0_247 = arith.constant 0 : index
    %c0_248 = arith.constant 0 : index
    %284 = vector.load %arg4[%c5_246, %c0_247, %c0_248] : memref<9x128x128xbf16, #tpu.memory_space<vmem>>, vector<1x128x128xbf16>
    %285 = vector.shape_cast %284 : vector<1x128x128xbf16> to vector<128x128xbf16>
    %cst_249 = arith.constant dense<0.000000e+00> : vector<128x128xf32>
    %286 = tpu.matmul %283, %285, %cst_249 {dimension_numbers = #tpu.dot_dimension_numbers<[1], [0], [0], [1], [0, 0, 1, 1], [], []>} : vector<128x128xbf16>, vector<128x128xbf16>, vector<128x128xf32> -> vector<128x128xf32>
    %287 = arith.addf %281, %286 : vector<128x128xf32>
    %288 = vector.extract_strided_slice %275 {offsets = [2, 0, 0], sizes = [8, 16, 128], strides = [1, 1, 1]} : vector<10x16x128xbf16> to vector<8x16x128xbf16>
    %289 = vector.shape_cast %288 : vector<8x16x128xbf16> to vector<128x128xbf16>
    %c8_250 = arith.constant 8 : index
    %c0_251 = arith.constant 0 : index
    %c0_252 = arith.constant 0 : index
    %290 = vector.load %arg4[%c8_250, %c0_251, %c0_252] : memref<9x128x128xbf16, #tpu.memory_space<vmem>>, vector<1x128x128xbf16>
    %291 = vector.shape_cast %290 : vector<1x128x128xbf16> to vector<128x128xbf16>
    %cst_253 = arith.constant dense<0.000000e+00> : vector<128x128xf32>
    %292 = tpu.matmul %289, %291, %cst_253 {dimension_numbers = #tpu.dot_dimension_numbers<[1], [0], [0], [1], [0, 0, 1, 1], [], []>} : vector<128x128xbf16>, vector<128x128xbf16>, vector<128x128xf32> -> vector<128x128xf32>
    %293 = arith.addf %287, %292 : vector<128x128xf32>
    %c0_254 = arith.constant 0 : index
    %c0_255 = arith.constant 0 : index
    %294 = vector.load %arg5[%c0_254, %c0_255] : memref<1x128xf32, #tpu.memory_space<vmem>>, vector<1x128xf32>
    %295 = vector.broadcast %294 : vector<1x128xf32> to vector<128x128xf32>
    %296 = arith.addf %293, %295 : vector<128x128xf32>
    %c0_256 = arith.constant 0 : index
    %c8_257 = arith.constant 8 : index
    %c0_258 = arith.constant 0 : index
    %c0_259 = arith.constant 0 : index
    %297 = vector.load %arg1[%c0_256, %c8_257, %c0_258, %c0_259] : memref<1x16x16x128xf32, #tpu.memory_space<vmem>>, vector<1x8x16x128xf32>
    %298 = vector.shape_cast %297 : vector<1x8x16x128xf32> to vector<8x16x128xf32>
    %299 = vector.shape_cast %298 : vector<8x16x128xf32> to vector<128x128xf32>
    %300 = arith.addf %296, %299 : vector<128x128xf32>
    %cst_260 = arith.constant 0.000000e+00 : f32
    %301 = vector.broadcast %cst_260 : f32 to vector<128x128xf32>
    %302 = arith.maximumf %300, %301 : vector<128x128xf32>
    %303 = vector.shape_cast %302 : vector<128x128xf32> to vector<8x16x128xf32>
    %c0_261 = arith.constant 0 : index
    %c8_262 = arith.constant 8 : index
    %c0_263 = arith.constant 0 : index
    %c0_264 = arith.constant 0 : index
    %304 = vector.load %arg6[%c0_261, %c8_262, %c0_263, %c0_264] : memref<1x16x16x128xf32, #tpu.memory_space<vmem>>, vector<1x8x16x128xf32>
    %305 = vector.shape_cast %304 : vector<1x8x16x128xf32> to vector<8x16x128xf32>
    %306 = vector.shape_cast %303 : vector<8x16x128xf32> to vector<1x8x16x128xf32>
    tpu.vector_store %arg6[%c0_261, %c8_262, %c0_263, %c0_264], %306 {strides = array<i32>} : memref<1x16x16x128xf32, #tpu.memory_space<vmem>>, vector<1x8x16x128xf32>,
    return
  }
  func.func @transform_0(%arg0: i32) -> (i32, i32, i32, i32) {
    %c0_i32 = arith.constant 0 : i32
    %c0_i32_0 = arith.constant 0 : i32
    %c0_i32_1 = arith.constant 0 : i32
    %c0_i32_2 = arith.constant 0 : i32
    return %arg0, %c0_i32, %c0_i32_0, %c0_i32_1 : i32, i32, i32, i32
  }
  func.func @transform_1(%arg0: i32) -> (i32, i32, i32) {
    %c0_i32 = arith.constant 0 : i32
    %c0_i32_0 = arith.constant 0 : i32
    %c0_i32_1 = arith.constant 0 : i32
    %c0_i32_2 = arith.constant 0 : i32
    return %c0_i32, %c0_i32_0, %c0_i32_1 : i32, i32, i32
  }
  func.func @transform_2(%arg0: i32) -> (i32, i32) {
    %c0_i32 = arith.constant 0 : i32
    %c0_i32_0 = arith.constant 0 : i32
    %c0_i32_1 = arith.constant 0 : i32
    return %c0_i32, %c0_i32_0 : i32, i32
  }
  func.func @transform_3(%arg0: i32) -> (i32, i32, i32) {
    %c0_i32 = arith.constant 0 : i32
    %c0_i32_0 = arith.constant 0 : i32
    %c0_i32_1 = arith.constant 0 : i32
    %c0_i32_2 = arith.constant 0 : i32
    return %c0_i32, %c0_i32_0, %c0_i32_1 : i32, i32, i32
  }
  func.func @transform_4(%arg0: i32) -> (i32, i32) {
    %c0_i32 = arith.constant 0 : i32
    %c0_i32_0 = arith.constant 0 : i32
    %c0_i32_1 = arith.constant 0 : i32
    return %c0_i32, %c0_i32_0 : i32, i32
  }
  func.func @transform_5(%arg0: i32) -> (i32, i32, i32, i32) {
    %c0_i32 = arith.constant 0 : i32
    %c0_i32_0 = arith.constant 0 : i32
    %c0_i32_1 = arith.constant 0 : i32
    %c0_i32_2 = arith.constant 0 : i32
    return %arg0, %c0_i32, %c0_i32_0, %c0_i32_1 : i32, i32, i32, i32
  }
}

</mosaic_0001>

<bundles_post_ra>
// kernel: tpu_custom_call.1
= control target key start
LH: loop header
LB: loop body
LE: loop exit
PB: predicated region body
PF: predicated region fallthrough
CT: control target
= control target key end

     0   :  { %10 = vsyncpa [#allocation5], 0  ;;  %s14023_s0 = inlined_call_operand.hbm [shape: f32[2,16,16,128], index: 0, kind: input, shape index: {}]   ;;  %s14024_s1 = inlined_call_operand.hbm [shape: bf16[9,128,128], index: 1, kind: input, shape index: {}]   ;;  %s14025_s2 = inlined_call_operand.vmem [shape: f32[1,128], index: 2, kind: input, shape index: {}]   ;;  %s14026_s3 = inlined_call_operand.hbm [shape: bf16[9,128,128], index: 3, kind: input, shape index: {}]   ;;  %s14027_s4 = inlined_call_operand.vmem [shape: f32[1,128], index: 4, kind: input, shape index: {}]   ;;  %s14028_s5 = inlined_call_operand.hbm [shape: f32[2,16,16,128], index: 5, kind: output, shape index: {}]  }
   0x1   :  { %12 = vsyncpa [#allocation5 + $0x1], 0 }
   0x2   :  { %13 = vsyncpa [#allocation8], 0 }
   0x3   :  { %14 = vsyncpa [#allocation6], 0 }
   0x4   :  { %16 = vsyncpa [#allocation6 + $0x1], 0  ;;  %s12198_s18 = smov 0   ;;  %s12200_s19 = smov 0  }
   0x5   :  { %s12202_s20 = smov 0   ;;  %s12204_s21 = smov 0  }
   0x6 LB: > { %s12219_s22 = sadd.s32 4294967295, %s12155_s21   ;;  %s9047_s23 = sadd.s32 4294967294, %s12155_s21   ;;  %s12155_s21 = sphi %s12204_s21, %s14135_s21   ;;  %s12151_s20 = sphi %s12202_s20, %s14134_s20   ;;  %s12147_s19 = sphi %s12200_s19, %s14133_s19   ;;  %s12143_s18 = sphi %s12198_s18, %s14132_s18  }
   0x7   : > { %p42_p0 = scmp.ne.s32.totalorder %s12147_s19, %s12143_s18  ;;  %p14029_p1 = scmp.eq.s32.totalorder %s12219_s22, 0 }
   0x8   : > { %p156_p3 = scmp.eq.s32.totalorder %s9047_s23, 1  ;;  %p9048_p5 = scmp.ge.s32.totalorder %s12155_s21, 1 }
   0x9   : > { %p12228_p4 = por %p14029_p1, %p42_p0  ;;  %p163_p7 = scmp.lt.s32.totalorder %s12155_s21, 3 }
   0xa   : > { %p12233_p6 = por %p156_p3, %p42_p0  ;;  %s12157_s27 = smov [#allocation7]  }
   0xb   : > { %s14032_s24 = scalar_select %p12228_p4, 1, 0 }
   0xc   : > { %s14033_s25 = scalar_select %p12233_p6, 1, 0 }
   0xd   : > { %p12238_p8 = pnand %p9048_p5, %p163_p7  ;;  %s175_s28 = sshll.u32 %s12157_s27, 4  ;;  %s12242_s28 = int_to_ptr.vmem [resolvable:$true] %s175_s28 }
   0xe   : > { %s12158_s30 = smov [#allocation9]   ;;  %s11999_s9 = scalar_lea.hbm %s14024_s1, 9216 }
   0xf   : > { %p11643_p9 = pneg %p12238_p8  ;;  %s191_s6 = sshll.u32 %s12158_s30, 4  ;;  %s12253_s6 = int_to_ptr.vmem [resolvable:$true] %s191_s6 }
  0x10   : > { %p12000_p12 = scmp.ne.s32.totalorder %s14024_s1, %s11999_s9  ;;  %p12006_p5 = scmp.lt.u32.totalorder %s11999_s9, %s14024_s1 }
  0x11   : > { %p12249_p11 = pnand %p11643_p9, %p14029_p1 }
  0x13   : > { %p12001_p13 = pneg %p12249_p11 }
  0x15   : > { %p12002_p0 = pnand %p12001_p13, %p12000_p12 }
  0x17   : > { %p12003_p3 = pneg %p12002_p0 }
  0x19   : > { %p12008_p7 = pnand %p12006_p5, %p12003_p3 }
  0x1b   : > { %12011 = shalt.err (!%p12008_p7)
}
  0x1c   : > { %s12012_s14 = scalar_lea.vmem %s12242_s28, 9216  ;;  %p12020_p2 = scmp.lt.s32.totalorder %s12242_s28, %s12242_s28 }
  0x1d   : > { %p12013_p9 = scmp.ne.s32.totalorder %s12242_s28, %s12012_s14  ;;  %p12021_p12 = scmp.lt.s32.totalorder %s12012_s14, %s12012_s14 }
  0x1f   : > { %p12015_p10 = pnand %p12013_p9, %p12001_p13  ;;  %p12022_p0 = por %p12021_p12, %p12020_p2 }
  0x21   : > { %p12016_p1 = pneg %p12015_p10 }
  0x23   : > { %p12023_p6 = pnand %p12022_p0, %p12016_p1 }
  0x25   : > { %12026 = shalt.err (!%p12023_p6)
}
  0x26   : > { %s12159_s15 = smov 64   ;;  %s12160_s16 = smov 4  }
  0x27   : > { %11646 = dma.hbm_to_vmem [thread:$0]  (!%p12249_p11), %s14024_s1, 9216, %s12242_s28, [#allocation8], %s12159_s15, %s12159_s15, %s12160_s16  }
  0x28   : > { %s12027_s7 = scalar_lea.hbm %s14026_s3, 9216 }
  0x29   : > { %p12028_p2 = scmp.ne.s32.totalorder %s14026_s3, %s12027_s7  ;;  %p12034_p10 = scmp.lt.u32.totalorder %s12027_s7, %s14026_s3 }
  0x2b   : > { %p12030_p1 = pnand %p12028_p2, %p12001_p13 }
  0x2d   : > { %p12031_p6 = pneg %p12030_p1 }
  0x2f   : > { %p12036_p3 = pnand %p12034_p10, %p12031_p6 }
  0x31   : > { %12039 = shalt.err (!%p12036_p3)
}
  0x32   : > { %s12040_s28 = scalar_lea.vmem %s12253_s6, 9216  ;;  %p12048_p12 = scmp.lt.s32.totalorder %s12253_s6, %s12253_s6 }
  0x33   : > { %p12041_p5 = scmp.ne.s32.totalorder %s12253_s6, %s12040_s28  ;;  %p12049_p0 = scmp.lt.s32.totalorder %s12040_s28, %s12040_s28 }
  0x35   : > { %p12043_p7 = pnand %p12041_p5, %p12001_p13  ;;  %p12050_p2 = por %p12049_p0, %p12048_p12 }
  0x37   : > { %p12044_p9 = pneg %p12043_p7 }
  0x39   : > { %p12051_p1 = pnand %p12050_p2, %p12044_p9 }
  0x3b   : > { %12054 = shalt.err (!%p12051_p1)
}
  0x3c   : > { %11649 = dma.hbm_to_vmem [thread:$0]  (!%p12249_p11), %s14026_s3, 9216, %s12253_s6, [#allocation8], %s12159_s15, %s12159_s15, %s12160_s16  }
  0x3d   : > { %s12308_s14 = sadd.s32 1, %s12155_s21   ;;  %s29_s29 = sadd.s32 1, %s12151_s20 }
  0x3e   : > { %s26_s17 = ssub.s32 %s12155_s21, %s12308_s14  ;;  %p36_p13 = scmp.ne.s32.totalorder %s12151_s20, %s12147_s19 }
  0x3f   : > { %p27_p6 = scmp.eq.s32.totalorder %s26_s17, 0  ;;  %p37_p10 = scmp.eq.s32.totalorder %s12155_s21, 0 }
  0x40   : > { %p14036_p3 = scmp.eq.s32.totalorder %s12219_s22, 1  ;;  %p11660_p7 = scmp.lt.s32.totalorder %s12155_s21, 2 }
  0x41   : > { %s12324_s27 = scalar_select %p27_p6, %s12151_s20, %s29_s29  }
  0x42   : > { %p12318_p5 = por %p14036_p3, %p36_p13  ;;  %p38_p9 = por %p37_p10, %p36_p13 }
  0x43   : > { %s208_s30 = sand.u32 1, %s12151_s20   ;;  %s9389_s6 = sshll.u32 %s12155_s21, 12 }
  0x44   : > { %s14037_s23 = scalar_select %p12318_p5, 1, 0 }
  0x45   : > { %s9052_s7 = sshll.u32 %s208_s30, 8  ;;  %s12331_s8 = scalar_lea.hbm %s14023_s0, %s9389_s6 }
  0x46   : > { %s212_s9 = scalar_lea.vmem [#allocation4], %s9052_s7  ;;  %p12335_p11 = pnand %p11660_p7, %p38_p9 }
  0x47   : > { %s219_s10 = sshll.u32 %s212_s9, 4  ;;  %s12339_s28 = scalar_lea.sflag [#allocation5], %s208_s30  ;;  %s12333_s10 = int_to_ptr.vmem [resolvable:$true] %s219_s10 }
  0x48   : > { %s12055_s12 = scalar_lea.hbm %s12331_s8, 4096  ;;  %p12057_p0 = pneg %p12335_p11 }
  0x49   : > { %p12056_p12 = scmp.ne.s32.totalorder %s12331_s8, %s12055_s12  ;;  %s12060_s17 = scalar_lea.hbm %s14023_s0, 8192 }
  0x4a   : > { %p12061_p13 = scmp.lt.u32.totalorder %s12331_s8, %s14023_s0  ;;  %p12062_p6 = scmp.lt.u32.totalorder %s12060_s17, %s12055_s12 }
  0x4b   : > { %p12058_p2 = pnand %p12057_p0, %p12056_p12  ;;  %p12064_p3 = scmp.lt.u32.totalorder %s12055_s12, %s12331_s8 }
  0x4c   : > { %p12063_p10 = por %p12062_p6, %p12061_p13 }
  0x4d   : > { %p12059_p1 = pneg %p12058_p2 }
  0x4e   : > { %p12065_p7 = por %p12064_p3, %p12063_p10 }
  0x50   : > { %p12066_p9 = pnand %p12065_p7, %p12059_p1 }
  0x52   : > { %12069 = shalt.err (!%p12066_p9)
}
  0x53   : > { %s12070_s30 = scalar_lea.vmem %s12333_s10, 4096  ;;  %s12161_s15 = smov [#allocation4]  }
  0x54   : > { %p12071_p12 = scmp.ne.s32.totalorder %s12333_s10, %s12070_s30  ;;  %s12075_s16 = sshll.u32 %s12161_s15, 4  ;;  %s12076_s16 = int_to_ptr.vmem [resolvable:$false] %s12075_s16 }
  0x55   : > { %s12077_s9 = scalar_lea.vmem %s12076_s16, 8192  ;;  %p12078_p4 = scmp.lt.s32.totalorder %s12333_s10, %s12076_s16 }
  0x56   : > { %p12073_p2 = pnand %p12071_p12, %p12057_p0  ;;  %p12079_p13 = scmp.lt.s32.totalorder %s12077_s9, %s12070_s30 }
  0x58   : > { %p12074_p5 = pneg %p12073_p2  ;;  %p12080_p6 = por %p12079_p13, %p12078_p4 }
  0x5a   : > { %p12081_p10 = pnand %p12080_p6, %p12074_p5 }
  0x5c   : > { %12084 = shalt.err (!%p12081_p10)
}
  0x5d   : > { %s12162_s12 = smov 128   ;;  %s12163_s13 = smov 8  }
  0x5e   : > { %11653 = dma.hbm_to_vmem [thread:$0]  (!%p12335_p11), %s12331_s8, 4096, %s12333_s10, %s12339_s28, %s12162_s12, %s12162_s12, %s12163_s13  }
  0x5f   : > { %231 = sbr.rel (%p12238_p8) target bundleno = 1227 (0x4cb), region = 40 }
  0x66   : > { %s12370_s29 = sand.u32 1, %s12147_s19   ;;  %p14039_p4 = scmp.ne.s32.totalorder %s14032_s24, 0 }
  0x67   : > { %s9056_s17 = sshll.u32 %s12370_s29, 8  ;;  %s234_s7 = scalar_lea.sflag [#allocation5], %s12370_s29 }
  0x68   : > { %s12376_s6 = scalar_lea.vmem [#allocation4], %s9056_s17 }
  0x69   : > { %12130 = dma.done.wait (%p14039_p4), %s234_s7, 4096  }
  0x6a   : > { %12132 = vsyncadd (%p14039_p4), %s234_s7, 4294963200  ;;  %p14040_p5 = scmp.eq.s32.totalorder %s12219_s22, 0 }
  0x6c   : > { %12134 = dma.done.wait (%p14040_p5), [#allocation8], 18432   ;;  %p14041_p8 = pmov %p14040_p5 }
  0x6d   : > { %v12164_v0 = vmov 0   ;;  %v11705_v1 = vld [vmem:[#allocation7 + $0xc0] sm:$0xff]   ;;  %v11707_v3 = vld [vmem:[#allocation7 + $0xc8] sm:$0xff]   ;;  %v11709_v5 = vld [vmem:[#allocation7 + $0xd0] sm:$0xff]   ;;  %vm504_vm0 = vsmask.f32 4352 }
  0x6e   : > { %12136 = vsyncadd (%p14041_p8), [#allocation8], 4294948864  ;;  %279 = vst [vmem:[#allocation2 + $0x10] sm:$0xf] %v12164_v0  ;;  %v11706_v2 = vld [vmem:[#allocation7 + $0xc0] sm:$0xff]   ;;  %9967 = vmatprep.subr.bf16.mxu0 %v11705_v1  ;;  %v11708_v4 = vld [vmem:[#allocation7 + $0xc8] sm:$0xff]  }
  0x6f   : > { %273 = vst [vmem:[#allocation2] sm:$0xff] %v12164_v0  ;;  %274 = vst [vmem:[#allocation2 + $0x8] sm:$0xff] %v12164_v0  ;;  %10255 = vmatprep.subr.bf16.mxu1 %v11706_v2  ;;  %9968 = vmatpush3.bf16.msra.mxu0 %v11705_v1  ;;  %v11710_v6 = vld [vmem:[#allocation7 + $0xd0] sm:$0xff]   ;;  %v11711_v7 = vld [vmem:[#allocation7 + $0xd8] sm:$0xff]   ;;  %vm1212_vm1 = vcmask 1043456   ;;  %s13890_s11 = scalar_lea.vmem [#allocation10], %s9056_s17 }
  0x70   : > { %276 = vst [vmem:[#allocation2 + $0x110] sm:$0xff] %v12164_v0  ;;  %277 = vst [vmem:[#allocation2 + $0x118] sm:$0xff] %v12164_v0  ;;  %10256 = vmatpush3.bf16.msra.mxu1 %v11706_v2  ;;  %9969 = vmatprep.subr.bf16.mxu0 %v11707_v3  ;;  %v11712_v8 = vld [vmem:[#allocation7 + $0xd8] sm:$0xff]   ;;  %v11713_v9 = vld [vmem:[#allocation7 + $0xe0] sm:$0xff]   ;;  %vm1801_vm2 = vsmask.f32 3328 }
  0x71   : > { %280 = vst [vmem:[#allocation2 + $0x20] sm:$0xf] %v12164_v0  ;;  %281 = vst [vmem:[#allocation2 + $0x30] sm:$0xf] %v12164_v0  ;;  %10257 = vmatprep.subr.bf16.mxu1 %v11708_v4  ;;  %v11714_v10 = vld [vmem:[#allocation7 + $0xe0] sm:$0xff]   ;;  %v11715_v11 = vld [vmem:[#allocation7 + $0xe8] sm:$0xff]  }
  0x72   : > { %282 = vst [vmem:[#allocation2 + $0x40] sm:$0xf] %v12164_v0  ;;  %283 = vst [vmem:[#allocation2 + $0x50] sm:$0xf] %v12164_v0  ;;  %v11716_v12 = vld [vmem:[#allocation7 + $0xe8] sm:$0xff]   ;;  %v355_v13 = vld [vmem:[%s12376_s6] sm:$0xff] }
  0x73   : > { %284 = vst [vmem:[#allocation2 + $0x60] sm:$0xf] %v12164_v0  ;;  %285 = vst [vmem:[#allocation2 + $0x70] sm:$0xf] %v12164_v0  ;;  %9970 = vmatpush3.bf16.msra.mxu0 %v11707_v3  ;;  %v356_v14 = vld [vmem:[%s12376_s6 + $0x8] sm:$0xff]  ;;  %v371_v15 = vld [vmem:[%s12376_s6 + $0x80] sm:$0xff] }
  0x74   : > { %286 = vst [vmem:[#allocation2 + $0x80] sm:$0xf] %v12164_v0  ;;  %287 = vst [vmem:[#allocation2 + $0x90] sm:$0xf] %v12164_v0  ;;  %10258 = vmatpush3.bf16.msra.mxu1 %v11708_v4  ;;  %9971 = vmatprep.subr.bf16.mxu0 %v11709_v5  ;;  %v387_v16 = vpack.c.bf16 %v356_v14, %v355_v13  ;;  %v372_v17 = vld [vmem:[%s12376_s6 + $0x88] sm:$0xff]  ;;  %v357_v18 = vld [vmem:[%s12376_s6 + $0x10] sm:$0xff] }
  0x75   : > { %288 = vst [vmem:[#allocation2 + $0xa0] sm:$0xf] %v12164_v0  ;;  %289 = vst [vmem:[#allocation2 + $0xb0] sm:$0xf] %v12164_v0  ;;  %10259 = vmatprep.subr.bf16.mxu1 %v11710_v6  ;;  %v358_v19 = vld [vmem:[%s12376_s6 + $0x18] sm:$0xff]  ;;  %v395_v20 = vpack.c.bf16 %v372_v17, %v371_v15  ;;  %v373_v23 = vld [vmem:[%s12376_s6 + $0x90] sm:$0xff] }
  0x76   : > { %290 = vst [vmem:[#allocation2 + $0xc0] sm:$0xf] %v12164_v0  ;;  %291 = vst [vmem:[#allocation2 + $0xd0] sm:$0xf] %v12164_v0  ;;  %v388_v21 = vpack.c.bf16 %v358_v19, %v357_v18  ;;  %v419_v22 = vrot.slane %v387_v16, 4  ;;  %v374_v24 = vld [vmem:[%s12376_s6 + $0x98] sm:$0xff] }
  0x77   : > { %292 = vst [vmem:[#allocation2 + $0xe0] sm:$0xf] %v12164_v0  ;;  %293 = vst [vmem:[#allocation2 + $0xf0] sm:$0xf] %v12164_v0  ;;  %9972 = vmatpush3.bf16.msra.mxu0 %v11709_v5  ;;  %v11717_v25 = vld [vmem:[#allocation7 + $0xf0] sm:$0xff]   ;;  %v427_v27 = vrot.slane %v395_v20, 4  ;;  %v396_v29 = vpack.c.bf16 %v374_v24, %v373_v23 }
  0x78   : > { %294 = vst [vmem:[#allocation2 + $0x100] sm:$0xf] %v12164_v0  ;;  %297 = vst [vmem:[#allocation2 + $0x18] sm:$0xf0] %v12164_v0  ;;  %10260 = vmatpush3.bf16.msra.mxu1 %v11710_v6  ;;  %9973 = vmatprep.subr.bf16.mxu0 %v11711_v7  ;;  %v11718_v26 = vld [vmem:[#allocation7 + $0xf0] sm:$0xff]   ;;  %v420_v28 = vrot.slane %v388_v21, 4 }
  0x79   : > { %298 = vst [vmem:[#allocation2 + $0x28] sm:$0xf0] %v12164_v0  ;;  %299 = vst [vmem:[#allocation2 + $0x38] sm:$0xf0] %v12164_v0  ;;  %10261 = vmatprep.subr.bf16.mxu1 %v11712_v8  ;;  %v11719_v30 = vld [vmem:[#allocation7 + $0xf8] sm:$0xff]   ;;  %v428_v31 = vrot.slane %v396_v29, 4 }
  0x7a   : > { %300 = vst [vmem:[#allocation2 + $0x48] sm:$0xf0] %v12164_v0  ;;  %301 = vst [vmem:[#allocation2 + $0x58] sm:$0xf0] %v12164_v0  ;;  %v359_v32 = vld [vmem:[%s12376_s6 + $0x20] sm:$0xff]  ;;  %v360_v33 = vld [vmem:[%s12376_s6 + $0x28] sm:$0xff] }
  0x7b   : > { %302 = vst [vmem:[#allocation2 + $0x68] sm:$0xf0] %v12164_v0  ;;  %303 = vst [vmem:[#allocation2 + $0x78] sm:$0xf0] %v12164_v0  ;;  %9974 = vmatpush3.bf16.msra.mxu0 %v11711_v7  ;;  %v375_v34 = vld [vmem:[%s12376_s6 + $0xa0] sm:$0xff]  ;;  %v376_v35 = vld [vmem:[%s12376_s6 + $0xa8] sm:$0xff]  ;;  %v389_v36 = vpack.c.bf16 %v360_v33, %v359_v32 }
  0x7c   : > { %304 = vst [vmem:[#allocation2 + $0x88] sm:$0xf0] %v12164_v0  ;;  %305 = vst [vmem:[#allocation2 + $0x98] sm:$0xf0] %v12164_v0  ;;  %10262 = vmatpush3.bf16.msra.mxu1 %v11712_v8  ;;  %9975 = vmatprep.subr.bf16.mxu0 %v11713_v9  ;;  %v397_v37 = vpack.c.bf16 %v376_v35, %v375_v34  ;;  %v361_v38 = vld [vmem:[%s12376_s6 + $0x30] sm:$0xff]  ;;  %v362_v39 = vld [vmem:[%s12376_s6 + $0x38] sm:$0xff] }
  0x7d   : > { %306 = vst [vmem:[#allocation2 + $0xa8] sm:$0xf0] %v12164_v0  ;;  %307 = vst [vmem:[#allocation2 + $0xb8] sm:$0xf0] %v12164_v0  ;;  %10263 = vmatprep.subr.bf16.mxu1 %v11714_v10  ;;  %v11720_v40 = vld [vmem:[#allocation7 + $0xf8] sm:$0xff]   ;;  %v390_v41 = vpack.c.bf16 %v362_v39, %v361_v38  ;;  %v12480_v42 = vld [vmem:[#allocation7] sm:$0xff]  }
  0x7e   : > { %308 = vst [vmem:[#allocation2 + $0xc8] sm:$0xf0] %v12164_v0  ;;  %309 = vst [vmem:[#allocation2 + $0xd8] sm:$0xf0] %v12164_v0  ;;  %v421_v43 = vrot.slane %v389_v36, 4  ;;  %v429_v44 = vrot.slane %v397_v37, 4 }
  0x7f   : > { %310 = vst [vmem:[#allocation2 + $0xe8] sm:$0xf0] %v12164_v0  ;;  %311 = vst [vmem:[#allocation2 + $0xf8] sm:$0xf0] %v12164_v0  ;;  %9976 = vmatpush3.bf16.msra.mxu0 %v11713_v9  ;;  %v12483_v45 = vld [vmem:[%s12376_s6 + $0xb0] sm:$0xff]  ;;  %v12485_v46 = vld [vmem:[#allocation7] sm:$0xff]  }
  0x80   : > { %312 = vst [vmem:[#allocation2 + $0x108] sm:$0xf0] %v12164_v0  ;;  %314 = vst [vmem:[#allocation3] sm:$0xff] %v12164_v0  ;;  %10264 = vmatpush3.bf16.msra.mxu1 %v11714_v10  ;;  %9977 = vmatprep.subr.bf16.mxu0 %v11715_v11  ;;  %v422_v47 = vrot.slane %v390_v41, 4  ;;  %v12488_v48 = vld [vmem:[%s12376_s6 + $0xb8] sm:$0xff]  ;;  %v11723_v38 = vld [vmem:[#allocation7 + $0x8] sm:$0xff]  }
  0x81   : > { %315 = vst [vmem:[#allocation3 + $0x8] sm:$0xff] %v12164_v0  ;;  %317 = vst [vmem:[#allocation3 + $0x110] sm:$0xff] %v12164_v0  ;;  %10265 = vmatprep.subr.bf16.mxu1 %v11716_v12  ;;  %v398_v60 = vpack.c.bf16 %v12488_v48, %v12483_v45  ;;  %s9390_s28 = sshll.u32 %s12219_s22, 12  ;;  %s8955_s30 = sshll.u32 %s13890_s11, 4  ;;  %s13975_s30 = int_to_ptr.vmem [resolvable:$true] %s8955_s30 }
  0x82   : > { %318 = vst [vmem:[#allocation3 + $0x118] sm:$0xff] %v12164_v0  ;;  %320 = vst [vmem:[#allocation3 + $0x10] sm:$0xf] %v12164_v0  ;;  %s13973_s22 = scalar_lea.hbm %s14028_s5, %s9390_s28  ;;  %s8942_s9 = scalar_lea.sflag [#allocation6], %s12370_s29 }
  0x83   : > { %321 = vst [vmem:[#allocation3 + $0x20] sm:$0xf] %v12164_v0  ;;  %322 = vst [vmem:[#allocation3 + $0x30] sm:$0xf] %v12164_v0  ;;  %9978 = vmatpush3.bf16.msra.mxu0 %v11715_v11  ;;  %s12085_s12 = scalar_lea.vmem %s13975_s30, 4096  ;;  %p14129_p0 = scmp.ne.s32.totalorder %s14037_s23, 0 }
  0x84   : > { %323 = vst [vmem:[#allocation3 + $0x40] sm:$0xf] %v12164_v0  ;;  %324 = vst [vmem:[#allocation3 + $0x50] sm:$0xf] %v12164_v0  ;;  %10266 = vmatpush3.bf16.msra.mxu1 %v11716_v12  ;;  %9979 = vmatprep.subr.bf16.mxu0 %v11717_v25  ;;  %p12086_p11 = scmp.ne.s32.totalorder %s13975_s30, %s12085_s12  ;;  %s12165_s13 = smov [#allocation10]  }
  0x85   : > { %325 = vst [vmem:[#allocation3 + $0x60] sm:$0xf] %v12164_v0  ;;  %326 = vst [vmem:[#allocation3 + $0x70] sm:$0xf] %v12164_v0  ;;  %10267 = vmatprep.subr.bf16.mxu1 %v11718_v26  ;;  %s12089_s17 = sshll.u32 %s12165_s13, 4  ;;  %s12090_s17 = int_to_ptr.vmem [resolvable:$false] %s12089_s17 }
  0x86   : > { %327 = vst [vmem:[#allocation3 + $0x80] sm:$0xf] %v12164_v0  ;;  %328 = vst [vmem:[#allocation3 + $0x90] sm:$0xf] %v12164_v0  ;;  %p12087_p1 = pnand %p12086_p11, %p14129_p0  ;;  %s12091_s7 = scalar_lea.vmem %s12090_s17, 8192 }
  0x87   : > { %329 = vst [vmem:[#allocation3 + $0xa0] sm:$0xf] %v12164_v0  ;;  %330 = vst [vmem:[#allocation3 + $0xb0] sm:$0xf] %v12164_v0  ;;  %9980 = vmatpush3.bf16.msra.mxu0 %v11717_v25  ;;  %p12092_p7 = scmp.lt.s32.totalorder %s13975_s30, %s12090_s17  ;;  %p12093_p9 = scmp.lt.s32.totalorder %s12091_s7, %s12085_s12 }
  0x88   : > { %331 = vst [vmem:[#allocation3 + $0xc0] sm:$0xf] %v12164_v0  ;;  %332 = vst [vmem:[#allocation3 + $0xd0] sm:$0xf] %v12164_v0  ;;  %10268 = vmatpush3.bf16.msra.mxu1 %v11718_v26  ;;  %9981 = vmatprep.subr.bf16.mxu0 %v11719_v30  ;;  %p12088_p3 = pneg %p12087_p1 }
  0x89   : > { %333 = vst [vmem:[#allocation3 + $0xe0] sm:$0xf] %v12164_v0  ;;  %334 = vst [vmem:[#allocation3 + $0xf0] sm:$0xf] %v12164_v0  ;;  %10269 = vmatprep.subr.bf16.mxu1 %v11720_v40  ;;  %p12094_p12 = por %p12093_p9, %p12092_p7 }
  0x8a   : > { %335 = vst [vmem:[#allocation3 + $0x100] sm:$0xf] %v12164_v0  ;;  %338 = vst [vmem:[#allocation3 + $0x18] sm:$0xf0] %v12164_v0 }
  0x8b   : > { %339 = vst [vmem:[#allocation3 + $0x28] sm:$0xf0] %v12164_v0  ;;  %340 = vst [vmem:[#allocation3 + $0x38] sm:$0xf0] %v12164_v0  ;;  %9982 = vmatpush3.bf16.msra.mxu0 %v11719_v30  ;;  %p12095_p2 = pnand %p12094_p12, %p12088_p3 }
  0x8c   : > { %341 = vst [vmem:[#allocation3 + $0x48] sm:$0xf0] %v12164_v0  ;;  %342 = vst [vmem:[#allocation3 + $0x58] sm:$0xf0] %v12164_v0  ;;  %10270 = vmatpush3.bf16.msra.mxu1 %v11720_v40  ;;  %9999 = vmatprep.subr.bf16.mxu0 %v12480_v42 }
  0x8d   : > { %343 = vst [vmem:[#allocation3 + $0x68] sm:$0xf0] %v12164_v0  ;;  %344 = vst [vmem:[#allocation3 + $0x78] sm:$0xf0] %v12164_v0  ;;  %10287 = vmatprep.subr.bf16.mxu1 %v12485_v46 }
  0x8e   : > { %345 = vst [vmem:[#allocation3 + $0x88] sm:$0xf0] %v12164_v0  ;;  %346 = vst [vmem:[#allocation3 + $0x98] sm:$0xf0] %v12164_v0 }
  0x8f   : > { %347 = vst [vmem:[#allocation3 + $0xa8] sm:$0xf0] %v12164_v0  ;;  %348 = vst [vmem:[#allocation3 + $0xb8] sm:$0xf0] %v12164_v0 }
  0x90   : > { %349 = vst [vmem:[#allocation3 + $0xc8] sm:$0xf0] %v12164_v0  ;;  %350 = vst [vmem:[#allocation3 + $0xd8] sm:$0xf0] %v12164_v0 }
  0x91   : > { %351 = vst [vmem:[#allocation3 + $0xe8] sm:$0xf0] %v12164_v0  ;;  %352 = vst [vmem:[#allocation3 + $0xf8] sm:$0xf0] %v12164_v0 }
  0x92   : > { %353 = vst [vmem:[#allocation3 + $0x108] sm:$0xf0] %v12164_v0  ;;  %278 = vst [vmem:[#allocation2] sm:$0xf] %v12164_v0 }
  0x93   : > { %295 = vst [vmem:[#allocation2 + $0x110] sm:$0xf] %v12164_v0  ;;  %296 = vst [vmem:[#allocation2 + $0x8] sm:$0xf0] %v12164_v0 }
  0x94   : > { %313 = vst [vmem:[#allocation2 + $0x118] sm:$0xf0] %v12164_v0  ;;  %319 = vst [vmem:[#allocation3] sm:$0xf] %v12164_v0 }
  0x95   : > { %336 = vst [vmem:[#allocation3 + $0x110] sm:$0xf] %v12164_v0  ;;  %337 = vst [vmem:[#allocation3 + $0x8] sm:$0xf0] %v12164_v0 }
  0x96   : > { %354 = vst [vmem:[#allocation3 + $0x118] sm:$0xf0] %v12164_v0  ;;  %452 = vst [vmem:[#allocation2 + $0x18] ss:$-4 sps:$4 sm:$0xff] %v419_v22  }
  0x97   : > { %468 = vst [vmem:[#allocation2 + $0x98] ss:$-4 sps:$4 sm:$0xff] %v427_v27   ;;  %454 = vst [vmem:[#allocation2 + $0x28] ss:$-4 sps:$4 sm:$0xff] %v420_v28  }
  0x98   : > { %470 = vst [vmem:[#allocation2 + $0xa8] ss:$-4 sps:$4 sm:$0xff] %v428_v31   ;;  %456 = vst [vmem:[#allocation2 + $0x38] ss:$-4 sps:$4 sm:$0xff] %v421_v43   ;;  %v11724_v43 = vld [vmem:[#allocation7 + $0x8] sm:$0xff]  }
  0x99   : > { %472 = vst [vmem:[#allocation2 + $0xb8] ss:$-4 sps:$4 sm:$0xff] %v429_v44   ;;  %458 = vst [vmem:[#allocation2 + $0x48] ss:$-4 sps:$4 sm:$0xff] %v422_v47  }
  0x9d   : > { %v486_v49 = vld [vmem:[#allocation2 + $0x10] sm:$0xf8]  ;;  %v487_v50 = vld [vmem:[#allocation2 + $0x18] sm:$0xf] }
  0x9e   : > { %v523_v51 = vshrl.u32 %v486_v49, 16  ;;  %v526_v52 = vshll.u32 %v486_v49, 16  ;;  %v531_v53 = vshrl.u32 %v487_v50, 16  ;;  %v534_v54 = vshll.u32 %v487_v50, 16  ;;  %v2607_v55 = vld [vmem:[#allocation2 + $0x90] sm:$0xf8] }
  0x9f   : > { %v2608_v56 = vld [vmem:[#allocation2 + $0x98] sm:$0xf]  ;;  %v2643_v57 = vshrl.u32 %v2607_v55, 16  ;;  %v2646_v58 = vshll.u32 %v2607_v55, 16  ;;  %v488_v59 = vld [vmem:[#allocation2 + $0x20] sm:$0xf8] }
  0xa0   : > { %v525_v61 = vrot.slane %v523_v51, 3  ;;  %v528_v62 = vrot.slane %v526_v52, 4  ;;  %v533_v63 = vrot.slane %v531_v53, 3  ;;  %v536_v0 = vrot.slane %v534_v54, 4  ;;  %v489_v1 = vld [vmem:[#allocation2 + $0x28] sm:$0xf] }
  0xa1   : > { %v2645_v2 = vrot.slane %v2643_v57, 3  ;;  %v2648_v3 = vrot.slane %v2646_v58, 4  ;;  %v2651_v4 = vshrl.u32 %v2608_v56, 16  ;;  %v2654_v5 = vshll.u32 %v2608_v56, 16  ;;  %v2609_v6 = vld [vmem:[#allocation2 + $0xa0] sm:$0xf8] }
  0xa2   : > { %v529_v7 = vor.u32 %v528_v62, %v525_v61  ;;  %v537_v8 = vor.u32 %v536_v0, %v533_v63  ;;  %v540_v9 = vshrl.u32 %v488_v59, 16  ;;  %v543_v10 = vshll.u32 %v488_v59, 16  ;;  %v12493_v11 = vld [vmem:[#allocation2 + $0xa8] sm:$0xf]  ;;  %v490_v20 = vld [vmem:[#allocation2 + $0x30] sm:$0xf8] }
  0xa3   : > { %v2649_v12 = vor.u32 %v2648_v3, %v2645_v2  ;;  %v2653_v13 = vrot.slane %v2651_v4, 3  ;;  %v2656_v14 = vrot.slane %v2654_v5, 4  ;;  %v548_v15 = vshrl.u32 %v489_v1, 16  ;;  %v12502_v29 = vld [vmem:[#allocation2 + $0x38] sm:$0xf]  ;;  %v12519_v61 = vld [vmem:[#allocation7 + $0x10] sm:$0xff]  }
  0xa4   : > { %v12497_v16 = vsel %vm504_vm0, %v529_v7, %v537_v8  ;;  %v542_v17 = vrot.slane %v540_v9, 3  ;;  %v545_v18 = vrot.slane %v543_v10, 4  ;;  %v551_v19 = vshll.u32 %v489_v1, 16  ;;  %v2611_v34 = vld [vmem:[#allocation2 + $0xb0] sm:$0xf8]  ;;  %v363_v2 = vld [vmem:[%s12376_s6 + $0x40] sm:$0xff] }
  0xa5   : > { %9983 = vmatprep.mubr.bf16.mxu0 %v12497_v16  ;;  %v2657_v21 = vor.u32 %v2656_v14, %v2653_v13  ;;  %v550_v22 = vrot.slane %v548_v15, 3  ;;  %v2660_v23 = vshrl.u32 %v2609_v6, 16  ;;  %v2663_v24 = vshll.u32 %v2609_v6, 16  ;;  %v12508_v40 = vld [vmem:[#allocation2 + $0xb8] sm:$0xf]  ;;  %v364_v3 = vld [vmem:[%s12376_s6 + $0x48] sm:$0xff] }
  0xa6   : > { %v546_v25 = vor.u32 %v545_v18, %v542_v17  ;;  %v553_v26 = vrot.slane %v551_v19, 4  ;;  %v2668_v27 = vshrl.u32 %v12493_v11, 16  ;;  %v2671_v28 = vshll.u32 %v12493_v11, 16  ;;  %v492_v50 = vld [vmem:[#allocation2 + $0x40] sm:$0xf8]  ;;  %v380_v5 = vld [vmem:[%s12376_s6 + $0xc8] sm:$0xff] }
  0xa7   : > { %v12505_v30 = vsel %vm504_vm0, %v2649_v12, %v2657_v21  ;;  %v2662_v31 = vrot.slane %v2660_v23, 3  ;;  %v2665_v32 = vrot.slane %v2663_v24, 4  ;;  %v557_v33 = vshrl.u32 %v490_v20, 16  ;;  %v12517_v59 = vld [vmem:[#allocation2 + $0x48] sm:$0xf]  ;;  %v379_v4 = vld [vmem:[%s12376_s6 + $0xc0] sm:$0xff] }
  0xa8   : > { %10271 = vmatprep.mubr.bf16.mxu1 %v12505_v30  ;;  %v554_v35 = vor.u32 %v553_v26, %v550_v22  ;;  %v2670_v36 = vrot.slane %v2668_v27, 3  ;;  %v2673_v37 = vrot.slane %v2671_v28, 4  ;;  %v560_v39 = vshll.u32 %v490_v20, 16  ;;  %v365_v6 = vld [vmem:[%s12376_s6 + $0x50] sm:$0xff]  ;;  %v366_v7 = vld [vmem:[%s12376_s6 + $0x58] sm:$0xff] }
  0xa9   : > { %v2666_v41 = vor.u32 %v2665_v32, %v2662_v31  ;;  %v559_v44 = vrot.slane %v557_v33, 3  ;;  %v565_v47 = vshrl.u32 %v12502_v29, 16  ;;  %v568_v49 = vshll.u32 %v12502_v29, 16  ;;  %v381_v8 = vld [vmem:[%s12376_s6 + $0xd0] sm:$0xff]  ;;  %v382_v14 = vld [vmem:[%s12376_s6 + $0xd8] sm:$0xff]  ;;  %v367_v32 = vld [vmem:[%s12376_s6 + $0x60] sm:$0xff] }
  0xaa   : > { %v12513_v51 = vsel %vm504_vm0, %v546_v25, %v554_v35  ;;  %v2674_v52 = vor.u32 %v2673_v37, %v2670_v36  ;;  %v562_v53 = vrot.slane %v560_v39, 4  ;;  %v2677_v54 = vshrl.u32 %v2611_v34, 16  ;;  %v11727_v27 = vld [vmem:[#allocation7 + $0x18] sm:$0xff]   ;;  %v368_v33 = vld [vmem:[%s12376_s6 + $0x68] sm:$0xff] }
  0xab   : > { %9984 = vmatmul.mubr.bf16.vlgmr.msra.gmra.mrb[0].mxu0 %v12513_v51  ;;  %v567_v55 = vrot.slane %v565_v47, 3  ;;  %v570_v56 = vrot.slane %v568_v49, 4  ;;  %v2680_v57 = vshll.u32 %v2611_v34, 16  ;;  %v2685_v58 = vshrl.u32 %v12508_v40, 16  ;;  %v11728_v28 = vld [vmem:[#allocation7 + $0x18] sm:$0xff]   ;;  %v383_v34 = vld [vmem:[%s12376_s6 + $0xe0] sm:$0xff] }
  0xac   : > { %v12522_v62 = vsel %vm504_vm0, %v2666_v41, %v2674_v52  ;;  %10000 = vmatpush3.bf16.msra.mxu0 %v12480_v42  ;;  %v563_v63 = vor.u32 %v562_v53, %v559_v44  ;;  %v2679_v0 = vrot.slane %v2677_v54, 3  ;;  %v2688_v1 = vshll.u32 %v12508_v40, 16  ;;  %v11726_v42 = vld [vmem:[#allocation7 + $0x10] sm:$0xff]   ;;  %v384_v39 = vld [vmem:[%s12376_s6 + $0xe8] sm:$0xff]  ;;  %v370_v44 = vld [vmem:[%s12376_s6 + $0x78] sm:$0xff] }
  0xad   : > { %10272 = vmatmul.mubr.bf16.vlgmr.msra.gmra.mrb[0].mxu1 %v12522_v62  ;;  %10001 = vmatprep.subr.bf16.mxu0 %v11723_v38  ;;  %v571_v9 = vor.u32 %v570_v56, %v567_v55  ;;  %v2682_v10 = vrot.slane %v2680_v57, 4  ;;  %v2687_v12 = vrot.slane %v2685_v58, 3  ;;  %v574_v13 = vshrl.u32 %v492_v50, 16  ;;  %v369_v41 = vld [vmem:[%s12376_s6 + $0x70] sm:$0xff]  ;;  %v11729_v53 = vld [vmem:[#allocation7 + $0x20] sm:$0xff]   ;;  %v386_v58 = vld [vmem:[%s12376_s6 + $0xf8] sm:$0xff] }
  0xae   : > { %10288 = vmatpush3.bf16.msra.mxu1 %v12485_v46  ;;  %v2690_v15 = vrot.slane %v2688_v1, 4  ;;  %v577_v17 = vshll.u32 %v492_v50, 16  ;;  %v582_v18 = vshrl.u32 %v12517_v59, 16  ;;  %v585_v19 = vshll.u32 %v12517_v59, 16  ;;  %v385_v57 = vld [vmem:[%s12376_s6 + $0xf0] sm:$0xff] }
  0xaf   : > { %10289 = vmatprep.subr.bf16.mxu1 %v11724_v43  ;;  %v12539_v20 = vsel %vm504_vm0, %v563_v63, %v571_v9  ;;  %v2683_v21 = vor.u32 %v2682_v10, %v2679_v0  ;;  %v576_v22 = vrot.slane %v574_v13, 3  ;;  %v430_v23 = vrot.slane %v398_v60, 4  ;;  %v11730_v63 = vld [vmem:[#allocation7 + $0x20] sm:$0xff]  }
  0xb0   : > { %10002 = vmatpush3.bf16.msra.mxu0 %v11723_v38  ;;  %9987 = vmatprep.mubr.bf16.mxu0 %v12539_v20  ;;  %v2691_v46 = vor.u32 %v2690_v15, %v2687_v12  ;;  %v579_v24 = vrot.slane %v577_v17, 4  ;;  %v584_v25 = vrot.slane %v582_v18, 3  ;;  %v587_v26 = vrot.slane %v585_v19, 4  ;;  %v12567_v10 = vld [vmem:[#allocation2] sm:$0xf8]  ;;  %v11732_v12 = vld [vmem:[#allocation7 + $0x28] sm:$0xff]  }
  0xb1   : > { %10003 = vmatprep.subr.bf16.mxu0 %v12519_v61  ;;  %474 = vst [vmem:[#allocation2 + $0xc8] ss:$-4 sps:$4 sm:$0xff] %v430_v23   ;;  %v391_v45 = vpack.c.bf16 %v364_v3, %v363_v2  ;;  %v399_v48 = vpack.c.bf16 %v380_v5, %v379_v4  ;;  %v392_v60 = vpack.c.bf16 %v366_v7, %v365_v6  ;;  %v11731_v4 = vld [vmem:[#allocation7 + $0x28] sm:$0xff]   ;;  %v506_v13 = vshrl.u32 %v12567_v10, 16 }
  0xb2   : > { %v400_v31 = vpack.c.bf16 %v382_v14, %v381_v8  ;;  %10290 = vmatpush3.bf16.msra.mxu1 %v11724_v43  ;;  %v12550_v35 = vsel %vm504_vm0, %v2683_v21, %v2691_v46  ;;  %v580_v36 = vor.u32 %v579_v24, %v576_v22  ;;  %v588_v37 = vor.u32 %v587_v26, %v584_v25 }
  0xb3   : > { %v393_v38 = vpack.c.bf16 %v368_v33, %v367_v32  ;;  %10275 = vmatprep.mubr.bf16.mxu1 %v12550_v35  ;;  %10291 = vmatprep.subr.bf16.mxu1 %v11726_v42  ;;  %v423_v47 = vrot.slane %v391_v45, 4  ;;  %v431_v49 = vrot.slane %v399_v48, 4  ;;  %v424_v50 = vrot.slane %v392_v60, 4 }
  0xb4   : > { %v432_v52 = vrot.slane %v400_v31, 4  ;;  %v12557_v43 = vsel %vm504_vm0, %v580_v36, %v588_v37  ;;  %10004 = vmatpush3.bf16.msra.mxu0 %v12519_v61  ;;  %v401_v55 = vpack.c.bf16 %v384_v39, %v383_v34  ;;  %v394_v56 = vpack.c.bf16 %v370_v44, %v369_v41 }
  0xb5   : > { %v425_v54 = vrot.slane %v393_v38, 4  ;;  %9988 = vmatmul.mubr.bf16.gmra.mrb[4].mxu0 %v12557_v43  ;;  %10005 = vmatprep.subr.bf16.mxu0 %v11727_v27  ;;  %460 = vst [vmem:[#allocation2 + $0x58] ss:$-4 sps:$4 sm:$0xff] %v423_v47   ;;  %476 = vst [vmem:[#allocation2 + $0xd8] ss:$-4 sps:$4 sm:$0xff] %v431_v49   ;;  %v402_v2 = vpack.c.bf16 %v386_v58, %v385_v57  ;;  %v11734_v38 = vld [vmem:[#allocation7 + $0x30] sm:$0xff]  }
  0xb6   : > { %462 = vst [vmem:[#allocation2 + $0x68] ss:$-4 sps:$4 sm:$0xff] %v424_v50   ;;  %478 = vst [vmem:[#allocation2 + $0xe8] ss:$-4 sps:$4 sm:$0xff] %v432_v52   ;;  %10292 = vmatpush3.bf16.msra.mxu1 %v11726_v42  ;;  %v433_v0 = vrot.slane %v401_v55, 4  ;;  %v426_v1 = vrot.slane %v394_v56, 4 }
  0xb7   : > { %464 = vst [vmem:[#allocation2 + $0x78] ss:$-4 sps:$4 sm:$0xff] %v425_v54   ;;  %10293 = vmatprep.subr.bf16.mxu1 %v11728_v28  ;;  %v434_v5 = vrot.slane %v402_v2, 4  ;;  %v509_v42 = vshll.u32 %v12567_v10, 16  ;;  %v11735_v55 = vld [vmem:[#allocation7 + $0x38] sm:$0xff]  }
  0xb8   : > { %v2613_v61 = vld [vmem:[#allocation2 + $0xc0] sm:$0xf8]  ;;  %v12563_v3 = vld [vmem:[#allocation2 + $0xc8] sm:$0xf]  ;;  %10006 = vmatpush3.bf16.msra.mxu0 %v11727_v27  ;;  %480 = vst [vmem:[#allocation2 + $0xf8] ss:$-4 sps:$4 sm:$0xff] %v433_v0  }
  0xb9   : > { %466 = vst [vmem:[#allocation2 + $0x88] ss:$-4 sps:$4 sm:$0xff] %v426_v1   ;;  %v2694_v6 = vshrl.u32 %v2613_v61, 16  ;;  %v2697_v7 = vshll.u32 %v2613_v61, 16  ;;  %v2702_v8 = vshrl.u32 %v12563_v3, 16  ;;  %v2705_v9 = vshll.u32 %v12563_v3, 16  ;;  %10007 = vmatprep.subr.bf16.mxu0 %v11729_v53 }
  0xba   : > { %10294 = vmatpush3.bf16.msra.mxu1 %v11728_v28  ;;  %482 = vst [vmem:[#allocation2 + $0x108] ss:$-4 sps:$4 sm:$0xff] %v434_v5   ;;  %v11733_v27 = vld [vmem:[#allocation7 + $0x30] sm:$0xff]   ;;  %v11736_v1 = vld [vmem:[#allocation7 + $0x38] sm:$0xff]  }
  0xbb   : > { %v2696_v14 = vrot.slane %v2694_v6, 3  ;;  %v2699_v15 = vrot.slane %v2697_v7, 4  ;;  %v2704_v17 = vrot.slane %v2702_v8, 3  ;;  %v2707_v18 = vrot.slane %v2705_v9, 4  ;;  %10295 = vmatprep.subr.bf16.mxu1 %v11730_v63 }
  0xbc   : > { %v494_v19 = vld [vmem:[#allocation2 + $0x50] sm:$0xf8]  ;;  %v12571_v21 = vld [vmem:[#allocation2 + $0x58] sm:$0xf]  ;;  %10008 = vmatpush3.bf16.msra.mxu0 %v11729_v53 }
  0xbd   : > { %v2615_v22 = vld [vmem:[#allocation2 + $0xd0] sm:$0xf8]  ;;  %v2700_v23 = vor.u32 %v2699_v15, %v2696_v14  ;;  %v2708_v46 = vor.u32 %v2707_v18, %v2704_v17  ;;  %v591_v24 = vshrl.u32 %v494_v19, 16  ;;  %v594_v25 = vshll.u32 %v494_v19, 16  ;;  %v12573_v26 = vld [vmem:[#allocation2 + $0xd8] sm:$0xf]  ;;  %10009 = vmatprep.subr.bf16.mxu0 %v11731_v4 }
  0xbe   : > { %v599_v28 = vshrl.u32 %v12571_v21, 16  ;;  %v602_v45 = vshll.u32 %v12571_v21, 16  ;;  %v2711_v48 = vshrl.u32 %v2615_v22, 16  ;;  %v2714_v60 = vshll.u32 %v2615_v22, 16  ;;  %v496_v31 = vld [vmem:[#allocation2 + $0x60] sm:$0xf8]  ;;  %10296 = vmatpush3.bf16.msra.mxu1 %v11730_v63 }
  0xbf   : > { %v12578_v32 = vsel %vm504_vm0, %v2700_v23, %v2708_v46  ;;  %v593_v33 = vrot.slane %v591_v24, 3  ;;  %v596_v34 = vrot.slane %v594_v25, 4  ;;  %v2719_v36 = vshrl.u32 %v12573_v26, 16  ;;  %v12581_v37 = vld [vmem:[#allocation2 + $0x68] sm:$0xf]  ;;  %10297 = vmatprep.subr.bf16.mxu1 %v11732_v12  ;;  %v12596_v22 = vld [vmem:[#allocation7 + $0x180] sm:$0xff]  }
  0xc0   : > { %10276 = vmatmul.mubr.bf16.gmra.mrb[4].mxu1 %v12578_v32  ;;  %v601_v39 = vrot.slane %v599_v28, 3  ;;  %v604_v41 = vrot.slane %v602_v45, 4  ;;  %v2713_v44 = vrot.slane %v2711_v48, 3  ;;  %v2716_v47 = vrot.slane %v2714_v60, 4  ;;  %v2617_v49 = vld [vmem:[#allocation2 + $0xe0] sm:$0xf8]  ;;  %10010 = vmatpush3.bf16.msra.mxu0 %v11731_v4 }
  0xc1   : > { %v597_v50 = vor.u32 %v596_v34, %v593_v33  ;;  %v2721_v52 = vrot.slane %v2719_v36, 3  ;;  %v2722_v53 = vshll.u32 %v12573_v26, 16  ;;  %v608_v54 = vshrl.u32 %v496_v31, 16  ;;  %10011 = vmatprep.subr.bf16.mxu0 %v11733_v27  ;;  %v12586_v0 = vld [vmem:[#allocation2 + $0xe8] sm:$0xf] }
  0xc2   : > { %v605_v56 = vor.u32 %v604_v41, %v601_v39  ;;  %v2717_v57 = vor.u32 %v2716_v47, %v2713_v44  ;;  %v611_v58 = vshll.u32 %v496_v31, 16  ;;  %v616_v63 = vshrl.u32 %v12581_v37, 16  ;;  %10298 = vmatpush3.bf16.msra.mxu1 %v11732_v12  ;;  %v498_v6 = vld [vmem:[#allocation2 + $0x70] sm:$0xf8]  ;;  %v12594_v19 = vld [vmem:[#allocation2 + $0x78] sm:$0xf] }
  0xc3   : > { %v2724_v2 = vrot.slane %v2722_v53, 4  ;;  %v610_v61 = vrot.slane %v608_v54, 3  ;;  %v619_v4 = vshll.u32 %v12581_v37, 16  ;;  %v2728_v5 = vshrl.u32 %v2617_v49, 16  ;;  %10299 = vmatprep.subr.bf16.mxu1 %v11734_v38  ;;  %v2619_v28 = vld [vmem:[#allocation2 + $0xf0] sm:$0xf8] }
  0xc4   : > { %v12590_v7 = vsel %vm504_vm0, %v597_v50, %v605_v56  ;;  %v613_v8 = vrot.slane %v611_v58, 4  ;;  %v618_v9 = vrot.slane %v616_v63, 3  ;;  %v2731_v14 = vshll.u32 %v2617_v49, 16  ;;  %10012 = vmatpush3.bf16.msra.mxu0 %v11733_v27  ;;  %v12599_v27 = vld [vmem:[#allocation7 + $0x180] sm:$0xff]   ;;  %v12604_v33 = vld [vmem:[#allocation2 + $0xf8] sm:$0xf] }
  0xc5   : > { %9991 = vmatprep.mubr.bf16.mxu0 %v12590_v7  ;;  %v2725_v15 = vor.u32 %v2724_v2, %v2721_v52  ;;  %v621_v17 = vrot.slane %v619_v4, 4  ;;  %v2730_v12 = vrot.slane %v2728_v5, 3  ;;  %v2736_v18 = vshrl.u32 %v12586_v0, 16  ;;  %10013 = vmatprep.subr.bf16.mxu0 %v11735_v55  ;;  %v500_v34 = vld [vmem:[#allocation2 + $0x80] sm:$0xf8] }
  0xc6   : > { %v614_v23 = vor.u32 %v613_v8, %v610_v61  ;;  %v2733_v46 = vrot.slane %v2731_v14, 4  ;;  %v2739_v24 = vshll.u32 %v12586_v0, 16  ;;  %v625_v25 = vshrl.u32 %v498_v6, 16  ;;  %10300 = vmatpush3.bf16.msra.mxu1 %v11734_v38  ;;  %v12608_v38 = vld [vmem:[#allocation2 + $0x88] sm:$0xf] }
  0xc7   : > { %v12602_v45 = vsel %vm504_vm0, %v2717_v57, %v2725_v15  ;;  %v622_v48 = vor.u32 %v621_v17, %v618_v9  ;;  %v2738_v60 = vrot.slane %v2736_v18, 3  ;;  %v628_v31 = vshll.u32 %v498_v6, 16  ;;  %10301 = vmatprep.subr.bf16.mxu1 %v11736_v1  ;;  %v2621_v53 = vld [vmem:[#allocation2 + $0x100] sm:$0xf8]  ;;  %v12618_v4 = vld [vmem:[#allocation2 + $0x108] sm:$0xf] }
  0xc8   : > { %10279 = vmatprep.mubr.bf16.mxu1 %v12602_v45  ;;  %v2734_v36 = vor.u32 %v2733_v46, %v2730_v12  ;;  %v2741_v39 = vrot.slane %v2739_v24, 4  ;;  %v627_v41 = vrot.slane %v625_v25, 3  ;;  %v633_v44 = vshrl.u32 %v12594_v19, 16  ;;  %10014 = vmatpush3.bf16.msra.mxu0 %v11735_v55  ;;  %v12627_v24 = vld [vmem:[#allocation2 + $0x8] sm:$0xf] }
  0xc9   : > { %v12611_v47 = vsel %vm504_vm0, %v614_v23, %v622_v48  ;;  %v630_v49 = vrot.slane %v628_v31, 4  ;;  %v636_v50 = vshll.u32 %v12594_v19, 16  ;;  %v2745_v52 = vshrl.u32 %v2619_v28, 16  ;;  %10031 = vmatprep.subr.bf16.mxu0 %v12596_v22  ;;  %v2605_v25 = vld [vmem:[#allocation2 + $0x80] sm:$0xf8] }
  0xca   : > { %9992 = vmatmul.mubr.bf16.gmra.mrb[8].mxu0 %v12611_v47  ;;  %v2742_v54 = vor.u32 %v2741_v39, %v2738_v60  ;;  %v635_v56 = vrot.slane %v633_v44, 3  ;;  %v2748_v57 = vshll.u32 %v2619_v28, 16  ;;  %v2753_v58 = vshrl.u32 %v12604_v33, 16  ;;  %10302 = vmatpush3.bf16.msra.mxu1 %v11736_v1 }
  0xcb   : > { %v631_v63 = vor.u32 %v630_v49, %v627_v41  ;;  %v638_v55 = vrot.slane %v636_v50, 4  ;;  %v2747_v2 = vrot.slane %v2745_v52, 3  ;;  %v2756_v61 = vshll.u32 %v12604_v33, 16  ;;  %10319 = vmatprep.subr.bf16.mxu1 %v12599_v27 }
  0xcc   : > { %v12622_v5 = vsel %vm504_vm0, %v2734_v36, %v2742_v54  ;;  %v2750_v6 = vrot.slane %v2748_v57, 4  ;;  %v2755_v8 = vrot.slane %v2753_v58, 3  ;;  %v666_v9 = vshrl.u32 %v500_v34, 16  ;;  %v12640_v54 = vld [vmem:[#allocation2 + $0x88] sm:$0xf] }
  0xcd   : > { %10280 = vmatmul.mubr.bf16.gmra.mrb[8].mxu1 %v12622_v5  ;;  %v639_v14 = vor.u32 %v638_v55, %v635_v56  ;;  %v2758_v15 = vrot.slane %v2756_v61, 4  ;;  %v669_v1 = vshll.u32 %v500_v34, 16  ;;  %v674_v17 = vshrl.u32 %v12608_v38, 16 }
  0xce   : > { %v2751_v12 = vor.u32 %v2750_v6, %v2747_v2  ;;  %v668_v18 = vrot.slane %v666_v9, 3  ;;  %v677_v23 = vshll.u32 %v12608_v38, 16  ;;  %v2786_v46 = vshrl.u32 %v2621_v53, 16 }
  0xcf   : > { %v12630_v28 = vsel %vm504_vm0, %v631_v63, %v639_v14  ;;  %v2759_v48 = vor.u32 %v2758_v15, %v2755_v8  ;;  %v671_v60 = vrot.slane %v669_v1, 4  ;;  %v676_v31 = vrot.slane %v674_v17, 3 }
  0xd0   : > { %9995 = vmatprep.mubr.bf16.mxu0 %v12630_v28  ;;  %v679_v36 = vrot.slane %v677_v23, 4  ;;  %v2788_v34 = vrot.slane %v2786_v46, 3  ;;  %v2789_v39 = vshll.u32 %v2621_v53, 16  ;;  %v2794_v41 = vshrl.u32 %v12618_v4, 16 }
  0xd1   : > { %v12635_v44 = vsel %vm504_vm0, %v2751_v12, %v2759_v48  ;;  %v672_v49 = vor.u32 %v671_v60, %v668_v18  ;;  %v2797_v50 = vshll.u32 %v12618_v4, 16  ;;  %v508_v52 = vrot.slane %v506_v13, 3 }
  0xd2   : > { %10283 = vmatprep.mubr.bf16.mxu1 %v12635_v44  ;;  %v680_v56 = vor.u32 %v679_v36, %v676_v31  ;;  %v2791_v57 = vrot.slane %v2789_v39, 4  ;;  %v2796_v58 = vrot.slane %v2794_v41, 3  ;;  %v511_v53 = vrot.slane %v509_v42, 4  ;;  %v11739_v31 = vld [vmem:[#allocation7 + $0x188] sm:$0xff]   ;;  %v11741_v41 = vld [vmem:[#allocation7 + $0x190] sm:$0xff]  }
  0xd3   : > { %v2799_v63 = vrot.slane %v2797_v50, 4  ;;  %v514_v55 = vshrl.u32 %v12627_v24, 16  ;;  %v517_v2 = vshll.u32 %v12627_v24, 16  ;;  %v2626_v61 = vshrl.u32 %v2605_v25, 16  ;;  %v11740_v39 = vld [vmem:[#allocation7 + $0x188] sm:$0xff]   ;;  %v11743_v50 = vld [vmem:[#allocation7 + $0x198] sm:$0xff]  }
  0xd4   : > { %v12648_v6 = vsel %vm504_vm0, %v672_v49, %v680_v56  ;;  %v2792_v13 = vor.u32 %v2791_v57, %v2788_v34  ;;  %v512_v8 = vor.u32 %v511_v53, %v508_v52  ;;  %v2629_v9 = vshll.u32 %v2605_v25, 16  ;;  %v11742_v49 = vld [vmem:[#allocation7 + $0x190] sm:$0xff]   ;;  %v11748_v52 = vld [vmem:[#allocation7 + $0x1a8] sm:$0xff]   ;;  %v11752_v53 = vld [vmem:[#allocation7 + $0x1b8] sm:$0xff]  }
  0xd5   : > { %9996 = vmatmul.mubr.bf16.gmra.mrb[12].mxu0 %v12648_v6  ;;  %v2800_v14 = vor.u32 %v2799_v63, %v2796_v58  ;;  %v516_v15 = vrot.slane %v514_v55, 3  ;;  %v519_v1 = vrot.slane %v517_v2, 4  ;;  %v2628_v17 = vrot.slane %v2626_v61, 3  ;;  %v11749_v56 = vld [vmem:[#allocation7 + $0x1b0] sm:$0xff]   ;;  %v11751_v58 = vld [vmem:[#allocation7 + $0x1b8] sm:$0xff]   ;;  %v11753_v63 = vld [vmem:[#allocation7 + $0x40] sm:$0xff]  }
  0xd6   : > { %v2631_v10 = vrot.slane %v2629_v9, 4  ;;  %v2634_v42 = vshrl.u32 %v12640_v54, 16  ;;  %v2637_v12 = vshll.u32 %v12640_v54, 16  ;;  %v11750_v57 = vld [vmem:[#allocation7 + $0x1b0] sm:$0xff]   ;;  %v11754_v55 = vld [vmem:[#allocation7 + $0x40] sm:$0xff]   ;;  %v11755_v2 = vld [vmem:[#allocation7 + $0x48] sm:$0xff]  }
  0xd7   : > { %v12654_v18 = vsel %vm504_vm0, %v2792_v13, %v2800_v14  ;;  %v520_v23 = vor.u32 %v519_v1, %v516_v15  ;;  %v1214_v61 = vrot.slane %v12627_v24, 4  ;;  %v11756_v13 = vld [vmem:[#allocation7 + $0x48] sm:$0xff]   ;;  %v11758_v14 = vld [vmem:[#allocation7 + $0x50] sm:$0xff]   ;;  %v12737_v24 = vld [vmem:[#allocation2 + $0xa0] sm:$0xf0] }
  0xd8   : > { %10284 = vmatmul.mubr.bf16.gmra.mrb[12].mxu1 %v12654_v18  ;;  %v2632_v46 = vor.u32 %v2631_v10, %v2628_v17  ;;  %v2636_v48 = vrot.slane %v2634_v42, 3  ;;  %v2639_v25 = vrot.slane %v2637_v12, 4  ;;  %v502_v15 = vld [vmem:[#allocation2 + $0x90] sm:$0xf8]  ;;  %v12688_v17 = vld [vmem:[#allocation2 + $0x28] sm:$0xf] }
  0xd9   : > { %v521_v60 = vsel %vm504_vm0, %v512_v8, %v520_v23  ;;  %v11757_v8 = vld [vmem:[#allocation7 + $0x50] sm:$0xff]   ;;  %v1220_v10 = vrot.slane %v12688_v17, 4  ;;  %v3337_v42 = vrot.slane %v12493_v11, 4  ;;  %v1223_v12 = vrot.slane %v12502_v29, 4 }
  0xda   : > { %10015 = vmatprep.mubr.bf16.mxu0 %v521_v60  ;;  %v2640_v36 = vor.u32 %v2639_v25, %v2636_v48  ;;  %v1226_v23 = vrot.slane %v12517_v59, 4  ;;  %v991_v48 = vshrl.u32 %v502_v15, 16  ;;  %v994_v25 = vshll.u32 %v502_v15, 16  ;;  %v11760_v60 = vld [vmem:[#allocation7 + $0x58] sm:$0xff]   ;;  %v12798_v29 = vld [vmem:[#allocation2 + $0x70] sm:$0xf0] }
  0xdc   : > { %v2641_v34 = vsel %vm504_vm0, %v2632_v46, %v2640_v36  ;;  %v12696_v46 = vld [vmem:[#allocation2 + $0x98] sm:$0xf] }
  0xdd   : > { %10303 = vmatprep.mubr.bf16.mxu1 %v2641_v34  ;;  %10016 = vmatmul.mubr.bf16.vlgmr.msra.gmra.mrb[0].mxu0 %v12497_v16  ;;  %v11744_v16 = vld [vmem:[#allocation7 + $0x198] sm:$0xff]   ;;  %v999_v34 = vshrl.u32 %v12696_v46, 16 }
  0xde   : > { %10032 = vmatpush3.bf16.msra.mxu0 %v12596_v22  ;;  %10019 = vmatprep.mubr.bf16.mxu0 %v12513_v51  ;;  %v11745_v22 = vld [vmem:[#allocation7 + $0x1a0] sm:$0xff]   ;;  %v12699_v36 = vld [vmem:[#allocation2 + $0x118] sm:$0xf] }
  0xdf   : > { %10033 = vmatprep.subr.bf16.mxu0 %v11739_v31 }
  0xe0   : > { %10304 = vmatmul.mubr.bf16.vlgmr.msra.gmra.mrb[0].mxu1 %v12505_v30  ;;  %v11746_v30 = vld [vmem:[#allocation7 + $0x1a0] sm:$0xff]  }
  0xe1   : > { %10320 = vmatpush3.bf16.msra.mxu1 %v12599_v27  ;;  %10307 = vmatprep.mubr.bf16.mxu1 %v12522_v62  ;;  %v11747_v27 = vld [vmem:[#allocation7 + $0x1a8] sm:$0xff]  }
  0xe2   : > { %10321 = vmatprep.subr.bf16.mxu1 %v11740_v39  ;;  %10034 = vmatpush3.bf16.msra.mxu0 %v11739_v31  ;;  %v2623_v31 = vld [vmem:[#allocation2 + $0x110] sm:$0xf8] }
  0xe3   : > { %10035 = vmatprep.subr.bf16.mxu0 %v11741_v41 }
  0xe5   : > { %10322 = vmatpush3.bf16.msra.mxu1 %v11740_v39  ;;  %10020 = vmatmul.mubr.bf16.gmra.mrb[4].mxu0 %v12539_v20  ;;  %v1002_v39 = vshll.u32 %v12696_v46, 16 }
  0xe6   : > { %10323 = vmatprep.subr.bf16.mxu1 %v11742_v49  ;;  %10036 = vmatpush3.bf16.msra.mxu0 %v11741_v41  ;;  %v3110_v41 = vshrl.u32 %v2623_v31, 16 }
  0xe7   : > { %10037 = vmatprep.subr.bf16.mxu0 %v11743_v50  ;;  %10023 = vmatprep.mubr.bf16.mxu0 %v12557_v43 }
  0xe8   : > { %10308 = vmatmul.mubr.bf16.gmra.mrb[4].mxu1 %v12550_v35 }
  0xe9   : > { %10324 = vmatpush3.bf16.msra.mxu1 %v11742_v49  ;;  %10311 = vmatprep.mubr.bf16.mxu1 %v12578_v32  ;;  %v3113_v49 = vshll.u32 %v2623_v31, 16  ;;  %v11767_v31 = vld [vmem:[#allocation7 + $0x78] sm:$0xff]  }
  0xea   : > { %10325 = vmatprep.subr.bf16.mxu1 %v11744_v16  ;;  %10038 = vmatpush3.bf16.msra.mxu0 %v11743_v50  ;;  %v11762_v50 = vld [vmem:[#allocation7 + $0x60] sm:$0xff]  }
  0xeb   : > { %10039 = vmatprep.subr.bf16.mxu0 %v11745_v22 }
  0xed   : > { %10326 = vmatpush3.bf16.msra.mxu1 %v11744_v16  ;;  %10024 = vmatmul.mubr.bf16.gmra.mrb[8].mxu0 %v12590_v7  ;;  %v3118_v16 = vshrl.u32 %v12699_v36, 16 }
  0xee   : > { %10327 = vmatprep.subr.bf16.mxu1 %v11746_v30  ;;  %10040 = vmatpush3.bf16.msra.mxu0 %v11745_v22  ;;  %v11763_v22 = vld [vmem:[#allocation7 + $0x68] sm:$0xff]  }
  0xef   : > { %10041 = vmatprep.subr.bf16.mxu0 %v11747_v27  ;;  %10027 = vmatprep.mubr.bf16.mxu0 %v12611_v47 }
  0xf0   : > { %10312 = vmatmul.mubr.bf16.gmra.mrb[8].mxu1 %v12602_v45 }
  0xf1   : > { %10328 = vmatpush3.bf16.msra.mxu1 %v11746_v30  ;;  %10315 = vmatprep.mubr.bf16.mxu1 %v12622_v5  ;;  %v993_v30 = vrot.slane %v991_v48, 3  ;;  %v11766_v48 = vld [vmem:[#allocation7 + $0x70] sm:$0xff]  }
  0xf2   : > { %10329 = vmatprep.subr.bf16.mxu1 %v11748_v52  ;;  %10042 = vmatpush3.bf16.msra.mxu0 %v11747_v27  ;;  %v996_v27 = vrot.slane %v994_v25, 4  ;;  %v12719_v25 = vld [vmem:[#allocation2 + $0x10] sm:$0xf0] }
  0xf3   : > { %10043 = vmatprep.subr.bf16.mxu0 %v11749_v56 }
  0xf5   : > { %10330 = vmatpush3.bf16.msra.mxu1 %v11748_v52  ;;  %10028 = vmatmul.mubr.bf16.gmra.mrb[12].mxu0 %v12630_v28  ;;  %v1001_v52 = vrot.slane %v999_v34, 3  ;;  %v11768_v34 = vld [vmem:[#allocation7 + $0x78] sm:$0xff]  }
  0xf6   : > { %10331 = vmatprep.subr.bf16.mxu1 %v11750_v57  ;;  %10044 = vmatpush3.bf16.msra.mxu0 %v11749_v56  ;;  %v3112_v56 = vrot.slane %v3110_v41, 3 }
  0xf7   : > { %10045 = vmatprep.subr.bf16.mxu0 %v11751_v58  ;;  %10047 = vmatprep.mubr.bf16.mxu0 %v12513_v51  ;;  %v3331_v51 = vrot.slane %v12640_v54, 4 }
  0xf8   : > { %10316 = vmatmul.mubr.bf16.gmra.mrb[12].mxu1 %v12635_v44 }
  0xf9   : > { %10332 = vmatpush3.bf16.msra.mxu1 %v11750_v57  ;;  %10335 = vmatprep.mubr.bf16.mxu1 %v12522_v62  ;;  %v12681_v62 = vld [vmem:[#allocation2 + $0x18] sm:$0xf]  ;;  %v3115_v57 = vrot.slane %v3113_v49, 4  ;;  %v12731_v49 = vld [vmem:[#allocation2 + $0x90] sm:$0xf0] }
  0xfa   : > { %10333 = vmatprep.subr.bf16.mxu1 %v11752_v53  ;;  %10046 = vmatpush3.bf16.msra.mxu0 %v11751_v58  ;;  %v1217_v9 = vrot.slane %v12681_v62, 4  ;;  %v3120_v58 = vrot.slane %v3118_v16, 3  ;;  %v11769_v16 = vld [vmem:[#allocation7 + $0x100] sm:$0xff]  }
  0xfb   : > { %10063 = vmatprep.subr.bf16.mxu0 %v11753_v63  ;;  %v3116_v15 = vor.u32 %v3115_v57, %v3112_v56  ;;  %v3349_v56 = vrot.slane %v12586_v0, 4  ;;  %v11772_v57 = vld [vmem:[#allocation7 + $0x108] sm:$0xff]   ;;  %v11781_v0 = vld [vmem:[#allocation7 + $0x130] sm:$0xff]  }
  0xfd   : > { %10334 = vmatpush3.bf16.msra.mxu1 %v11752_v53  ;;  %10048 = vmatmul.mubr.bf16.vlgmr.msra.gmra.mrb[0].mxu0 %v12539_v20  ;;  %v12685_v20 = vld [vmem:[#allocation2 + $0x98] sm:$0xf] }
  0xfe   : > { %10351 = vmatprep.subr.bf16.mxu1 %v11754_v55  ;;  %10064 = vmatpush3.bf16.msra.mxu0 %v11753_v63  ;;  %v3334_v1 = vrot.slane %v12685_v20, 4  ;;  %v12709_v63 = vld [vmem:[#allocation2] sm:$0xf0]  ;;  %v11774_v20 = vld [vmem:[#allocation7 + $0x110] sm:$0xff]  }
  0xff   : > { %10065 = vmatprep.subr.bf16.mxu0 %v11755_v2  ;;  %10051 = vmatprep.mubr.bf16.mxu0 %v12557_v43  ;;  %v11759_v43 = vld [vmem:[#allocation7 + $0x58] sm:$0xff]  }
 0x100   : > { %10336 = vmatmul.mubr.bf16.vlgmr.msra.gmra.mrb[0].mxu1 %v12550_v35  ;;  %v3340_v35 = vrot.slane %v12508_v40, 4 }
 0x101   : > { %10352 = vmatpush3.bf16.msra.mxu1 %v11754_v55  ;;  %10339 = vmatprep.mubr.bf16.mxu1 %v12578_v32  ;;  %v11761_v32 = vld [vmem:[#allocation7 + $0x60] sm:$0xff]  }
 0x102   : > { %10353 = vmatprep.subr.bf16.mxu1 %v11756_v13  ;;  %10066 = vmatpush3.bf16.msra.mxu0 %v11755_v2  ;;  %v11765_v2 = vld [vmem:[#allocation7 + $0x70] sm:$0xff]  }
 0x103   : > { %10067 = vmatprep.subr.bf16.mxu0 %v11757_v8 }
 0x105   : > { %10354 = vmatpush3.bf16.msra.mxu1 %v11756_v13  ;;  %10052 = vmatmul.mubr.bf16.gmra.mrb[4].mxu0 %v12590_v7  ;;  %v3121_v7 = vshll.u32 %v12699_v36, 16  ;;  %v3343_v13 = vrot.slane %v12563_v3, 4 }
 0x106   : > { %10355 = vmatprep.subr.bf16.mxu1 %v11758_v14  ;;  %10068 = vmatpush3.bf16.msra.mxu0 %v11757_v8  ;;  %v12713_v8 = vld [vmem:[#allocation2 + $0x80] sm:$0xf0] }
 0x107   : > { %10069 = vmatprep.subr.bf16.mxu0 %v11759_v43  ;;  %10055 = vmatprep.mubr.bf16.mxu0 %v12611_v47  ;;  %v1004_v47 = vrot.slane %v1002_v39, 4  ;;  %v3123_v53 = vrot.slane %v3121_v7, 4  ;;  %v1216_v39 = vrot.slane %v12719_v25, 4 }
 0x108   : > { %10340 = vmatmul.mubr.bf16.gmra.mrb[4].mxu1 %v12602_v45  ;;  %v11764_v45 = vld [vmem:[#allocation7 + $0x68] sm:$0xff]  }
 0x109   : > { %10356 = vmatpush3.bf16.msra.mxu1 %v11758_v14  ;;  %10343 = vmatprep.mubr.bf16.mxu1 %v12622_v5  ;;  %v997_v5 = vor.u32 %v996_v27, %v993_v30  ;;  %v1005_v55 = vor.u32 %v1004_v47, %v1001_v52  ;;  %v1213_v14 = vrot.slane %v12709_v63, 4  ;;  %v3333_v30 = vrot.slane %v12731_v49, 4  ;;  %v11771_v27 = vld [vmem:[#allocation7 + $0x108] sm:$0xff]  }
 0x10a   : > { %10357 = vmatprep.subr.bf16.mxu1 %v11760_v60  ;;  %10070 = vmatpush3.bf16.msra.mxu0 %v11759_v43  ;;  %v3124_v43 = vor.u32 %v3123_v53, %v3120_v58  ;;  %v12745_v54 = vsel %vm1212_vm1, %v1216_v39, %v1217_v9  ;;  %v1232_v52 = vrot.slane %v12581_v37, 4  ;;  %v12756_v58 = vld [vmem:[#allocation2 + $0xb0] sm:$0xf0]  ;;  %v12764_v53 = vld [vmem:[#allocation2 + $0x40] sm:$0xf0] }
 0x10b   : > { %10071 = vmatprep.subr.bf16.mxu0 %v11761_v32  ;;  %v12762_v62 = vsel %vm1212_vm1, %v3333_v30, %v3334_v1  ;;  %v11773_v9 = vld [vmem:[#allocation7 + $0x110] sm:$0xff]   ;;  %v1225_v1 = vrot.slane %v12764_v53, 4  ;;  %v3339_v11 = vrot.slane %v12756_v58, 4  ;;  %v11779_v30 = vld [vmem:[#allocation7 + $0x128] sm:$0xff]  }
 0x10c   : > { %v3125_v41 = vsel %vm504_vm0, %v3116_v15, %v3124_v43  ;;  %v12787_v15 = vld [vmem:[#allocation2 + $0xd0] sm:$0xf0]  ;;  %v12789_v43 = vld [vmem:[#allocation2 + $0x60] sm:$0xf0] }
 0x10d   : > { %10358 = vmatpush3.bf16.msra.mxu1 %v11760_v60  ;;  %10056 = vmatmul.mubr.bf16.gmra.mrb[8].mxu0 %v12630_v28  ;;  %v1229_v28 = vrot.slane %v12571_v21, 4  ;;  %v3346_v60 = vrot.slane %v12573_v26, 4  ;;  %v3345_v40 = vrot.slane %v12787_v15, 4  ;;  %v1231_v3 = vrot.slane %v12789_v43, 4  ;;  %v12836_v21 = vld [vmem:[#allocation2 + $0x80] sm:$0xf0] }
 0x10e   : > { %10359 = vmatprep.subr.bf16.mxu1 %v11762_v50  ;;  %10072 = vmatpush3.bf16.msra.mxu0 %v11761_v32  ;;  %v12724_v32 = vld [vmem:[#allocation2 + $0x20] sm:$0xf0] }
 0x10f   : > { %10073 = vmatprep.subr.bf16.mxu0 %v11763_v22  ;;  %10059 = vmatprep.mubr.bf16.mxu0 %v12648_v6  ;;  %v1006_v6 = vsel %vm504_vm0, %v997_v5, %v1005_v55  ;;  %v1219_v7 = vrot.slane %v12724_v32, 4  ;;  %v12774_v5 = vld [vmem:[#allocation2 + $0x50] sm:$0xf0]  ;;  %v11775_v55 = vld [vmem:[#allocation7 + $0x118] sm:$0xff]   ;;  %v1837_v37 = vshrl.u32 %v12724_v32, 16 }
 0x110   : > { %10344 = vmatmul.mubr.bf16.gmra.mrb[8].mxu1 %v12635_v44  ;;  %v3330_v44 = vrot.slane %v12713_v8, 4 }
 0x111   : > { %10360 = vmatpush3.bf16.msra.mxu1 %v11762_v50  ;;  %10347 = vmatprep.mubr.bf16.mxu1 %v12654_v18  ;;  %v1215_v18 = vsel %vm1212_vm1, %v1213_v14, %v1214_v61  ;;  %v11770_v61 = vld [vmem:[#allocation7 + $0x100] sm:$0xff]   ;;  %v1228_v14 = vrot.slane %v12774_v5, 4 }
 0x112   : > { %10361 = vmatprep.subr.bf16.mxu1 %v11764_v45  ;;  %10074 = vmatpush3.bf16.msra.mxu0 %v11763_v22  ;;  %v3332_v50 = vsel %vm1212_vm1, %v3330_v44, %v3331_v51  ;;  %v12739_v22 = vld [vmem:[#allocation2 + $0x30] sm:$0xf0]  ;;  %v3336_v51 = vrot.slane %v12737_v24, 4  ;;  %v11776_v44 = vld [vmem:[#allocation7 + $0x118] sm:$0xff]  }
 0x113   : > { %10075 = vmatprep.subr.bf16.mxu0 %v11765_v2  ;;  %v1222_v47 = vrot.slane %v12739_v22, 4 }
 0x114   : > { %v12769_v17 = vsel %vm1212_vm1, %v3336_v51, %v3337_v42  ;;  %v3919_v51 = vshll.u32 %v12713_v8, 16 }
 0x115   : > { %10362 = vmatpush3.bf16.msra.mxu1 %v11764_v45  ;;  %10060 = vmatmul.mubr.bf16.gmra.mrb[12].mxu0 %v1006_v6  ;;  %v12754_v45 = vsel %vm1212_vm1, %v1219_v7, %v1220_v10  ;;  %v12771_v10 = vld [vmem:[#allocation2 + $0xc0] sm:$0xf0]  ;;  %v12783_v42 = vsel %vm1212_vm1, %v1222_v47, %v1223_v12  ;;  %v12796_v6 = vsel %vm1212_vm1, %v1225_v1, %v1226_v23  ;;  %v1235_v23 = vrot.slane %v12594_v19, 4 }
 0x116   : > { %10363 = vmatprep.subr.bf16.mxu1 %v11766_v48  ;;  %10076 = vmatpush3.bf16.msra.mxu0 %v11765_v2  ;;  %v3342_v2 = vrot.slane %v12771_v10, 4  ;;  %v12804_v12 = vsel %vm1212_vm1, %v3339_v11, %v3340_v35  ;;  %v3352_v35 = vrot.slane %v12604_v33, 4  ;;  %v1234_v19 = vrot.slane %v12798_v29, 4 }
 0x117   : > { %10077 = vmatprep.subr.bf16.mxu0 %v11767_v31  ;;  %10079 = vmatprep.mubr.bf16.mxu0 %v1215_v18  ;;  %v1806_v7 = vshll.u32 %v12709_v63, 16  ;;  %v1820_v47 = vshrl.u32 %v12719_v25, 16  ;;  %v3936_v1 = vshll.u32 %v12731_v49, 16 }
 0x118   : > { %10348 = vmatmul.mubr.bf16.gmra.mrb[12].mxu1 %v3125_v41  ;;  %v12811_v59 = vsel %vm1212_vm1, %v3342_v2, %v3343_v13 }
 0x119   : > { %10364 = vmatpush3.bf16.msra.mxu1 %v11766_v48  ;;  %10367 = vmatprep.mubr.bf16.mxu1 %v3332_v50  ;;  %v12791_v48 = vld [vmem:[#allocation2 + $0xe0] sm:$0xf0]  ;;  %v12828_v50 = vsel %vm1212_vm1, %v1228_v14, %v1229_v28  ;;  %v12864_v26 = vrot.slane %v1806_v7, 5  ;;  %v12871_v2 = vrot.slane %v1820_v47, 4  ;;  %v11782_v14 = vld [vmem:[#allocation7 + $0x130] sm:$0xff]  }
 0x11a   : > { %10365 = vmatprep.subr.bf16.mxu1 %v11768_v34  ;;  %10078 = vmatpush3.bf16.msra.mxu0 %v11767_v31  ;;  %v12806_v31 = vld [vmem:[#allocation2 + $0xf0] sm:$0xf0]  ;;  %v3348_v13 = vrot.slane %v12791_v48, 4  ;;  %v12838_v28 = vld [vmem:[#allocation2 + $0x100] sm:$0xf0] }
 0x11b   : > { %10095 = vmatprep.subr.bf16.mxu0 %v11769_v16  ;;  %v3351_v41 = vrot.slane %v12806_v31, 4  ;;  %v1791_v7 = vld [vmem:[#allocation2 + $0x8] sm:$0x1f]  ;;  %v12890_v47 = vld [vmem:[#allocation2 + $0x90] sm:$0xf0] }
 0x11c   : > { %v1811_v11 = vshrl.u32 %v1791_v7, 16 }
 0x11d   : > { %10366 = vmatpush3.bf16.msra.mxu1 %v11768_v34  ;;  %10080 = vmatmul.mubr.bf16.vlgmr.msra.gmra.mrb[0].mxu0 %v12745_v54  ;;  %v11777_v34 = vld [vmem:[#allocation7 + $0x120] sm:$0xff]  }
 0x11e   : > { %10383 = vmatprep.subr.bf16.mxu1 %v11770_v61  ;;  %10096 = vmatpush3.bf16.msra.mxu0 %v11769_v16  ;;  %v1803_v16 = vshrl.u32 %v12709_v63, 16  ;;  %v12843_v63 = vsel %vm1212_vm1, %v1231_v3, %v1232_v52  ;;  %v1840_v52 = vshll.u32 %v12724_v32, 16  ;;  %v12880_v3 = vrot.slane %v3936_v1, 5 }
 0x11f   : > { %10097 = vmatprep.subr.bf16.mxu0 %v11771_v27  ;;  %10083 = vmatprep.mubr.bf16.mxu0 %v12754_v45  ;;  %v1857_v1 = vshll.u32 %v12739_v22, 16 }
 0x120   : > { %10368 = vmatmul.mubr.bf16.vlgmr.msra.gmra.mrb[0].mxu1 %v12762_v62  ;;  %14044 = vst [vmem:[#allocation16_spill] sm:$0xff] %v12880_v3 }
 0x121   : > { %10384 = vmatpush3.bf16.msra.mxu1 %v11770_v61  ;;  %10371 = vmatprep.mubr.bf16.mxu1 %v12769_v17  ;;  %v11778_v61 = vld [vmem:[#allocation7 + $0x120] sm:$0xff]  }
 0x122   : > { %10385 = vmatprep.subr.bf16.mxu1 %v11772_v57  ;;  %10098 = vmatpush3.bf16.msra.mxu0 %v11771_v27  ;;  %v3916_v27 = vshrl.u32 %v12713_v8, 16  ;;  %v12851_v8 = vsel %vm1212_vm1, %v3345_v40, %v3346_v60 }
 0x123   : > { %10099 = vmatprep.subr.bf16.mxu0 %v11773_v9 }
 0x124   : > { %v12867_v60 = vrot.slane %v3916_v27, 4  ;;  %v12886_v27 = vrot.slane %v1837_v37, 4  ;;  %v11784_v37 = vld [vmem:[#allocation7 + $0x138] sm:$0xff]  }
 0x125   : > { %10386 = vmatpush3.bf16.msra.mxu1 %v11772_v57  ;;  %10084 = vmatmul.mubr.bf16.gmra.mrb[4].mxu0 %v12783_v42  ;;  %v1823_v57 = vshll.u32 %v12719_v25, 16  ;;  %v12856_v25 = vsel %vm1212_vm1, %v3348_v13, %v3349_v56  ;;  %v12869_v56 = vrot.slane %v3919_v51, 5  ;;  %v12884_v13 = vsel %vm1212_vm1, %v1234_v19, %v1235_v23  ;;  %v12896_v23 = vld [vmem:[#allocation2 + $0x110] sm:$0xf0]  ;;  %v3905_v19 = vld [vmem:[#allocation2 + $0x88] sm:$0x1f] }
 0x126   : > { %10387 = vmatprep.subr.bf16.mxu1 %v11774_v20  ;;  %10100 = vmatpush3.bf16.msra.mxu0 %v11773_v9  ;;  %v11780_v9 = vld [vmem:[#allocation7 + $0x128] sm:$0xff]   ;;  %14045 = vst [vmem:[#allocation17_spill] sm:$0xff] %v12886_v27  ;;  %v12888_v51 = vrot.slane %v1840_v52, 5  ;;  %v1814_v52 = vshll.u32 %v1791_v7, 16 }
 0x127   : > { %10101 = vmatprep.subr.bf16.mxu0 %v11775_v55  ;;  %10087 = vmatprep.mubr.bf16.mxu0 %v12796_v6  ;;  %v12873_v32 = vrot.slane %v1823_v57, 5  ;;  %v3950_v57 = vshrl.u32 %v12737_v24, 16 }
 0x128   : > { %10372 = vmatmul.mubr.bf16.gmra.mrb[4].mxu1 %v12804_v12  ;;  %14046 = vst [vmem:[#allocation18_spill] sm:$0xff] %v12888_v51 }
 0x129   : > { %10388 = vmatpush3.bf16.msra.mxu1 %v11774_v20  ;;  %10375 = vmatprep.mubr.bf16.mxu1 %v12811_v59  ;;  %v3933_v20 = vshrl.u32 %v12731_v49, 16  ;;  %14042 = vst [vmem:[#allocation14_spill] sm:$0xff] %v12873_v32  ;;  %v1792_v49 = vld [vmem:[#allocation2 + $0x18] sm:$0x1f]  ;;  %v12907_v39 = vrot.slane %v3950_v57, 4 }
 0x12a   : > { %10389 = vmatprep.subr.bf16.mxu1 %v11776_v44  ;;  %10102 = vmatpush3.bf16.msra.mxu0 %v11775_v55  ;;  %v12862_v55 = vrot.slane %v1803_v16, 4  ;;  %v11783_v16 = vld [vmem:[#allocation7 + $0x138] sm:$0xff]   ;;  %v1831_v18 = vshll.u32 %v1792_v49, 16  ;;  %v1793_v57 = vld [vmem:[#allocation2 + $0x28] sm:$0x1f] }
 0x12b   : > { %10103 = vmatprep.subr.bf16.mxu0 %v11777_v34  ;;  %v12878_v40 = vrot.slane %v3933_v20, 4  ;;  %v3953_v20 = vshll.u32 %v12737_v24, 16  ;;  %v12904_v24 = vsel %vm1212_vm1, %v3351_v41, %v3352_v35  ;;  %14047 = vst [vmem:[#allocation19_spill] sm:$0xff] %v12907_v39  ;;  %v12915_v41 = vrot.slane %v1857_v1, 5  ;;  %v3908_v39 = vld [vmem:[#allocation2 + $0xb8] sm:$0x1f] }
 0x12c   : > { %v12932_v27 = vrot.slane %v1831_v18, 5  ;;  %v3978_v32 = vshll.u32 %v3908_v39, 16 }
 0x12d   : > { %10390 = vmatpush3.bf16.msra.mxu1 %v11776_v44  ;;  %10088 = vmatmul.mubr.bf16.gmra.mrb[8].mxu0 %v12828_v50  ;;  %14043 = vst [vmem:[#allocation15_spill] sm:$0xff] %v12878_v40  ;;  %v12909_v7 = vrot.slane %v3953_v20, 5  ;;  %v3906_v44 = vld [vmem:[#allocation2 + $0x98] sm:$0x1f]  ;;  %14050 = vst [vmem:[#allocation22_spill] sm:$0xff] %v12915_v41  ;;  %v11787_v20 = vld [vmem:[#allocation7 + $0x1c8] sm:$0xff]  }
 0x12e   : > { %10391 = vmatprep.subr.bf16.mxu1 %v11778_v61  ;;  %10104 = vmatpush3.bf16.msra.mxu0 %v11777_v34  ;;  %v3924_v34 = vshrl.u32 %v3905_v19, 16  ;;  %v3941_v1 = vshrl.u32 %v3906_v44, 16  ;;  %v3944_v33 = vshll.u32 %v3906_v44, 16  ;;  %v1794_v41 = vld [vmem:[#allocation2 + $0x38] sm:$0x1f]  ;;  %v3970_v44 = vshll.u32 %v12756_v58, 16 }
 0x12f   : > { %10105 = vmatprep.subr.bf16.mxu0 %v11779_v30  ;;  %10091 = vmatprep.mubr.bf16.mxu0 %v12843_v63  ;;  %14048 = vst [vmem:[#allocation20_spill] sm:$0xff] %v12909_v7  ;;  %v12919_v7 = vrot.slane %v1811_v11, 4  ;;  %14051 = vst [vmem:[#allocation23_spill] sm:$0xff] %v12932_v27  ;;  %v1795_v27 = vld [vmem:[#allocation2 + $0x48] sm:$0x1f] }
 0x130   : > { %10376 = vmatmul.mubr.bf16.gmra.mrb[8].mxu1 %v12851_v8 }
 0x131   : > { %10392 = vmatpush3.bf16.msra.mxu1 %v11778_v61  ;;  %10379 = vmatprep.mubr.bf16.mxu1 %v12856_v25  ;;  %v1854_v61 = vshrl.u32 %v12739_v22, 16  ;;  %v1828_v22 = vshrl.u32 %v1792_v49, 16  ;;  %v1845_v49 = vshrl.u32 %v1793_v57, 16 }
 0x132   : > { %10393 = vmatprep.subr.bf16.mxu1 %v11780_v9  ;;  %10106 = vmatpush3.bf16.msra.mxu0 %v11779_v30  ;;  %v11785_v30 = vld [vmem:[#allocation7 + $0x1c0] sm:$0xff]  }
 0x133   : > { %10107 = vmatprep.subr.bf16.mxu0 %v11781_v0  ;;  %v12913_v35 = vrot.slane %v1854_v61, 4  ;;  %v12923_v61 = vrot.slane %v3924_v34, 4  ;;  %v1862_v34 = vshrl.u32 %v1794_v41, 16  ;;  %v12930_v51 = vrot.slane %v1828_v22, 4 }
 0x135   : > { %10394 = vmatpush3.bf16.msra.mxu1 %v11780_v9  ;;  %10092 = vmatmul.mubr.bf16.gmra.mrb[12].mxu0 %v12884_v13  ;;  %v3927_v9 = vshll.u32 %v3905_v19, 16  ;;  %14049 = vst [vmem:[#allocation21_spill] sm:$0xff] %v12913_v35  ;;  %v3907_v19 = vld [vmem:[#allocation2 + $0xa8] sm:$0x1f]  ;;  %v3967_v35 = vshrl.u32 %v12756_v58, 16  ;;  %v11790_v58 = vld [vmem:[#allocation7 + $0x1d0] sm:$0xff]  }
 0x136   : > { %10395 = vmatprep.subr.bf16.mxu1 %v11782_v14  ;;  %10108 = vmatpush3.bf16.msra.mxu0 %v11781_v0  ;;  %v11786_v0 = vld [vmem:[#allocation7 + $0x1c0] sm:$0xff]   ;;  %v3958_v3 = vshrl.u32 %v3907_v19, 16  ;;  %v3961_v11 = vshll.u32 %v3907_v19, 16  ;;  %v12937_v19 = vrot.slane %v3944_v33, 5  ;;  %v11791_v33 = vld [vmem:[#allocation7 + $0x1d8] sm:$0xff]  }
 0x137   : > { %10109 = vmatprep.subr.bf16.mxu0 %v11783_v16  ;;  %10111 = vmatprep.mubr.bf16.mxu0 %v12745_v54  ;;  %v12921_v54 = vrot.slane %v1814_v52, 5  ;;  %v11789_v52 = vld [vmem:[#allocation7 + $0x1d0] sm:$0xff]   ;;  %v12927_v40 = vrot.slane %v3927_v9, 5  ;;  %v12939_v9 = vrot.slane %v3967_v35, 4  ;;  %v12952_v35 = vrot.slane %v1862_v34, 4 }
 0x138   : > { %10380 = vmatmul.mubr.bf16.gmra.mrb[12].mxu1 %v12904_v24  ;;  %14052 = vst [vmem:[#allocation24_spill] sm:$0xff] %v12937_v19  ;;  %v12947_v22 = vrot.slane %v3958_v3, 4  ;;  %v3909_v19 = vld [vmem:[#allocation2 + $0xc8] sm:$0x1f]  ;;  %v1882_v34 = vshll.u32 %v1795_v27, 16 }
 0x139   : > { %10396 = vmatpush3.bf16.msra.mxu1 %v11782_v14  ;;  %10399 = vmatprep.mubr.bf16.mxu1 %v12762_v62  ;;  %v1848_v14 = vshll.u32 %v1793_v57, 16  ;;  %v11788_v62 = vld [vmem:[#allocation7 + $0x1c8] sm:$0xff]   ;;  %v3975_v57 = vshrl.u32 %v3908_v39, 16  ;;  %14053 = vst [vmem:[#allocation25_spill] sm:$0xff] %v12939_v9  ;;  %v12949_v39 = vrot.slane %v3961_v11, 5  ;;  %14055 = vst [vmem:[#allocation27_spill] sm:$0xff] %v12952_v35 }
 0x13a   : > { %10397 = vmatprep.subr.bf16.mxu1 %v11784_v37  ;;  %10110 = vmatpush3.bf16.msra.mxu0 %v11783_v16  ;;  %v1865_v16 = vshll.u32 %v1794_v41, 16  ;;  %v1871_v41 = vshrl.u32 %v12764_v53, 16  ;;  %v12956_v9 = vrot.slane %v3970_v44, 5  ;;  %v1796_v11 = vld [vmem:[#allocation2 + $0x58] sm:$0x1f]  ;;  %v3987_v44 = vshll.u32 %v12771_v10, 16 }
 0x13b   : > { %10127 = vmatprep.subr.bf16.mxu0 %v11785_v30  ;;  %v12945_v18 = vrot.slane %v1848_v14, 5  ;;  %14054 = vst [vmem:[#allocation26_spill] sm:$0xff] %v12949_v39  ;;  %v12959_v3 = vrot.slane %v3975_v57, 4  ;;  %v12961_v14 = vrot.slane %v3978_v32, 5  ;;  %v1879_v39 = vshrl.u32 %v1795_v27, 16  ;;  %v11793_v32 = vld [vmem:[#allocation7 + $0x1e0] sm:$0xff]  }
 0x13c   : > { %14057 = vst [vmem:[#allocation29_spill] sm:$0xff] %v12956_v9  ;;  %v3992_v9 = vshrl.u32 %v3909_v19, 16  ;;  %v1888_v35 = vshrl.u32 %v12774_v5, 16  ;;  %v1891_v57 = vshll.u32 %v12774_v5, 16  ;;  %v1896_v27 = vshrl.u32 %v1796_v11, 16 }
 0x13d   : > { %10398 = vmatpush3.bf16.msra.mxu1 %v11784_v37  ;;  %10112 = vmatmul.mubr.bf16.vlgmr.msra.gmra.mrb[0].mxu0 %v12754_v45  ;;  %v12935_v37 = vrot.slane %v3941_v1, 4  ;;  %v12954_v1 = vrot.slane %v1865_v16, 5  ;;  %14058 = vst [vmem:[#allocation30_spill] sm:$0xff] %v12959_v3  ;;  %14059 = vst [vmem:[#allocation31_spill] sm:$0xff] %v12961_v14  ;;  %v3984_v16 = vshrl.u32 %v12771_v10, 16  ;;  %v1899_v14 = vshll.u32 %v1796_v11, 16 }
 0x13e   : > { %10415 = vmatprep.subr.bf16.mxu1 %v11786_v0  ;;  %10128 = vmatpush3.bf16.msra.mxu0 %v11785_v30  ;;  %v12943_v30 = vrot.slane %v1845_v49, 4  ;;  %v1874_v49 = vshll.u32 %v12764_v53, 16  ;;  %v3995_v53 = vshll.u32 %v3909_v19, 16  ;;  %v12973_v10 = vrot.slane %v1879_v39, 4  ;;  %v11795_v39 = vld [vmem:[#allocation7 + $0x1e8] sm:$0xff]  }
 0x13f   : > { %10129 = vmatprep.subr.bf16.mxu0 %v11787_v20  ;;  %10115 = vmatprep.mubr.bf16.mxu0 %v12783_v42  ;;  %14056 = vst [vmem:[#allocation28_spill] sm:$0xff] %v12954_v1  ;;  %v11792_v1 = vld [vmem:[#allocation7 + $0x1d8] sm:$0xff]   ;;  %v12975_v19 = vrot.slane %v1882_v34, 5  ;;  %v4001_v3 = vshrl.u32 %v12787_v15, 16  ;;  %v12981_v5 = vrot.slane %v3987_v44, 5  ;;  %v12987_v11 = vrot.slane %v1888_v35, 4 }
 0x140   : > { %10400 = vmatmul.mubr.bf16.vlgmr.msra.gmra.mrb[0].mxu1 %v12769_v17  ;;  %v4004_v34 = vshll.u32 %v12787_v15, 16  ;;  %v12995_v44 = vrot.slane %v1899_v14, 5  ;;  %v1797_v35 = vld [vmem:[#allocation2 + $0x68] sm:$0x1f]  ;;  %v11797_v15 = vld [vmem:[#allocation7 + $0x1f0] sm:$0xff]  }
 0x141   : > { %10416 = vmatpush3.bf16.msra.mxu1 %v11786_v0  ;;  %10403 = vmatprep.mubr.bf16.mxu1 %v12804_v12  ;;  %v12963_v0 = vrot.slane %v1871_v41, 4  ;;  %v3910_v41 = vld [vmem:[#allocation2 + $0xd8] sm:$0x1f]  ;;  %14061 = vst [vmem:[#allocation33_spill] sm:$0xff] %v12975_v19  ;;  %14064 = vst [vmem:[#allocation36_spill] sm:$0xff] %v12987_v11  ;;  %v12993_v19 = vrot.slane %v1896_v27, 4 }
 0x142   : > { %10417 = vmatprep.subr.bf16.mxu1 %v11788_v62  ;;  %10130 = vmatpush3.bf16.msra.mxu0 %v11787_v20  ;;  %v12969_v20 = vrot.slane %v1874_v49, 5  ;;  %v11794_v49 = vld [vmem:[#allocation7 + $0x1e0] sm:$0xff]   ;;  %14067 = vst [vmem:[#allocation39_spill] sm:$0xff] %v12995_v44  ;;  %v11796_v11 = vld [vmem:[#allocation7 + $0x1e8] sm:$0xff]   ;;  %v1916_v27 = vshll.u32 %v1797_v35, 16 }
 0x143   : > { %10131 = vmatprep.subr.bf16.mxu0 %v11789_v52  ;;  %14066 = vst [vmem:[#allocation38_spill] sm:$0xff] %v12993_v19 }
 0x144   : > { %14060 = vst [vmem:[#allocation32_spill] sm:$0xff] %v12969_v20  ;;  %v12983_v20 = vrot.slane %v3992_v9, 4  ;;  %v4012_v9 = vshll.u32 %v3910_v41, 16 }
 0x145   : > { %10418 = vmatpush3.bf16.msra.mxu1 %v11788_v62  ;;  %10116 = vmatmul.mubr.bf16.gmra.mrb[4].mxu0 %v12796_v6  ;;  %v12977_v62 = vrot.slane %v3984_v16, 4  ;;  %v4009_v16 = vshrl.u32 %v3910_v41, 16  ;;  %v1913_v41 = vshrl.u32 %v1797_v35, 16  ;;  %v14074_v35 = vrot.slane %v12836_v21, 4 }
 0x146   : > { %10419 = vmatprep.subr.bf16.mxu1 %v11790_v58  ;;  %10132 = vmatpush3.bf16.msra.mxu0 %v11789_v52  ;;  %v12985_v52 = vrot.slane %v3995_v53, 5  ;;  %v12997_v53 = vrot.slane %v4001_v3, 4  ;;  %v13005_v14 = vrot.slane %v4012_v9, 5  ;;  %v1908_v3 = vshll.u32 %v12789_v43, 16 }
 0x147   : > { %10133 = vmatprep.subr.bf16.mxu0 %v11791_v33  ;;  %10119 = vmatprep.mubr.bf16.mxu0 %v12828_v50  ;;  %14062 = vst [vmem:[#allocation34_spill] sm:$0xff] %v12977_v62  ;;  %v12991_v62 = vrot.slane %v1891_v57, 5  ;;  %v13003_v57 = vrot.slane %v4009_v16, 4  ;;  %v4021_v16 = vshll.u32 %v12791_v48, 16 }
 0x148   : > { %10404 = vmatmul.mubr.bf16.gmra.mrb[4].mxu1 %v12811_v59  ;;  %14063 = vst [vmem:[#allocation35_spill] sm:$0xff] %v12985_v52  ;;  %14068 = vst [vmem:[#allocation40_spill] sm:$0xff] %v12997_v53  ;;  %v3911_v52 = vld [vmem:[#allocation2 + $0xe8] sm:$0x1f] }
 0x149   : > { %10420 = vmatpush3.bf16.msra.mxu1 %v11790_v58  ;;  %10407 = vmatprep.mubr.bf16.mxu1 %v12851_v8  ;;  %14065 = vst [vmem:[#allocation37_spill] sm:$0xff] %v12991_v62  ;;  %v1905_v58 = vshrl.u32 %v12789_v43, 16  ;;  %14070 = vst [vmem:[#allocation42_spill] sm:$0xff] %v13003_v57  ;;  %v4026_v9 = vshrl.u32 %v3911_v52, 16  ;;  %v14073_v43 = vrot.slane %v12608_v38, 4  ;;  %v4029_v57 = vshll.u32 %v3911_v52, 16 }
 0x14a   : > { %10421 = vmatprep.subr.bf16.mxu1 %v11792_v1  ;;  %10134 = vmatpush3.bf16.msra.mxu0 %v11791_v33  ;;  %v13001_v33 = vrot.slane %v4004_v34, 5  ;;  %14071 = vst [vmem:[#allocation43_spill] sm:$0xff] %v13005_v14  ;;  %v4018_v34 = vshrl.u32 %v12791_v48, 16  ;;  %v11800_v48 = vld [vmem:[#allocation7 + $0x1f8] sm:$0xff]  }
 0x14b   : > { %10135 = vmatprep.subr.bf16.mxu0 %v11793_v32  ;;  %v13010_v53 = vrot.slane %v1905_v58, 4  ;;  %v13020_v14 = vsel %vm1212_vm1, %v14074_v35, %v14073_v43  ;;  %v13022_v58 = vrot.slane %v1908_v3, 5  ;;  %v3912_v38 = vld [vmem:[#allocation2 + $0xf8] sm:$0x1f]  ;;  %v14079_v43 = vrot.slane %v12618_v4, 4 }
 0x14c   : > { %14069 = vst [vmem:[#allocation41_spill] sm:$0xff] %v13001_v33  ;;  %v1798_v33 = vld [vmem:[#allocation2 + $0x78] sm:$0x1f]  ;;  %v13028_v44 = vrot.slane %v4018_v34, 4  ;;  %v14080_v3 = vrot.slane %v12838_v28, 4  ;;  %v13043_v34 = vrot.slane %v4029_v57, 5 }
 0x14d   : > { %10422 = vmatpush3.bf16.msra.mxu1 %v11792_v1  ;;  %10120 = vmatmul.mubr.bf16.gmra.mrb[8].mxu0 %v12843_v63  ;;  %v11798_v1 = vld [vmem:[#allocation7 + $0x1f0] sm:$0xff]   ;;  %14072 = vst [vmem:[#allocation44_spill] sm:$0xff] %v13010_v53  ;;  %14075 = vst [vmem:[#allocation45_spill] sm:$0xff] %v13022_v58  ;;  %v13026_v53 = vrot.slane %v1916_v27, 5  ;;  %v13041_v27 = vrot.slane %v4026_v9, 4  ;;  %v1925_v35 = vshll.u32 %v12798_v29, 16 }
 0x14e   : > { %10423 = vmatprep.subr.bf16.mxu1 %v11794_v49  ;;  %10136 = vmatpush3.bf16.msra.mxu0 %v11793_v32  ;;  %v11799_v32 = vld [vmem:[#allocation7 + $0x1f8] sm:$0xff]   ;;  %14078 = vst [vmem:[#allocation48_spill] sm:$0xff] %v13028_v44  ;;  %v13037_v52 = vsel %vm1212_vm1, %v14080_v3, %v14079_v43  ;;  %14083 = vst [vmem:[#allocation51_spill] sm:$0xff] %v13043_v34  ;;  %v1930_v4 = vshrl.u32 %v1798_v33, 16  ;;  %v1933_v44 = vshll.u32 %v1798_v33, 16  ;;  %v4038_v43 = vshll.u32 %v12806_v31, 16 }
 0x14f   : > { %10137 = vmatprep.subr.bf16.mxu0 %v11795_v39  ;;  %10123 = vmatprep.mubr.bf16.mxu0 %v12884_v13  ;;  %14077 = vst [vmem:[#allocation47_spill] sm:$0xff] %v13026_v53  ;;  %14082 = vst [vmem:[#allocation50_spill] sm:$0xff] %v13041_v27  ;;  %v4035_v53 = vshrl.u32 %v12806_v31, 16  ;;  %v1799_v9 = vld [vmem:[#allocation2 + $0x88] sm:$0x1f]  ;;  %v4043_v57 = vshrl.u32 %v3912_v38, 16 }
 0x150   : > { %10408 = vmatmul.mubr.bf16.gmra.mrb[8].mxu1 %v12856_v25  ;;  %v2128_v33 = vshll.u32 %v12836_v21, 16  ;;  %v3913_v3 = vld [vmem:[#allocation2 + $0x108] sm:$0x1f]  ;;  %v2133_v34 = vshrl.u32 %v1799_v9, 16  ;;  %v2136_v31 = vshll.u32 %v1799_v9, 16  ;;  %v4237_v27 = vshrl.u32 %v12838_v28, 16 }
 0x151   : > { %10424 = vmatpush3.bf16.msra.mxu1 %v11794_v49  ;;  %10411 = vmatprep.mubr.bf16.mxu1 %v12904_v24  ;;  %v13024_v49 = vrot.slane %v1913_v41, 4  ;;  %v13039_v41 = vrot.slane %v4021_v16, 5  ;;  %v11802_v16 = vld [vmem:[#allocation7 + $0x80] sm:$0xff]   ;;  %v13064_v58 = vrot.slane %v4035_v53, 4  ;;  %v13066_v9 = vrot.slane %v4038_v43, 5  ;;  %v11807_v43 = vld [vmem:[#allocation7 + $0x98] sm:$0xff]  }
 0x152   : > { %10425 = vmatprep.subr.bf16.mxu1 %v11796_v11  ;;  %10138 = vmatpush3.bf16.msra.mxu0 %v11795_v39  ;;  %v1922_v39 = vshrl.u32 %v12798_v29, 16  ;;  %v4046_v29 = vshll.u32 %v3912_v38, 16  ;;  %v13059_v38 = vrot.slane %v1930_v4, 4  ;;  %v4245_v19 = vshrl.u32 %v3913_v3, 16 }
 0x153   : > { %10139 = vmatprep.subr.bf16.mxu0 %v11797_v15  ;;  %14076 = vst [vmem:[#allocation46_spill] sm:$0xff] %v13024_v49  ;;  %14081 = vst [vmem:[#allocation49_spill] sm:$0xff] %v13039_v41  ;;  %v4240_v41 = vshll.u32 %v12838_v28, 16  ;;  %v4248_v62 = vshll.u32 %v3913_v3, 16  ;;  %v13068_v28 = vrot.slane %v4043_v57, 4  ;;  %v13079_v53 = vrot.slane %v2136_v31, 5 }
 0x154   : > { %v13055_v49 = vrot.slane %v1922_v39, 4  ;;  %v13070_v39 = vrot.slane %v4046_v29, 5  ;;  %v13087_v57 = vrot.slane %v4245_v19, 4  ;;  %v11812_v19 = vld [vmem:[#allocation7 + $0xa8] sm:$0xff]   ;;  %v14093_v3 = vld [vmem:[#allocation16_spill] sm:$0xff] }
 0x155   : > { %10426 = vmatpush3.bf16.msra.mxu1 %v11796_v11  ;;  %10124 = vmatmul.mubr.bf16.gmra.mrb[12].mxu0 %v13020_v14  ;;  %v11801_v11 = vld [vmem:[#allocation7 + $0x80] sm:$0xff]   ;;  %v13083_v4 = vrot.slane %v4240_v41, 5  ;;  %v13089_v29 = vrot.slane %v4248_v62, 5  ;;  %v11815_v62 = vld [vmem:[#allocation7 + $0xb8] sm:$0xff]  }
 0x156   : > { %10427 = vmatprep.subr.bf16.mxu1 %v11798_v1  ;;  %10140 = vmatpush3.bf16.msra.mxu0 %v11797_v15  ;;  %v11803_v15 = vld [vmem:[#allocation7 + $0x88] sm:$0xff]   ;;  %v11809_v41 = vld [vmem:[#allocation7 + $0xa0] sm:$0xff]  }
 0x157   : > { %10141 = vmatprep.subr.bf16.mxu0 %v11799_v32  ;;  %10143 = vmatprep.mubr.bf16.mxu0 %v12754_v45  ;;  %v2125_v45 = vshrl.u32 %v12836_v21, 16  ;;  %v11805_v21 = vld [vmem:[#allocation7 + $0x90] sm:$0xff]  }
 0x158   : > { %10412 = vmatmul.mubr.bf16.gmra.mrb[12].mxu1 %v13037_v52 }
 0x159   : > { %10428 = vmatpush3.bf16.msra.mxu1 %v11798_v1  ;;  %10431 = vmatprep.mubr.bf16.mxu1 %v12769_v17  ;;  %v11804_v1 = vld [vmem:[#allocation7 + $0x88] sm:$0xff]   ;;  %v13057_v17 = vrot.slane %v1925_v35, 5  ;;  %v13072_v35 = vrot.slane %v2125_v45, 4  ;;  %v1851_v45 = vor.u32 %v12945_v18, %v12943_v30 }
 0x15a   : > { %10429 = vmatprep.subr.bf16.mxu1 %v11800_v48  ;;  %10142 = vmatpush3.bf16.msra.mxu0 %v11799_v32  ;;  %v13061_v32 = vrot.slane %v1933_v44, 5  ;;  %v13074_v44 = vrot.slane %v2128_v33, 5  ;;  %v14092_v33 = vld [vmem:[#allocation15_spill] sm:$0xff] }
 0x15b   : > { %10159 = vmatprep.subr.bf16.mxu0 %v11801_v11  ;;  %v3939_v31 = vor.u32 %v14093_v3, %v14092_v33  ;;  %v11820_v18 = vld [vmem:[#allocation7 + $0x148] sm:$0xff]   ;;  %v14112_v33 = vld [vmem:[#allocation38_spill] sm:$0xff] }
 0x15c   : > { %v14113_v3 = vld [vmem:[#allocation39_spill] sm:$0xff] }
 0x15d   : > { %10430 = vmatpush3.bf16.msra.mxu1 %v11800_v48  ;;  %10144 = vmatmul.mubr.bf16.vlgmr.msra.gmra.mrb[0].mxu0 %v12783_v42  ;;  %v13077_v42 = vrot.slane %v2133_v34, 4  ;;  %v13081_v48 = vrot.slane %v4237_v27, 4  ;;  %v14085_v27 = vrot.slane %v12890_v47, 4 }
 0x15e   : > { %10447 = vmatprep.subr.bf16.mxu1 %v11802_v16  ;;  %10160 = vmatpush3.bf16.msra.mxu0 %v11801_v11  ;;  %v11806_v11 = vld [vmem:[#allocation7 + $0x90] sm:$0xff]  }
 0x15f   : > { %10161 = vmatprep.subr.bf16.mxu0 %v11803_v15  ;;  %10147 = vmatprep.mubr.bf16.mxu0 %v12796_v6  ;;  %v11808_v6 = vld [vmem:[#allocation7 + $0x98] sm:$0xff]  }
 0x160   : > { %10432 = vmatmul.mubr.bf16.vlgmr.msra.gmra.mrb[0].mxu1 %v12804_v12  ;;  %v11810_v12 = vld [vmem:[#allocation7 + $0xa0] sm:$0xff]  }
 0x161   : > { %10448 = vmatpush3.bf16.msra.mxu1 %v11802_v16  ;;  %10435 = vmatprep.mubr.bf16.mxu1 %v12811_v59  ;;  %v11811_v59 = vld [vmem:[#allocation7 + $0xa8] sm:$0xff]   ;;  %v11818_v16 = vld [vmem:[#allocation7 + $0x140] sm:$0xff]  }
 0x162   : > { %10449 = vmatprep.subr.bf16.mxu1 %v11804_v1  ;;  %10162 = vmatpush3.bf16.msra.mxu0 %v11803_v15  ;;  %v14091_v15 = vld [vmem:[#allocation18_spill] sm:$0xff] }
 0x163   : > { %10163 = vmatprep.subr.bf16.mxu0 %v11805_v21 }
 0x165   : > { %10450 = vmatpush3.bf16.msra.mxu1 %v11804_v1  ;;  %10148 = vmatmul.mubr.bf16.gmra.mrb[4].mxu0 %v12828_v50  ;;  %v11813_v50 = vld [vmem:[#allocation7 + $0xb0] sm:$0xff]  }
 0x166   : > { %10451 = vmatprep.subr.bf16.mxu1 %v11806_v11  ;;  %10164 = vmatpush3.bf16.msra.mxu0 %v11805_v21  ;;  %v11819_v21 = vld [vmem:[#allocation7 + $0x148] sm:$0xff]  }
 0x167   : > { %10165 = vmatprep.subr.bf16.mxu0 %v11807_v43  ;;  %10151 = vmatprep.mubr.bf16.mxu0 %v12843_v63  ;;  %v11814_v63 = vld [vmem:[#allocation7 + $0xb0] sm:$0xff]  }
 0x168   : > { %10436 = vmatmul.mubr.bf16.gmra.mrb[4].mxu1 %v12851_v8  ;;  %v1809_v8 = vor.u32 %v12864_v26, %v12862_v55  ;;  %v3930_v55 = vor.u32 %v12927_v40, %v12923_v61  ;;  %v11816_v26 = vld [vmem:[#allocation7 + $0xb8] sm:$0xff]   ;;  %v14089_v61 = vld [vmem:[#allocation23_spill] sm:$0xff] }
 0x169   : > { %10452 = vmatpush3.bf16.msra.mxu1 %v11806_v11  ;;  %10439 = vmatprep.mubr.bf16.mxu1 %v12856_v25  ;;  %v1817_v25 = vor.u32 %v12921_v54, %v12919_v7  ;;  %v14086_v54 = vrot.slane %v12699_v36, 4  ;;  %v1834_v34 = vor.u32 %v14089_v61, %v12930_v51  ;;  %v14090_v36 = vld [vmem:[#allocation17_spill] sm:$0xff]  ;;  %v14095_v11 = vld [vmem:[#allocation19_spill] sm:$0xff] }
 0x16a   : > { %10453 = vmatprep.subr.bf16.mxu1 %v11808_v6  ;;  %10166 = vmatpush3.bf16.msra.mxu0 %v11807_v43  ;;  %v14096_v43 = vld [vmem:[#allocation20_spill] sm:$0xff] }
 0x16b   : > { %10167 = vmatprep.subr.bf16.mxu0 %v11809_v41  ;;  %v1818_v7 = vsel %vm1801_vm2, %v1809_v8, %v1817_v25  ;;  %v14100_v8 = vld [vmem:[#allocation27_spill] sm:$0xff]  ;;  %v14101_v25 = vld [vmem:[#allocation28_spill] sm:$0xff] }
 0x16d   : > { %10454 = vmatpush3.bf16.msra.mxu1 %v11808_v6  ;;  %10152 = vmatmul.mubr.bf16.gmra.mrb[8].mxu0 %v12884_v13  ;;  %v14084_v13 = vrot.slane %v12696_v46, 4  ;;  %v14087_v46 = vrot.slane %v12896_v23, 4  ;;  %v1843_v23 = vor.u32 %v14091_v15, %v14090_v36  ;;  %v3956_v6 = vor.u32 %v14096_v43, %v14095_v11  ;;  %v11825_v15 = vld [vmem:[#allocation7 + $0x160] sm:$0xff]  }
 0x16e   : > { %10455 = vmatprep.subr.bf16.mxu1 %v11810_v12  ;;  %10168 = vmatpush3.bf16.msra.mxu0 %v11809_v41  ;;  %v14097_v41 = vld [vmem:[#allocation26_spill] sm:$0xff] }
 0x16f   : > { %10169 = vmatprep.subr.bf16.mxu0 %v11811_v59  ;;  %10155 = vmatprep.mubr.bf16.mxu0 %v13020_v14  ;;  %v1611_v14 = vsel %vm1212_vm1, %v14085_v27, %v14084_v13  ;;  %v3726_v47 = vsel %vm1212_vm1, %v14087_v46, %v14086_v54  ;;  %v3964_v30 = vor.u32 %v14097_v41, %v12947_v22  ;;  %v11822_v13 = vld [vmem:[#allocation7 + $0x150] sm:$0xff]   ;;  %v14106_v46 = vld [vmem:[#allocation30_spill] sm:$0xff] }
 0x170   : > { %10440 = vmatmul.mubr.bf16.gmra.mrb[8].mxu1 %v12904_v24  ;;  %v3922_v24 = vor.u32 %v12869_v56, %v12867_v60  ;;  %v14088_v56 = vld [vmem:[#allocation14_spill] sm:$0xff]  ;;  %v14102_v27 = vld [vmem:[#allocation32_spill] sm:$0xff] }
 0x171   : > { %10456 = vmatpush3.bf16.msra.mxu1 %v11810_v12  ;;  %10443 = vmatprep.mubr.bf16.mxu1 %v13037_v52  ;;  %v11817_v52 = vld [vmem:[#allocation7 + $0x140] sm:$0xff]   ;;  %v1826_v40 = vor.u32 %v14088_v56, %v12871_v2  ;;  %v14094_v2 = vld [vmem:[#allocation24_spill] sm:$0xff]  ;;  %v13139_v12 = vsel %vm1801_vm2, %v1843_v23, %v1851_v45  ;;  %v14111_v45 = vld [vmem:[#allocation37_spill] sm:$0xff] }
 0x172   : > { %10457 = vmatprep.subr.bf16.mxu1 %v11812_v19  ;;  %10170 = vmatpush3.bf16.msra.mxu0 %v11811_v59  ;;  %v3931_v60 = vsel %vm1801_vm2, %v3922_v24, %v3930_v55  ;;  %v3947_v1 = vor.u32 %v14094_v2, %v12935_v37  ;;  %v11821_v59 = vld [vmem:[#allocation7 + $0x150] sm:$0xff]   ;;  %v14103_v24 = vld [vmem:[#allocation33_spill] sm:$0xff]  ;;  %v11826_v2 = vld [vmem:[#allocation7 + $0x160] sm:$0xff]  }
 0x173   : > { %10171 = vmatprep.subr.bf16.mxu0 %v11813_v50  ;;  %v13132_v51 = vsel %vm1801_vm2, %v1826_v40, %v1834_v34  ;;  %v1885_v55 = vor.u32 %v14103_v24, %v12973_v10  ;;  %v14108_v40 = vld [vmem:[#allocation34_spill] sm:$0xff]  ;;  %v14109_v10 = vld [vmem:[#allocation35_spill] sm:$0xff]  ;;  %v11824_v34 = vld [vmem:[#allocation7 + $0x158] sm:$0xff]  }
 0x174   : > { %v13143_v37 = vsel %vm1801_vm2, %v3939_v31, %v3947_v1  ;;  %v3998_v61 = vor.u32 %v14109_v10, %v12983_v20  ;;  %v1902_v31 = vor.u32 %v14113_v3, %v14112_v33  ;;  %v14114_v1 = vld [vmem:[#allocation44_spill] sm:$0xff]  ;;  %v14116_v43 = vld [vmem:[#allocation46_spill] sm:$0xff]  ;;  %v4049_v10 = vor.u32 %v13070_v39, %v13068_v28  ;;  %v11836_v28 = vld [vmem:[#allocation7 + $0x208] sm:$0xff]  }
 0x175   : > { %10458 = vmatpush3.bf16.msra.mxu1 %v11812_v19  ;;  %10156 = vmatmul.mubr.bf16.gmra.mrb[12].mxu0 %v1611_v14  ;;  %v13146_v19 = vsel %vm1801_vm2, %v3956_v6, %v3964_v30  ;;  %v1877_v14 = vor.u32 %v14102_v27, %v12963_v0  ;;  %v3990_v0 = vor.u32 %v12981_v5, %v14108_v40  ;;  %v14110_v5 = vld [vmem:[#allocation36_spill] sm:$0xff]  ;;  %v14117_v6 = vld [vmem:[#allocation47_spill] sm:$0xff]  ;;  %v14123_v27 = vld [vmem:[#allocation49_spill] sm:$0xff] }
 0x176   : > { %10459 = vmatprep.subr.bf16.mxu1 %v11814_v63  ;;  %10172 = vmatpush3.bf16.msra.mxu0 %v11813_v50  ;;  %v14098_v50 = vld [vmem:[#allocation21_spill] sm:$0xff]  ;;  %v1894_v20 = vor.u32 %v14111_v45, %v14110_v5  ;;  %v1919_v41 = vor.u32 %v14117_v6, %v14116_v43  ;;  %v14118_v30 = vld [vmem:[#allocation40_spill] sm:$0xff]  ;;  %v14124_v24 = vld [vmem:[#allocation50_spill] sm:$0xff]  ;;  %v2131_v3 = vor.u32 %v13074_v44, %v13072_v35 }
 0x177   : > { %10173 = vmatprep.subr.bf16.mxu0 %v11815_v62  ;;  %10175 = vmatprep.mubr.bf16.mxu0 %v1818_v7  ;;  %v14105_v7 = vld [vmem:[#allocation29_spill] sm:$0xff]  ;;  %v13178_v23 = vsel %vm1801_vm2, %v3990_v0, %v3998_v61  ;;  %v11830_v40 = vld [vmem:[#allocation7 + $0x170] sm:$0xff]   ;;  %v4041_v0 = vor.u32 %v13066_v9, %v13064_v58  ;;  %v11834_v58 = vld [vmem:[#allocation7 + $0x200] sm:$0xff]  }
 0x178   : > { %10444 = vmatmul.mubr.bf16.gmra.mrb[12].mxu1 %v3726_v47  ;;  %v14107_v47 = vld [vmem:[#allocation31_spill] sm:$0xff]  ;;  %v11831_v61 = vld [vmem:[#allocation7 + $0x178] sm:$0xff]   ;;  %v11837_v39 = vld [vmem:[#allocation7 + $0x210] sm:$0xff]  }
 0x179   : > { %10460 = vmatpush3.bf16.msra.mxu1 %v11814_v63  ;;  %10463 = vmatprep.mubr.bf16.mxu1 %v3931_v60  ;;  %v14099_v63 = vld [vmem:[#allocation22_spill] sm:$0xff]  ;;  %v11823_v60 = vld [vmem:[#allocation7 + $0x158] sm:$0xff]   ;;  %v11835_v9 = vld [vmem:[#allocation7 + $0x208] sm:$0xff]  }
 0x17a   : > { %10461 = vmatprep.subr.bf16.mxu1 %v11816_v26  ;;  %10174 = vmatpush3.bf16.msra.mxu0 %v11815_v62  ;;  %v1860_v22 = vor.u32 %v14099_v63, %v14098_v50  ;;  %v1868_v62 = vor.u32 %v14101_v25, %v14100_v8  ;;  %v14120_v50 = vld [vmem:[#allocation42_spill] sm:$0xff]  ;;  %v14121_v63 = vld [vmem:[#allocation43_spill] sm:$0xff]  ;;  %v13196_v25 = vsel %vm1801_vm2, %v1894_v20, %v1902_v31  ;;  %v11845_v33 = vld [vmem:[#allocation7 + $0x230] sm:$0xff]  }
 0x17b   : > { %10191 = vmatprep.subr.bf16.mxu0 %v11817_v52  ;;  %v11827_v8 = vld [vmem:[#allocation7 + $0x168] sm:$0xff]   ;;  %v11842_v5 = vld [vmem:[#allocation7 + $0x220] sm:$0xff]   ;;  %v2139_v31 = vor.u32 %v13079_v53, %v13077_v42  ;;  %v11848_v44 = vld [vmem:[#allocation7 + $0x238] sm:$0xff]  }
 0x17c   : > { %v13164_v56 = vsel %vm1801_vm2, %v1860_v22, %v1868_v62  ;;  %v4015_v22 = vor.u32 %v14121_v63, %v14120_v50  ;;  %v14122_v62 = vld [vmem:[#allocation48_spill] sm:$0xff]  ;;  %v11843_v45 = vld [vmem:[#allocation7 + $0x228] sm:$0xff]   ;;  %v11849_v53 = vld [vmem:[#allocation9 + $0xc0] sm:$0xff]  }
 0x17d   : > { %10462 = vmatpush3.bf16.msra.mxu1 %v11816_v26  ;;  %10176 = vmatmul.mubr.bf16.vlgmr.msra.gmra.mrb[0].mxu0 %v13132_v51  ;;  %v14104_v26 = vld [vmem:[#allocation25_spill] sm:$0xff]  ;;  %v11844_v20 = vld [vmem:[#allocation7 + $0x228] sm:$0xff]   ;;  %v2140_v35 = vsel %vm1801_vm2, %v2131_v3, %v2139_v31 }
 0x17e   : > { %10479 = vmatprep.subr.bf16.mxu1 %v11818_v16  ;;  %10192 = vmatpush3.bf16.msra.mxu0 %v11817_v52  ;;  %v3973_v54 = vor.u32 %v14105_v7, %v14104_v26  ;;  %v3981_v52 = vor.u32 %v14107_v47, %v14106_v46  ;;  %v11828_v26 = vld [vmem:[#allocation7 + $0x168] sm:$0xff]   ;;  %v11829_v46 = vld [vmem:[#allocation7 + $0x170] sm:$0xff]  }
 0x17f   : > { %10193 = vmatprep.subr.bf16.mxu0 %v11819_v21  ;;  %10179 = vmatprep.mubr.bf16.mxu0 %v13139_v12 }
 0x180   : > { %10464 = vmatmul.mubr.bf16.vlgmr.msra.gmra.mrb[0].mxu1 %v13143_v37  ;;  %v13175_v36 = vsel %vm1801_vm2, %v3973_v54, %v3981_v52  ;;  %v1928_v52 = vor.u32 %v13057_v17, %v13055_v49  ;;  %v11832_v17 = vld [vmem:[#allocation7 + $0x178] sm:$0xff]  }
 0x181   : > { %10480 = vmatpush3.bf16.msra.mxu1 %v11818_v16  ;;  %10467 = vmatprep.mubr.bf16.mxu1 %v13146_v19  ;;  %v13171_v16 = vsel %vm1801_vm2, %v1877_v14, %v1885_v55  ;;  %v4024_v14 = vor.u32 %v14123_v27, %v14122_v62  ;;  %v14125_v55 = vld [vmem:[#allocation51_spill] sm:$0xff] }
 0x182   : > { %10481 = vmatprep.subr.bf16.mxu1 %v11820_v18  ;;  %10194 = vmatpush3.bf16.msra.mxu0 %v11819_v21  ;;  %v14115_v21 = vld [vmem:[#allocation45_spill] sm:$0xff] }
 0x183   : > { %10195 = vmatprep.subr.bf16.mxu0 %v11821_v59  ;;  %v1911_v11 = vor.u32 %v14115_v21, %v14114_v1  ;;  %v4243_v1 = vor.u32 %v13083_v4, %v13081_v48  ;;  %v4251_v21 = vor.u32 %v13089_v29, %v13087_v57  ;;  %v11850_v48 = vld [vmem:[#allocation9 + $0xc0] sm:$0xff]   ;;  %v1800_v4 = vld [vmem:[#allocation2 + $0x98] sm:$0x1f]  ;;  %v11996_v57 = vld [vmem:[#allocation2 + $0x90] sm:$0xf0] }
 0x184   : > { %v2321_v29 = vshrl.u32 %v11996_v57, 16  ;;  %v2332_v43 = vshll.u32 %v1800_v4, 16 }
 0x185   : > { %10482 = vmatpush3.bf16.msra.mxu1 %v11820_v18  ;;  %10180 = vmatmul.mubr.bf16.gmra.mrb[4].mxu0 %v13164_v56  ;;  %v14119_v18 = vld [vmem:[#allocation41_spill] sm:$0xff]  ;;  %v13203_v7 = vsel %vm1801_vm2, %v1911_v11, %v1919_v41  ;;  %v4252_v42 = vsel %vm1801_vm2, %v4243_v1, %v4251_v21 }
 0x186   : > { %10483 = vmatprep.subr.bf16.mxu1 %v11822_v13  ;;  %10196 = vmatpush3.bf16.msra.mxu0 %v11821_v59  ;;  %v4007_v59 = vor.u32 %v14119_v18, %v14118_v30  ;;  %v11847_v11 = vld [vmem:[#allocation7 + $0x238] sm:$0xff]   ;;  %v2323_v30 = vrot.slane %v2321_v29, 4  ;;  %v2334_v50 = vrot.slane %v2332_v43, 5 }
 0x187   : > { %10197 = vmatprep.subr.bf16.mxu0 %v11823_v60  ;;  %10183 = vmatprep.mubr.bf16.mxu0 %v13171_v16 }
 0x188   : > { %10468 = vmatmul.mubr.bf16.gmra.mrb[4].mxu1 %v13175_v36  ;;  %v13207_v54 = vsel %vm1801_vm2, %v4007_v59, %v4015_v22 }
 0x189   : > { %10484 = vmatpush3.bf16.msra.mxu1 %v11822_v13  ;;  %10471 = vmatprep.mubr.bf16.mxu1 %v13178_v23  ;;  %v4032_v13 = vor.u32 %v14125_v55, %v14124_v24 }
 0x18a   : > { %10485 = vmatprep.subr.bf16.mxu1 %v11824_v34  ;;  %10198 = vmatpush3.bf16.msra.mxu0 %v11823_v60  ;;  %v1936_v60 = vor.u32 %v13061_v32, %v13059_v38  ;;  %v13228_v38 = vsel %vm1801_vm2, %v4041_v0, %v4049_v10  ;;  %v11833_v32 = vld [vmem:[#allocation7 + $0x200] sm:$0xff]   ;;  %v11859_v0 = vld [vmem:[#allocation9 + $0xe8] sm:$0xff]  }
 0x18b   : > { %10199 = vmatprep.subr.bf16.mxu0 %v11825_v15  ;;  %v13210_v47 = vsel %vm1801_vm2, %v4024_v14, %v4032_v13  ;;  %v11860_v10 = vld [vmem:[#allocation9 + $0xe8] sm:$0xff]  }
 0x18c   : > { %v13224_v49 = vsel %vm1801_vm2, %v1928_v52, %v1936_v60  ;;  %v11856_v52 = vld [vmem:[#allocation9 + $0xd8] sm:$0xff]   ;;  %v11857_v60 = vld [vmem:[#allocation9 + $0xe0] sm:$0xff]  }
 0x18d   : > { %10486 = vmatpush3.bf16.msra.mxu1 %v11824_v34  ;;  %10184 = vmatmul.mubr.bf16.gmra.mrb[8].mxu0 %v13196_v25  ;;  %v11840_v34 = vld [vmem:[#allocation7 + $0x218] sm:$0xff]  }
 0x18e   : > { %10487 = vmatprep.subr.bf16.mxu1 %v11826_v2  ;;  %10200 = vmatpush3.bf16.msra.mxu0 %v11825_v15  ;;  %v11841_v15 = vld [vmem:[#allocation7 + $0x220] sm:$0xff]  }
 0x18f   : > { %10201 = vmatprep.subr.bf16.mxu0 %v11827_v8  ;;  %10187 = vmatprep.mubr.bf16.mxu0 %v13203_v7 }
 0x190   : > { %10472 = vmatmul.mubr.bf16.gmra.mrb[8].mxu1 %v13207_v54 }
 0x191   : > { %10488 = vmatpush3.bf16.msra.mxu1 %v11826_v2  ;;  %10475 = vmatprep.mubr.bf16.mxu1 %v13210_v47  ;;  %v11846_v2 = vld [vmem:[#allocation7 + $0x230] sm:$0xff]  }
 0x192   : > { %10489 = vmatprep.subr.bf16.mxu1 %v11828_v26  ;;  %10202 = vmatpush3.bf16.msra.mxu0 %v11827_v8 }
 0x193   : > { %10203 = vmatprep.subr.bf16.mxu0 %v11829_v46 }
 0x195   : > { %10490 = vmatpush3.bf16.msra.mxu1 %v11828_v26  ;;  %10188 = vmatmul.mubr.bf16.gmra.mrb[12].mxu0 %v13224_v49  ;;  %v11851_v26 = vld [vmem:[#allocation9 + $0xc8] sm:$0xff]  }
 0x196   : > { %10491 = vmatprep.subr.bf16.mxu1 %v11830_v40  ;;  %10204 = vmatpush3.bf16.msra.mxu0 %v11829_v46  ;;  %v11854_v46 = vld [vmem:[#allocation9 + $0xd0] sm:$0xff]  }
 0x197   : > { %10205 = vmatprep.subr.bf16.mxu0 %v11831_v61  ;;  %10207 = vmatprep.mubr.bf16.mxu0 %v13132_v51  ;;  %v11838_v51 = vld [vmem:[#allocation7 + $0x210] sm:$0xff]  }
 0x198   : > { %10476 = vmatmul.mubr.bf16.gmra.mrb[12].mxu1 %v13228_v38 }
 0x199   : > { %10492 = vmatpush3.bf16.msra.mxu1 %v11830_v40  ;;  %10495 = vmatprep.mubr.bf16.mxu1 %v13143_v37  ;;  %v11839_v37 = vld [vmem:[#allocation7 + $0x218] sm:$0xff]   ;;  %v11858_v40 = vld [vmem:[#allocation9 + $0xe0] sm:$0xff]  }
 0x19a   : > { %10493 = vmatprep.subr.bf16.mxu1 %v11832_v17  ;;  %10206 = vmatpush3.bf16.msra.mxu0 %v11831_v61  ;;  %v11861_v61 = vld [vmem:[#allocation9 + $0xf0] sm:$0xff]  }
 0x19b   : > { %10223 = vmatprep.subr.bf16.mxu0 %v11833_v32 }
 0x19d   : > { %10494 = vmatpush3.bf16.msra.mxu1 %v11832_v17  ;;  %10208 = vmatmul.mubr.bf16.vlgmr.msra.gmra.mrb[0].mxu0 %v13139_v12  ;;  %v11863_v17 = vld [vmem:[#allocation9 + $0xf8] sm:$0xff]  }
 0x19e   : > { %10511 = vmatprep.subr.bf16.mxu1 %v11834_v58  ;;  %10224 = vmatpush3.bf16.msra.mxu0 %v11833_v32  ;;  %v13269_v32 = vld [vmem:[#allocation9] sm:$0xff]  }
 0x19f   : > { %10225 = vmatprep.subr.bf16.mxu0 %v11835_v9  ;;  %10211 = vmatprep.mubr.bf16.mxu0 %v13164_v56 }
 0x1a0   : > { %10496 = vmatmul.mubr.bf16.vlgmr.msra.gmra.mrb[0].mxu1 %v13146_v19 }
 0x1a1   : > { %10512 = vmatpush3.bf16.msra.mxu1 %v11834_v58  ;;  %10499 = vmatprep.mubr.bf16.mxu1 %v13175_v36  ;;  %v13272_v58 = vld [vmem:[#allocation9] sm:$0xff]  }
 0x1a2   : > { %10513 = vmatprep.subr.bf16.mxu1 %v11836_v28  ;;  %10226 = vmatpush3.bf16.msra.mxu0 %v11835_v9  ;;  %v13278_v9 = vld [vmem:[%s14025_s2] ss:$0 sm:$0xff] }
 0x1a3   : > { %10227 = vmatprep.subr.bf16.mxu0 %v11837_v39 }
 0x1a5   : > { %10514 = vmatpush3.bf16.msra.mxu1 %v11836_v28  ;;  %10212 = vmatmul.mubr.bf16.gmra.mrb[4].mxu0 %v13171_v16 }
 0x1a6   : > { %10515 = vmatprep.subr.bf16.mxu1 %v11838_v51  ;;  %10228 = vmatpush3.bf16.msra.mxu0 %v11837_v39  ;;  %v4714_v39 = vld [vmem:[#allocation3] sm:$0xf8] }
 0x1a7   : > { %10229 = vmatprep.subr.bf16.mxu0 %v11839_v37  ;;  %10215 = vmatprep.mubr.bf16.mxu0 %v13196_v25  ;;  %v4735_v3 = vshrl.u32 %v4714_v39, 16  ;;  %v4738_v31 = vshll.u32 %v4714_v39, 16 }
 0x1a8   : > { %10500 = vmatmul.mubr.bf16.gmra.mrb[4].mxu1 %v13178_v23 }
 0x1a9   : > { %10516 = vmatpush3.bf16.msra.mxu1 %v11838_v51  ;;  %10503 = vmatprep.mubr.bf16.mxu1 %v13207_v54 }
 0x1aa   : > { %10517 = vmatprep.subr.bf16.mxu1 %v11840_v34  ;;  %10230 = vmatpush3.bf16.msra.mxu0 %v11839_v37 }
 0x1ab   : > { %10231 = vmatprep.subr.bf16.mxu0 %v11841_v15 }
 0x1ad   : > { %10518 = vmatpush3.bf16.msra.mxu1 %v11840_v34  ;;  %10216 = vmatmul.mubr.bf16.gmra.mrb[8].mxu0 %v13203_v7  ;;  %v4715_v34 = vld [vmem:[#allocation3 + $0x8] sm:$0xf] }
 0x1ae   : > { %10519 = vmatprep.subr.bf16.mxu1 %v11842_v5  ;;  %10232 = vmatpush3.bf16.msra.mxu0 %v11841_v15 }
 0x1af   : > { %10233 = vmatprep.subr.bf16.mxu0 %v11843_v45  ;;  %10219 = vmatprep.mubr.bf16.mxu0 %v13224_v49 }
 0x1b0   : > { %10504 = vmatmul.mubr.bf16.gmra.mrb[8].mxu1 %v13210_v47 }
 0x1b1   : > { %10520 = vmatpush3.bf16.msra.mxu1 %v11842_v5  ;;  %10507 = vmatprep.mubr.bf16.mxu1 %v13228_v38 }
 0x1b2   : > { %10521 = vmatprep.subr.bf16.mxu1 %v11844_v20  ;;  %10234 = vmatpush3.bf16.msra.mxu0 %v11843_v45 }
 0x1b3   : > { %10235 = vmatprep.subr.bf16.mxu0 %v11845_v33 }
 0x1b5   : > { %10522 = vmatpush3.bf16.msra.mxu1 %v11844_v20  ;;  %10220 = vmatmul.mubr.bf16.gmra.mrb[12].mxu0 %v2140_v35 }
 0x1b6   : > { %10523 = vmatprep.subr.bf16.mxu1 %v11846_v2  ;;  %10236 = vmatpush3.bf16.msra.mxu0 %v11845_v33 }
 0x1b7   : > { %10237 = vmatprep.subr.bf16.mxu0 %v11847_v11  ;;  %10239 = vmatprep.mubr.bf16.mxu0 %v13139_v12  ;;  %v2324_v12 = vshll.u32 %v11996_v57, 16 }
 0x1b8   : > { %10508 = vmatmul.mubr.bf16.gmra.mrb[12].mxu1 %v4252_v42 }
 0x1b9   : > { %10524 = vmatpush3.bf16.msra.mxu1 %v11846_v2  ;;  %10527 = vmatprep.mubr.bf16.mxu1 %v13146_v19  ;;  %v2329_v19 = vshrl.u32 %v1800_v4, 16  ;;  %v2326_v18 = vrot.slane %v2324_v12, 5  ;;  %v4746_v12 = vshll.u32 %v4715_v34, 16 }
 0x1ba   : > { %10525 = vmatprep.subr.bf16.mxu1 %v11848_v44  ;;  %10238 = vmatpush3.bf16.msra.mxu0 %v11847_v11  ;;  %v4743_v11 = vshrl.u32 %v4715_v34, 16 }
 0x1bb   : > { %10543 = vmatprep.subr.bf16.mxu0 %v11849_v53  ;;  %v2331_v59 = vrot.slane %v2329_v19, 4  ;;  %v2327_v62 = vor.u32 %v2326_v18, %v2323_v30 }
 0x1bc   : > { %v4745_v30 = vrot.slane %v4743_v11, 3 }
 0x1bd   : > { %10526 = vmatpush3.bf16.msra.mxu1 %v11848_v44  ;;  %10240 = vmatmul.mubr.bf16.vlgmr.msra.gmra.mrb[0].mxu0 %v13164_v56  ;;  %v3914_v56 = vld [vmem:[#allocation2 + $0x118] sm:$0x1f]  ;;  %v2335_v27 = vor.u32 %v2334_v50, %v2331_v59 }
 0x1be   : > { %10243 = vmatprep.mubr.bf16.mxu0 %v13171_v16  ;;  %10831 = vmatprep.subr.bf16.mxu1 %v11850_v48  ;;  %v11997_v16 = vld [vmem:[#allocation2 + $0x110] sm:$0xf0]  ;;  %v4443_v41 = vshll.u32 %v3914_v56, 16 }
 0x1bf   : > { %10544 = vmatpush3.bf16.msra.mxu0 %v11849_v53  ;;  %v4435_v6 = vshll.u32 %v11997_v16, 16  ;;  %v2336_v55 = vsel %vm1801_vm2, %v2327_v62, %v2335_v27 }
 0x1c0   : > { %10528 = vmatmul.mubr.bf16.vlgmr.msra.gmra.mrb[0].mxu1 %v13175_v36  ;;  %v4432_v36 = vshrl.u32 %v11997_v16, 16  ;;  %10545 = vmatprep.subr.bf16.mxu0 %v11851_v26  ;;  %v4740_v16 = vrot.slane %v4738_v31, 4 }
 0x1c1   : > { %10531 = vmatprep.mubr.bf16.mxu1 %v13178_v23  ;;  %10832 = vmatpush3.bf16.msra.mxu1 %v11850_v48  ;;  %v4440_v23 = vshrl.u32 %v3914_v56, 16  ;;  %v4437_v22 = vrot.slane %v4435_v6, 5  ;;  %v4737_v56 = vrot.slane %v4735_v3, 3 }
 0x1c2   : > { %v4434_v63 = vrot.slane %v4432_v36, 4 }
 0x1c3   : > { %v4442_v8 = vrot.slane %v4440_v23, 4  ;;  %10546 = vmatpush3.bf16.msra.mxu0 %v11851_v26 }
 0x1c4   : > { %v4438_v14 = vor.u32 %v4437_v22, %v4434_v63 }
 0x1c5   : > { %10244 = vmatmul.mubr.bf16.gmra.mrb[4].mxu0 %v13196_v25  ;;  %v4445_v25 = vrot.slane %v4443_v41, 5 }
 0x1c6   : > { %10247 = vmatprep.mubr.bf16.mxu0 %v13203_v7  ;;  %v11852_v7 = vld [vmem:[#allocation9 + $0xc8] sm:$0xff]  }
 0x1c7   : > { %v4446_v24 = vor.u32 %v4445_v25, %v4442_v8  ;;  %10833 = vmatprep.subr.bf16.mxu1 %v11852_v7 }
 0x1c8   : > { %10532 = vmatmul.mubr.bf16.gmra.mrb[4].mxu1 %v13207_v54  ;;  %v11853_v54 = vld [vmem:[#allocation9 + $0xd0] sm:$0xff]  }
 0x1c9   : > { %10535 = vmatprep.mubr.bf16.mxu1 %v13210_v47  ;;  %v4447_v13 = vsel %vm1801_vm2, %v4438_v14, %v4446_v24  ;;  %10834 = vmatpush3.bf16.msra.mxu1 %v11852_v7  ;;  %v11855_v47 = vld [vmem:[#allocation9 + $0xd8] sm:$0xff]   ;;  %v4748_v14 = vrot.slane %v4746_v12, 4 }
 0x1ca   : > { %10547 = vmatprep.subr.bf16.mxu0 %v11853_v54  ;;  %10835 = vmatprep.subr.bf16.mxu1 %v11854_v46 }
 0x1cb   : > { %10548 = vmatpush3.bf16.msra.mxu0 %v11853_v54  ;;  %v4749_v39 = vor.u32 %v4748_v14, %v4745_v30 }
 0x1cc   : > { %10549 = vmatprep.subr.bf16.mxu0 %v11855_v47 }
 0x1cd   : > { %10248 = vmatmul.mubr.bf16.gmra.mrb[8].mxu0 %v13224_v49  ;;  %10836 = vmatpush3.bf16.msra.mxu1 %v11854_v46  ;;  %v11862_v49 = vld [vmem:[#allocation9 + $0xf0] sm:$0xff]  }
 0x1ce   : > { %10251 = vmatprep.mubr.bf16.mxu0 %v2140_v35  ;;  %10837 = vmatprep.subr.bf16.mxu1 %v11856_v52 }
 0x1cf   : > { %10550 = vmatpush3.bf16.msra.mxu0 %v11855_v47 }
 0x1d0   : > { %10536 = vmatmul.mubr.bf16.gmra.mrb[8].mxu1 %v13228_v38  ;;  %10551 = vmatprep.subr.bf16.mxu0 %v11857_v60  ;;  %v11864_v38 = vld [vmem:[#allocation9 + $0xf8] sm:$0xff]  }
 0x1d1   : > { %10539 = vmatprep.mubr.bf16.mxu1 %v4252_v42  ;;  %10838 = vmatpush3.bf16.msra.mxu1 %v11856_v52  ;;  %v4741_v52 = vor.u32 %v4740_v16, %v4737_v56 }
 0x1d2   : > { %10839 = vmatprep.subr.bf16.mxu1 %v11858_v40 }
 0x1d3   : > { %10552 = vmatpush3.bf16.msra.mxu0 %v11857_v60 }
 0x1d4   : > { %10553 = vmatprep.subr.bf16.mxu0 %v11859_v0 }
 0x1d5   : > { %10252 = vmatmul.mubr.bf16.gmra.mrb[12].mxu0 %v2336_v55  ;;  %10840 = vmatpush3.bf16.msra.mxu1 %v11858_v40 }
 0x1d6   : > { %10841 = vmatprep.subr.bf16.mxu1 %v11860_v10 }
 0x1d7   : > { %10554 = vmatpush3.bf16.msra.mxu0 %v11859_v0 }
 0x1d8   : > { %10540 = vmatmul.mubr.bf16.gmra.mrb[12].mxu1 %v4447_v13  ;;  %10555 = vmatprep.subr.bf16.mxu0 %v11861_v61 }
 0x1d9   : > { %10842 = vmatpush3.bf16.msra.mxu1 %v11860_v10 }
 0x1da   : > { %10843 = vmatprep.subr.bf16.mxu1 %v11862_v49 }
 0x1db   : > { %10556 = vmatpush3.bf16.msra.mxu0 %v11861_v61 }
 0x1dc   : > { %10557 = vmatprep.subr.bf16.mxu0 %v11863_v17 }
 0x1dd   : > { %10844 = vmatpush3.bf16.msra.mxu1 %v11862_v49 }
 0x1de   : > { %10845 = vmatprep.subr.bf16.mxu1 %v11864_v38 }
 0x1df   : > { %10558 = vmatpush3.bf16.msra.mxu0 %v11863_v17 }
 0x1e0   : > { %10575 = vmatprep.subr.bf16.mxu0 %v13269_v32 }
 0x1e1   : > { %10846 = vmatpush3.bf16.msra.mxu1 %v11864_v38 }
 0x1e2   : > { %10863 = vmatprep.subr.bf16.mxu1 %v13272_v58 }
 0x290   : > { %v10241_v28 = vpop.f32.mrb[0].mxu0 }
 0x291   : > { %v2525_v51 = vadd.f32 %v10241_v28, %v13278_v9  ;;  %v2437_v37 = vpop.f32.mrb[1].mxu0 }
 0x292   : > { %v2523_v15 = vadd.f32 %v13278_v9, %v2437_v37  ;;  %v10242_v5 = vpop.f32.mrb[2].mxu0 }
 0x293   : > { %v10529_v45 = vpop.f32.mrb[0].mxu1  ;;  %v2526_v20 = vadd.f32 %v10242_v5, %v13278_v9  ;;  %v2440_v33 = vpop.f32.mrb[3].mxu0  ;;  %v2541_v35 = vmax.f32 %v2525_v51, 0.0 }
 0x294   : > { %v4635_v2 = vadd.f32 %v10529_v45, %v13278_v9  ;;  %v4547_v1 = vpop.f32.mrb[1].mxu1  ;;  %v2524_v21 = vadd.f32 %v13278_v9, %v2440_v33  ;;  %v2539_v48 = vmax.f32 %v2523_v15, 0.0 }
 0x295   : > { %v4633_v44 = vadd.f32 %v13278_v9, %v4547_v1  ;;  %v2542_v42 = vmax.f32 %v2526_v20, 0.0  ;;  %v10530_v53 = vpop.f32.mrb[2].mxu1 }
 0x296   : > { %v4636_v4 = vadd.f32 %v10530_v53, %v13278_v9  ;;  %v2540_v57 = vmax.f32 %v2524_v21, 0.0  ;;  %v4550_v29 = vpop.f32.mrb[3].mxu1  ;;  %v4651_v36 = vmax.f32 %v4635_v2, 0.0 }
 0x297   : > { %v2556_v19 = vpack.c.bf16 %v2542_v42, %v2541_v35  ;;  %v4634_v43 = vadd.f32 %v13278_v9, %v4550_v29  ;;  %v4649_v18 = vmax.f32 %v4633_v44, 0.0  ;;  %v13301_v42 = vsel %vm504_vm0, %v4741_v52, %v4749_v39 }
 0x298   : > { %v4652_v6 = vmax.f32 %v4636_v4, 0.0  ;;  %v2555_v23 = vpack.c.bf16 %v2540_v57, %v2539_v48  ;;  %v10245_v41 = vpop.f32.mrb[4].mxu0 }
 0x299   : > { %v2572_v59 = vrot.slane %v2556_v19, 4  ;;  %v4650_v50 = vmax.f32 %v4634_v43, 0.0  ;;  %v2529_v63 = vadd.f32 %v10245_v41, %v13278_v9  ;;  %v2453_v22 = vpop.f32.mrb[5].mxu0 }
 0x29a   : > { %v4666_v8 = vpack.c.bf16 %v4652_v6, %v4651_v36  ;;  %v2571_v25 = vrot.slane %v2555_v23, 4  ;;  %v2527_v62 = vadd.f32 %v13278_v9, %v2453_v22  ;;  %v10246_v27 = vpop.f32.mrb[6].mxu0 }
 0x29b   : > { %2590 = vst [vmem:[#allocation3 + $0x28] ss:$-4 sps:$4 sm:$0xff] %v2572_v59   ;;  %v4665_v24 = vpack.c.bf16 %v4650_v50, %v4649_v18  ;;  %v10533_v55 = vpop.f32.mrb[4].mxu1  ;;  %v2530_v13 = vadd.f32 %v10246_v27, %v13278_v9  ;;  %v2456_v26 = vpop.f32.mrb[7].mxu0  ;;  %v2545_v40 = vmax.f32 %v2529_v63, 0.0 }
 0x29c   : > { %v4682_v7 = vrot.slane %v4666_v8, 4  ;;  %2588 = vst [vmem:[#allocation3 + $0x18] ss:$-4 sps:$4 sm:$0xff] %v2571_v25   ;;  %v4639_v54 = vadd.f32 %v10533_v55, %v13278_v9  ;;  %v4563_v46 = vpop.f32.mrb[5].mxu1  ;;  %v2528_v47 = vadd.f32 %v13278_v9, %v2456_v26  ;;  %v2543_v49 = vmax.f32 %v2527_v62, 0.0 }
 0x29d   : > { %v4681_v60 = vrot.slane %v4665_v24, 4  ;;  %v4637_v0 = vadd.f32 %v13278_v9, %v4563_v46  ;;  %v2546_v10 = vmax.f32 %v2530_v13, 0.0  ;;  %v10534_v61 = vpop.f32.mrb[6].mxu1 }
 0x29e   : > { %4700 = vst [vmem:[#allocation3 + $0xa8] ss:$-4 sps:$4 sm:$0xff] %v4682_v7   ;;  %v4640_v17 = vadd.f32 %v10534_v61, %v13278_v9  ;;  %v2544_v38 = vmax.f32 %v2528_v47, 0.0  ;;  %v4566_v28 = vpop.f32.mrb[7].mxu1  ;;  %v4655_v34 = vmax.f32 %v4639_v54, 0.0 }
 0x29f   : > { %4698 = vst [vmem:[#allocation3 + $0x98] ss:$-4 sps:$4 sm:$0xff] %v4681_v60   ;;  %v2558_v51 = vpack.c.bf16 %v2546_v10, %v2545_v40  ;;  %v4638_v37 = vadd.f32 %v13278_v9, %v4566_v28  ;;  %v4653_v20 = vmax.f32 %v4637_v0, 0.0 }
 0x2a0   : > { %v4656_v15 = vmax.f32 %v4640_v17, 0.0  ;;  %v2557_v5 = vpack.c.bf16 %v2544_v38, %v2543_v49  ;;  %v10249_v45 = vpop.f32.mrb[8].mxu0 }
 0x2a1   : > { %v2574_v33 = vrot.slane %v2558_v51, 4  ;;  %v4654_v3 = vmax.f32 %v4638_v37, 0.0  ;;  %v2533_v31 = vadd.f32 %v10249_v45, %v13278_v9  ;;  %v2469_v2 = vpop.f32.mrb[9].mxu0 }
 0x2a2   : > { %v4668_v1 = vpack.c.bf16 %v4656_v15, %v4655_v34  ;;  %v2573_v21 = vrot.slane %v2557_v5, 4  ;;  %v2531_v11 = vadd.f32 %v13278_v9, %v2469_v2  ;;  %v10250_v35 = vpop.f32.mrb[10].mxu0  ;;  %v13298_v44 = vld [vmem:[#allocation3 + $0x20] sm:$0xf8] }
 0x2a3   : > { %2594 = vst [vmem:[#allocation3 + $0x48] ss:$-4 sps:$4 sm:$0xff] %v2574_v33   ;;  %v4667_v53 = vpack.c.bf16 %v4654_v3, %v4653_v20  ;;  %v2549_v48 = vmax.f32 %v2533_v31, 0.0  ;;  %v10537_v4 = vpop.f32.mrb[8].mxu1  ;;  %v2534_v57 = vadd.f32 %v10250_v35, %v13278_v9  ;;  %v2472_v29 = vpop.f32.mrb[11].mxu0  ;;  %v4769_v19 = vshrl.u32 %v13298_v44, 16 }
 0x2a4   : > { %v4716_v12 = vld [vmem:[#allocation3 + $0x10] sm:$0xf8]  ;;  %v4684_v43 = vrot.slane %v4668_v1, 4  ;;  %2592 = vst [vmem:[#allocation3 + $0x38] ss:$-4 sps:$4 sm:$0xff] %v2573_v21   ;;  %v4643_v56 = vadd.f32 %v10537_v4, %v13278_v9  ;;  %v2547_v16 = vmax.f32 %v2531_v11, 0.0  ;;  %v2532_v6 = vadd.f32 %v13278_v9, %v2472_v29 }
 0x2a5   : > { %v4579_v36 = vpop.f32.mrb[9].mxu1  ;;  %v4683_v23 = vrot.slane %v4667_v53, 4  ;;  %v2550_v30 = vmax.f32 %v2534_v57, 0.0  ;;  %v13308_v59 = vld [vmem:[#allocation3 + $0x18] sm:$0xf]  ;;  %v4752_v50 = vshrl.u32 %v4716_v12, 16 }
 0x2a6   : > { %v4641_v41 = vadd.f32 %v13278_v9, %v4579_v36  ;;  %v10538_v18 = vpop.f32.mrb[10].mxu1  ;;  %4704 = vst [vmem:[#allocation3 + $0xc8] ss:$-4 sps:$4 sm:$0xff] %v4684_v43   ;;  %v4659_v63 = vmax.f32 %v4643_v56, 0.0  ;;  %v2548_v8 = vmax.f32 %v2532_v6, 0.0  ;;  %v4755_v62 = vshll.u32 %v4716_v12, 16 }
 0x2a7   : > { %v4644_v22 = vadd.f32 %v10538_v18, %v13278_v9  ;;  %v4582_v25 = vpop.f32.mrb[11].mxu1  ;;  %4702 = vst [vmem:[#allocation3 + $0xb8] ss:$-4 sps:$4 sm:$0xff] %v4683_v23   ;;  %v2560_v14 = vpack.c.bf16 %v2550_v30, %v2549_v48  ;;  %v4754_v55 = vrot.slane %v4752_v50, 3  ;;  %v4760_v46 = vshrl.u32 %v13308_v59, 16 }
 0x2a8   : > { %v4657_v27 = vmax.f32 %v4641_v41, 0.0  ;;  %v4642_v24 = vadd.f32 %v13278_v9, %v4582_v25  ;;  %v2559_v26 = vpack.c.bf16 %v2548_v8, %v2547_v16  ;;  %v10253_v7 = vpop.f32.mrb[12].mxu0  ;;  %v4757_v54 = vrot.slane %v4755_v62, 4  ;;  %v6833_v5 = vld [vmem:[#allocation3 + $0x90] sm:$0xf8] }
 0x2a9   : > { %v4660_v13 = vmax.f32 %v4644_v22, 0.0  ;;  %v2576_v47 = vrot.slane %v2560_v14, 4  ;;  %v2537_v60 = vadd.f32 %v10253_v7, %v13278_v9  ;;  %v2485_v40 = vpop.f32.mrb[13].mxu0  ;;  %v4763_v0 = vshll.u32 %v13308_v59, 16  ;;  %v13321_v29 = vld [vmem:[#allocation3 + $0x98] sm:$0xf] }
 0x2aa   : > { %v4658_v52 = vmax.f32 %v4642_v24, 0.0  ;;  %v2575_v61 = vrot.slane %v2559_v26, 4  ;;  %v2535_v49 = vadd.f32 %v13278_v9, %v2485_v40  ;;  %v10254_v17 = vpop.f32.mrb[14].mxu0  ;;  %v4758_v38 = vor.u32 %v4757_v54, %v4754_v55  ;;  %v13328_v8 = vld [vmem:[#allocation3 + $0x28] sm:$0xf] }
 0x2ab   : > { %v4670_v10 = vpack.c.bf16 %v4660_v13, %v4659_v63  ;;  %2598 = vst [vmem:[#allocation3 + $0x68] ss:$-4 sps:$4 sm:$0xff] %v2576_v47   ;;  %v2553_v39 = vmax.f32 %v2537_v60, 0.0  ;;  %v10541_v51 = vpop.f32.mrb[12].mxu1  ;;  %v2538_v37 = vadd.f32 %v10254_v17, %v13278_v9  ;;  %v2488_v34 = vpop.f32.mrb[15].mxu0  ;;  %v4762_v15 = vrot.slane %v4760_v46, 3 }
 0x2ac   : > { %v4669_v28 = vpack.c.bf16 %v4658_v52, %v4657_v27  ;;  %2596 = vst [vmem:[#allocation3 + $0x58] ss:$-4 sps:$4 sm:$0xff] %v2575_v61   ;;  %v4647_v20 = vadd.f32 %v10541_v51, %v13278_v9  ;;  %v2551_v33 = vmax.f32 %v2535_v49, 0.0  ;;  %v4595_v3 = vpop.f32.mrb[13].mxu1  ;;  %v2536_v31 = vadd.f32 %v13278_v9, %v2488_v34  ;;  %v6835_v14 = vld [vmem:[#allocation3 + $0xa0] sm:$0xf8] }
 0x2ad   : > { %v4686_v45 = vrot.slane %v4670_v10, 4  ;;  %v4645_v1 = vadd.f32 %v13278_v9, %v4595_v3  ;;  %v2554_v21 = vmax.f32 %v2538_v37, 0.0  ;;  %v10542_v11 = vpop.f32.mrb[14].mxu1  ;;  %v4765_v35 = vrot.slane %v4763_v0, 4  ;;  %v13335_v7 = vld [vmem:[#allocation3 + $0xa8] sm:$0xf] }
 0x2ae   : > { %v4685_v2 = vrot.slane %v4669_v28, 4  ;;  %v4663_v53 = vmax.f32 %v4647_v20, 0.0  ;;  %v4648_v48 = vadd.f32 %v10542_v11, %v13278_v9  ;;  %v2552_v4 = vmax.f32 %v2536_v31, 0.0  ;;  %v4598_v57 = vpop.f32.mrb[15].mxu1  ;;  %v4720_v61 = vld [vmem:[#allocation3 + $0x30] sm:$0xf8] }
 0x2af   : > { %4708 = vst [vmem:[#allocation3 + $0xe8] ss:$-4 sps:$4 sm:$0xff] %v4686_v45   ;;  %v6869_v12 = vshrl.u32 %v6833_v5, 16  ;;  %v4661_v43 = vmax.f32 %v4645_v1, 0.0  ;;  %v2562_v56 = vpack.c.bf16 %v2554_v21, %v2553_v39  ;;  %v4646_v16 = vadd.f32 %v13278_v9, %v4598_v57  ;;  %v6837_v34 = vld [vmem:[#allocation3 + $0xb0] sm:$0xf8] }
 0x2b0   : > { %4706 = vst [vmem:[#allocation3 + $0xd8] ss:$-4 sps:$4 sm:$0xff] %v4685_v2   ;;  %v4766_v36 = vor.u32 %v4765_v35, %v4762_v15  ;;  %v4664_v6 = vmax.f32 %v4648_v48, 0.0  ;;  %v2561_v23 = vpack.c.bf16 %v2552_v4, %v2551_v33  ;;  %v6872_v30 = vshll.u32 %v6833_v5, 16  ;;  %v13348_v1 = vld [vmem:[#allocation3 + $0xb8] sm:$0xf] }
 0x2b1   : > { %v6871_v41 = vrot.slane %v6869_v12, 3  ;;  %v2578_v18 = vrot.slane %v2562_v56, 4  ;;  %v4662_v50 = vmax.f32 %v4646_v16, 0.0  ;;  %v6877_v22 = vshrl.u32 %v13321_v29, 16  ;;  %v11867_v11 = vld [vmem:[#allocation9 + $0x8] sm:$0xff]  }
 0x2b2   : > { %v13325_v63 = vsel %vm504_vm0, %v4758_v38, %v4766_v36  ;;  %v4672_v25 = vpack.c.bf16 %v4664_v6, %v4663_v53  ;;  %v2577_v62 = vrot.slane %v2561_v23, 4  ;;  %v6874_v27 = vrot.slane %v6872_v30, 4  ;;  %v13340_v38 = vld [vmem:[#allocation3 + $0x38] sm:$0xf]  ;;  %v4722_v4 = vld [vmem:[#allocation3 + $0x40] sm:$0xf8] }
 0x2b3   : > { %10559 = vmatprep.mubr.bf16.mxu0 %v13325_v63  ;;  %v6880_v9 = vshll.u32 %v13321_v29, 16  ;;  %2602 = vst [vmem:[#allocation3 + $0x88] ss:$-4 sps:$4 sm:$0xff] %v2578_v18   ;;  %v4671_v24 = vpack.c.bf16 %v4662_v50, %v4661_v43  ;;  %v6879_v55 = vrot.slane %v6877_v22, 3  ;;  %v4771_v13 = vrot.slane %v4769_v19, 3  ;;  %v11868_v43 = vld [vmem:[#allocation9 + $0x8] sm:$0xff]  }
 0x2b4   : > { %v4772_v26 = vshll.u32 %v13298_v44, 16  ;;  %v4688_v54 = vrot.slane %v4672_v25, 4  ;;  %2600 = vst [vmem:[#allocation3 + $0x78] ss:$-4 sps:$4 sm:$0xff] %v2577_v62   ;;  %v6875_v46 = vor.u32 %v6874_v27, %v6871_v41  ;;  %v4777_v52 = vshrl.u32 %v13328_v8, 16 }
 0x2b5   : > { %v6882_v47 = vrot.slane %v6880_v9, 4  ;;  %v4687_v60 = vrot.slane %v4671_v24, 4  ;;  %v4780_v0 = vshll.u32 %v13328_v8, 16  ;;  %v6886_v10 = vshrl.u32 %v6835_v14, 16  ;;  %v13356_v30 = vld [vmem:[#allocation3 + $0x48] sm:$0xf] }
 0x2b6   : > { %v4774_v40 = vrot.slane %v4772_v26, 4  ;;  %4712 = vst [vmem:[#allocation3 + $0x108] ss:$-4 sps:$4 sm:$0xff] %v4688_v54   ;;  %v4779_v17 = vrot.slane %v4777_v52, 3  ;;  %v6889_v19 = vshll.u32 %v6835_v14, 16  ;;  %v6894_v44 = vshrl.u32 %v13335_v7, 16 }
 0x2b7   : > { %v6883_v49 = vor.u32 %v6882_v47, %v6879_v55  ;;  %4710 = vst [vmem:[#allocation3 + $0xf8] ss:$-4 sps:$4 sm:$0xff] %v4687_v60   ;;  %v4782_v39 = vrot.slane %v4780_v0, 4  ;;  %v6888_v51 = vrot.slane %v6886_v10, 3  ;;  %v6897_v37 = vshll.u32 %v13335_v7, 16  ;;  %v11869_v55 = vld [vmem:[#allocation9 + $0x10] sm:$0xff]  }
 0x2b8   : > { %v4775_v28 = vor.u32 %v4774_v40, %v4771_v13  ;;  %v6891_v5 = vrot.slane %v6889_v19, 4  ;;  %v6896_v45 = vrot.slane %v6894_v44, 3  ;;  %v4786_v20 = vshrl.u32 %v4720_v61, 16  ;;  %v6839_v62 = vld [vmem:[#allocation3 + $0xc0] sm:$0xf8]  ;;  %v11870_v0 = vld [vmem:[#allocation9 + $0x10] sm:$0xff]  }
 0x2b9   : > { %v13344_v15 = vsel %vm504_vm0, %v6875_v46, %v6883_v49  ;;  %v4783_v33 = vor.u32 %v4782_v39, %v4779_v17  ;;  %v6899_v3 = vrot.slane %v6897_v37, 4  ;;  %v4789_v31 = vshll.u32 %v4720_v61, 16  ;;  %v13367_v46 = vld [vmem:[#allocation3 + $0xc8] sm:$0xf]  ;;  %v4724_v10 = vld [vmem:[#allocation3 + $0x50] sm:$0xf8] }
 0x2ba   : > { %10847 = vmatprep.mubr.bf16.mxu1 %v13344_v15  ;;  %v4794_v2 = vshrl.u32 %v13340_v38, 16  ;;  %v6892_v21 = vor.u32 %v6891_v5, %v6888_v51  ;;  %v4788_v35 = vrot.slane %v4786_v20, 3  ;;  %v4797_v53 = vshll.u32 %v13340_v38, 16  ;;  %v13373_v19 = vld [vmem:[#allocation3 + $0x58] sm:$0xf] }
 0x2bb   : > { %v6903_v48 = vshrl.u32 %v6837_v34, 16  ;;  %v13352_v57 = vsel %vm504_vm0, %v4775_v28, %v4783_v33  ;;  %v6900_v12 = vor.u32 %v6899_v3, %v6896_v45  ;;  %v4791_v56 = vrot.slane %v4789_v31, 4  ;;  %v11871_v37 = vld [vmem:[#allocation9 + $0x18] sm:$0xff]   ;;  %v6841_v3 = vld [vmem:[#allocation3 + $0xd0] sm:$0xf8] }
 0x2bc   : > { %v4796_v16 = vrot.slane %v4794_v2, 3  ;;  %10560 = vmatmul.mubr.bf16.vlgmr.msra.gmra.mrb[16].mxu0 %v13352_v57  ;;  %v4799_v36 = vrot.slane %v4797_v53, 4  ;;  %v6906_v23 = vshll.u32 %v6837_v34, 16  ;;  %v6911_v41 = vshrl.u32 %v13348_v1, 16  ;;  %v11872_v20 = vld [vmem:[#allocation9 + $0x18] sm:$0xff]  }
 0x2bd   : > { %v6905_v6 = vrot.slane %v6903_v48, 3  ;;  %v13359_v18 = vsel %vm504_vm0, %v6892_v21, %v6900_v12  ;;  %10576 = vmatpush3.bf16.msra.mxu0 %v13269_v32  ;;  %v4792_v50 = vor.u32 %v4791_v56, %v4788_v35  ;;  %v6914_v22 = vshll.u32 %v13348_v1, 16  ;;  %v13382_v35 = vld [vmem:[#allocation3 + $0xd8] sm:$0xf] }
 0x2be   : > { %v4803_v25 = vshrl.u32 %v4722_v4, 16  ;;  %10848 = vmatmul.mubr.bf16.vlgmr.msra.gmra.mrb[16].mxu1 %v13359_v18  ;;  %10577 = vmatprep.subr.bf16.mxu0 %v11867_v11  ;;  %v4800_v27 = vor.u32 %v4799_v36, %v4796_v16  ;;  %v6908_v9 = vrot.slane %v6906_v23, 4  ;;  %v6913_v14 = vrot.slane %v6911_v41, 3  ;;  %v11873_v23 = vld [vmem:[#allocation9 + $0x20] sm:$0xff]  }
 0x2bf   : > { %v4806_v24 = vshll.u32 %v4722_v4, 16  ;;  %10864 = vmatpush3.bf16.msra.mxu1 %v13272_v58  ;;  %v6916_v13 = vrot.slane %v6914_v22, 4  ;;  %v4811_v54 = vshrl.u32 %v13356_v30, 16  ;;  %v4814_v32 = vshll.u32 %v13356_v30, 16 }
 0x2c0   : > { %v4805_v26 = vrot.slane %v4803_v25, 3  ;;  %10865 = vmatprep.subr.bf16.mxu1 %v11868_v43  ;;  %v13370_v47 = vsel %vm504_vm0, %v4792_v50, %v4800_v27  ;;  %v6909_v52 = vor.u32 %v6908_v9, %v6905_v6  ;;  %v6920_v40 = vshrl.u32 %v6839_v62, 16 }
 0x2c1   : > { %v4808_v60 = vrot.slane %v4806_v24, 4  ;;  %10578 = vmatpush3.bf16.msra.mxu0 %v11867_v11  ;;  %10563 = vmatprep.mubr.bf16.mxu0 %v13370_v47  ;;  %v6917_v58 = vor.u32 %v6916_v13, %v6913_v14  ;;  %v4813_v61 = vrot.slane %v4811_v54, 3  ;;  %v4816_v49 = vrot.slane %v4814_v32, 4  ;;  %v11874_v13 = vld [vmem:[#allocation9 + $0x20] sm:$0xff]  }
 0x2c2   : > { %v6923_v17 = vshll.u32 %v6839_v62, 16  ;;  %10579 = vmatprep.subr.bf16.mxu0 %v11869_v55  ;;  %v6922_v28 = vrot.slane %v6920_v40, 3  ;;  %v6928_v39 = vshrl.u32 %v13367_v46, 16  ;;  %v6931_v51 = vshll.u32 %v13367_v46, 16  ;;  %v13391_v62 = vld [vmem:[#allocation3 + $0x68] sm:$0xf] }
 0x2c3   : > { %v4809_v44 = vor.u32 %v4808_v60, %v4805_v26  ;;  %10866 = vmatpush3.bf16.msra.mxu1 %v11868_v43  ;;  %v13378_v34 = vsel %vm504_vm0, %v6909_v52, %v6917_v58  ;;  %v4817_v5 = vor.u32 %v4816_v49, %v4813_v61  ;;  %v4820_v33 = vshrl.u32 %v4724_v10, 16  ;;  %v4726_v43 = vld [vmem:[#allocation3 + $0x60] sm:$0xf8]  ;;  %v11875_v60 = vld [vmem:[#allocation9 + $0x28] sm:$0xff]  }
 0x2c4   : > { %v6925_v45 = vrot.slane %v6923_v17, 4  ;;  %10851 = vmatprep.mubr.bf16.mxu1 %v13378_v34  ;;  %v6930_v31 = vrot.slane %v6928_v39, 3  ;;  %v6933_v2 = vrot.slane %v6931_v51, 4  ;;  %10867 = vmatprep.subr.bf16.mxu1 %v11870_v0  ;;  %v4823_v21 = vshll.u32 %v4724_v10, 16  ;;  %v13399_v61 = vld [vmem:[#allocation3 + $0xe8] sm:$0xf] }
 0x2c5   : > { %v4828_v11 = vshrl.u32 %v13373_v19, 16  ;;  %v13385_v53 = vsel %vm504_vm0, %v4809_v44, %v4817_v5  ;;  %10580 = vmatpush3.bf16.msra.mxu0 %v11869_v55  ;;  %v4822_v4 = vrot.slane %v4820_v33, 3  ;;  %v4831_v12 = vshll.u32 %v13373_v19, 16  ;;  %v6843_v55 = vld [vmem:[#allocation3 + $0xe0] sm:$0xf8]  ;;  %v11876_v39 = vld [vmem:[#allocation9 + $0x28] sm:$0xff]  }
 0x2c6   : > { %v6926_v48 = vor.u32 %v6925_v45, %v6922_v28  ;;  %10564 = vmatmul.mubr.bf16.gmra.mrb[20].mxu0 %v13385_v53  ;;  %v6934_v56 = vor.u32 %v6933_v2, %v6930_v31  ;;  %10581 = vmatprep.subr.bf16.mxu0 %v11871_v37  ;;  %v4825_v16 = vrot.slane %v4823_v21, 4  ;;  %v6937_v6 = vshrl.u32 %v6841_v3, 16  ;;  %v4728_v51 = vld [vmem:[#allocation3 + $0x70] sm:$0xf8] }
 0x2c7   : > { %v4830_v36 = vrot.slane %v4828_v11, 3  ;;  %10868 = vmatpush3.bf16.msra.mxu1 %v11870_v0  ;;  %v4833_v41 = vrot.slane %v4831_v12, 4  ;;  %v6940_v50 = vshll.u32 %v6841_v3, 16  ;;  %v6945_v22 = vshrl.u32 %v13382_v35, 16  ;;  %v13405_v3 = vld [vmem:[#allocation3 + $0x78] sm:$0xf] }
 0x2c8   : > { %v6948_v25 = vshll.u32 %v13382_v35, 16  ;;  %v13394_v27 = vsel %vm504_vm0, %v6926_v48, %v6934_v56  ;;  %10869 = vmatprep.subr.bf16.mxu1 %v11872_v20  ;;  %v4826_v9 = vor.u32 %v4825_v16, %v4822_v4  ;;  %v6939_v14 = vrot.slane %v6937_v6, 3  ;;  %v11877_v56 = vld [vmem:[#allocation9 + $0x30] sm:$0xff]  }
 0x2c9   : > { %v4837_v24 = vshrl.u32 %v4726_v43, 16  ;;  %10852 = vmatmul.mubr.bf16.gmra.mrb[20].mxu1 %v13394_v27  ;;  %10582 = vmatpush3.bf16.msra.mxu0 %v11871_v37  ;;  %v4834_v26 = vor.u32 %v4833_v41, %v4830_v36  ;;  %v6942_v54 = vrot.slane %v6940_v50, 4  ;;  %v6947_v32 = vrot.slane %v6945_v22, 3  ;;  %v13414_v50 = vld [vmem:[#allocation3 + $0xf8] sm:$0xf] }
 0x2ca   : > { %v6950_v52 = vrot.slane %v6948_v25, 4  ;;  %v4840_v0 = vshll.u32 %v4726_v43, 16  ;;  %v4845_v10 = vshrl.u32 %v13391_v62, 16  ;;  %v4848_v58 = vshll.u32 %v13391_v62, 16  ;;  %10583 = vmatprep.subr.bf16.mxu0 %v11873_v23  ;;  %v6845_v43 = vld [vmem:[#allocation3 + $0xf0] sm:$0xf8] }
 0x2cb   : > { %v4839_v40 = vrot.slane %v4837_v24, 3  ;;  %10870 = vmatpush3.bf16.msra.mxu1 %v11872_v20  ;;  %v13402_v49 = vsel %vm504_vm0, %v4826_v9, %v4834_v26  ;;  %v6943_v17 = vor.u32 %v6942_v54, %v6939_v14  ;;  %v6954_v28 = vshrl.u32 %v6843_v55, 16  ;;  %v4730_v14 = vld [vmem:[#allocation3 + $0x80] sm:$0xf8]  ;;  %v11878_v24 = vld [vmem:[#allocation9 + $0x30] sm:$0xff]  }
 0x2cc   : > { %v6951_v44 = vor.u32 %v6950_v52, %v6947_v32  ;;  %10567 = vmatprep.mubr.bf16.mxu0 %v13402_v49  ;;  %v4842_v37 = vrot.slane %v4840_v0, 4  ;;  %v4847_v5 = vrot.slane %v4845_v10, 3  ;;  %v4850_v45 = vrot.slane %v4848_v58, 4  ;;  %10871 = vmatprep.subr.bf16.mxu1 %v11874_v13  ;;  %v13423_v10 = vld [vmem:[#allocation3 + $0x88] sm:$0xf] }
 0x2cd   : > { %v6957_v33 = vshll.u32 %v6843_v55, 16  ;;  %v6956_v20 = vrot.slane %v6954_v28, 3  ;;  %v6962_v2 = vshrl.u32 %v13399_v61, 16  ;;  %v6965_v21 = vshll.u32 %v13399_v61, 16  ;;  %10584 = vmatpush3.bf16.msra.mxu0 %v11873_v23 }
 0x2ce   : > { %v13408_v31 = vsel %vm504_vm0, %v6943_v17, %v6951_v44  ;;  %v4843_v11 = vor.u32 %v4842_v37, %v4839_v40  ;;  %v4851_v48 = vor.u32 %v4850_v45, %v4847_v5  ;;  %10585 = vmatprep.subr.bf16.mxu0 %v11875_v60  ;;  %v4854_v12 = vshrl.u32 %v4728_v51, 16 }
 0x2cf   : > { %10855 = vmatprep.mubr.bf16.mxu1 %v13408_v31  ;;  %v6959_v4 = vrot.slane %v6957_v33, 4  ;;  %v6964_v16 = vrot.slane %v6962_v2, 3  ;;  %v6967_v36 = vrot.slane %v6965_v21, 4  ;;  %10872 = vmatpush3.bf16.msra.mxu1 %v11874_v13  ;;  %v4857_v6 = vshll.u32 %v4728_v51, 16  ;;  %v6847_v51 = vld [vmem:[#allocation3 + $0x100] sm:$0xf8] }
 0x2d0   : > { %v4862_v41 = vshrl.u32 %v13405_v3, 16  ;;  %v13417_v22 = vsel %vm504_vm0, %v4843_v11, %v4851_v48  ;;  %10873 = vmatprep.subr.bf16.mxu1 %v11876_v39  ;;  %v4856_v25 = vrot.slane %v4854_v12, 3  ;;  %v4865_v9 = vshll.u32 %v13405_v3, 16  ;;  %v11879_v33 = vld [vmem:[#allocation9 + $0x38] sm:$0xff]   ;;  %v13431_v48 = vld [vmem:[#allocation3 + $0x108] sm:$0xf] }
 0x2d1   : > { %v6960_v23 = vor.u32 %v6959_v4, %v6956_v20  ;;  %10568 = vmatmul.mubr.bf16.gmra.mrb[24].mxu0 %v13417_v22  ;;  %v6968_v55 = vor.u32 %v6967_v36, %v6964_v16  ;;  %v4859_v26 = vrot.slane %v4857_v6, 4  ;;  %v6971_v54 = vshrl.u32 %v6845_v43, 16  ;;  %v11880_v20 = vld [vmem:[#allocation9 + $0x38] sm:$0xff]   ;;  %v6831_v36 = vld [vmem:[#allocation3 + $0x80] sm:$0xf8] }
 0x2d2   : > { %v4864_v13 = vrot.slane %v4862_v41, 3  ;;  %10586 = vmatpush3.bf16.msra.mxu0 %v11875_v60  ;;  %v4867_v32 = vrot.slane %v4865_v9, 4  ;;  %v6974_v52 = vshll.u32 %v6845_v43, 16  ;;  %v6979_v40 = vshrl.u32 %v13414_v50, 16  ;;  %v11881_v6 = vld [vmem:[#allocation9 + $0x180] sm:$0xff]  }
 0x2d3   : > { %v6982_v0 = vshll.u32 %v13414_v50, 16  ;;  %v13426_v58 = vsel %vm504_vm0, %v6960_v23, %v6968_v55  ;;  %10874 = vmatpush3.bf16.msra.mxu1 %v11876_v39  ;;  %v4860_v17 = vor.u32 %v4859_v26, %v4856_v25  ;;  %v6973_v44 = vrot.slane %v6971_v54, 3  ;;  %10587 = vmatprep.subr.bf16.mxu0 %v11877_v56 }
 0x2d4   : > { %v4895_v28 = vshrl.u32 %v4730_v14, 16  ;;  %10856 = vmatmul.mubr.bf16.gmra.mrb[24].mxu1 %v13426_v58  ;;  %v4868_v60 = vor.u32 %v4867_v32, %v4864_v13  ;;  %v6976_v37 = vrot.slane %v6974_v52, 4  ;;  %v6981_v5 = vrot.slane %v6979_v40, 3  ;;  %10875 = vmatprep.subr.bf16.mxu1 %v11878_v24 }
 0x2d5   : > { %v6984_v45 = vrot.slane %v6982_v0, 4  ;;  %v4898_v21 = vshll.u32 %v4730_v14, 16  ;;  %v4903_v11 = vshrl.u32 %v13423_v10, 16  ;;  %v4906_v39 = vshll.u32 %v13423_v10, 16  ;;  %v13437_v14 = vld [vmem:[#allocation3 + $0x88] sm:$0xf] }
 0x2d6   : > { %v4897_v2 = vrot.slane %v4895_v28, 3  ;;  %v13434_v4 = vsel %vm504_vm0, %v4860_v17, %v4868_v60  ;;  %v6977_v12 = vor.u32 %v6976_v37, %v6973_v44  ;;  %v7012_v16 = vshrl.u32 %v6847_v51, 16  ;;  %10588 = vmatpush3.bf16.msra.mxu0 %v11877_v56  ;;  %v11882_v56 = vld [vmem:[#allocation9 + $0x180] sm:$0xff]  }
 0x2d7   : > { %v6985_v43 = vor.u32 %v6984_v45, %v6981_v5  ;;  %10571 = vmatprep.mubr.bf16.mxu0 %v13434_v4  ;;  %v4900_v41 = vrot.slane %v4898_v21, 4  ;;  %v4905_v23 = vrot.slane %v4903_v11, 3  ;;  %v4908_v25 = vrot.slane %v4906_v39, 4  ;;  %10876 = vmatpush3.bf16.msra.mxu1 %v11878_v24 }
 0x2d8   : > { %v7015_v9 = vshll.u32 %v6847_v51, 16  ;;  %v7014_v26 = vrot.slane %v7012_v16, 3  ;;  %v7020_v13 = vshrl.u32 %v13431_v48, 16  ;;  %v7023_v54 = vshll.u32 %v13431_v48, 16  ;;  %10589 = vmatprep.subr.bf16.mxu0 %v11879_v33  ;;  %10877 = vmatprep.subr.bf16.mxu1 %v11880_v20  ;;  %v11884_v16 = vld [vmem:[#allocation9 + $0x188] sm:$0xff]  }
 0x2d9   : > { %v13440_v55 = vsel %vm504_vm0, %v6977_v12, %v6985_v43  ;;  %v4901_v32 = vor.u32 %v4900_v41, %v4897_v2  ;;  %v4909_v52 = vor.u32 %v4908_v25, %v4905_v23  ;;  %v6852_v0 = vshrl.u32 %v6831_v36, 16  ;;  %v11887_v41 = vld [vmem:[#allocation9 + $0x198] sm:$0xff]   ;;  %v11891_v23 = vld [vmem:[#allocation9 + $0x1a8] sm:$0xff]  }
 0x2da   : > { %10859 = vmatprep.mubr.bf16.mxu1 %v13440_v55  ;;  %v7017_v40 = vrot.slane %v7015_v9, 4  ;;  %v7022_v24 = vrot.slane %v7020_v13, 3  ;;  %v7025_v17 = vrot.slane %v7023_v54, 4  ;;  %v6855_v44 = vshll.u32 %v6831_v36, 16  ;;  %10590 = vmatpush3.bf16.msra.mxu0 %v11879_v33  ;;  %v11885_v36 = vld [vmem:[#allocation9 + $0x190] sm:$0xff]   ;;  %v11892_v25 = vld [vmem:[#allocation9 + $0x1a8] sm:$0xff]  }
 0x2db   : > { %v6860_v28 = vshrl.u32 %v13437_v14, 16  ;;  %v13447_v51 = vsel %vm504_vm0, %v4901_v32, %v4909_v52  ;;  %v6854_v37 = vrot.slane %v6852_v0, 3  ;;  %v6863_v5 = vshll.u32 %v13437_v14, 16  ;;  %10878 = vmatpush3.bf16.msra.mxu1 %v11880_v20  ;;  %10607 = vmatprep.subr.bf16.mxu0 %v11881_v6  ;;  %v11883_v20 = vld [vmem:[#allocation9 + $0x188] sm:$0xff]   ;;  %v11893_v9 = vld [vmem:[#allocation9 + $0x1b0] sm:$0xff]   ;;  %v11895_v13 = vld [vmem:[#allocation9 + $0x1b8] sm:$0xff]  }
 0x2dc   : > { %v7018_v60 = vor.u32 %v7017_v40, %v7014_v26  ;;  %10572 = vmatmul.mubr.bf16.gmra.mrb[28].mxu0 %v13447_v51  ;;  %v7026_v45 = vor.u32 %v7025_v17, %v7022_v24  ;;  %v6857_v2 = vrot.slane %v6855_v44, 4  ;;  %10895 = vmatprep.subr.bf16.mxu1 %v11882_v56  ;;  %v11894_v26 = vld [vmem:[#allocation9 + $0x1b0] sm:$0xff]   ;;  %v11896_v54 = vld [vmem:[#allocation9 + $0x1b8] sm:$0xff]   ;;  %v11898_v32 = vld [vmem:[#allocation9 + $0x40] sm:$0xff]  }
 0x2dd   : > { %v6862_v21 = vrot.slane %v6860_v28, 3  ;;  %v6865_v11 = vrot.slane %v6863_v5, 4  ;;  %10591 = vmatprep.mubr.bf16.mxu0 %v13301_v42  ;;  %v11886_v42 = vld [vmem:[#allocation9 + $0x190] sm:$0xff]   ;;  %v11899_v52 = vld [vmem:[#allocation9 + $0x48] sm:$0xff]   ;;  %v11903_v0 = vld [vmem:[#allocation9 + $0x58] sm:$0xff]  }
 0x2de   : > { %v13453_v33 = vsel %vm504_vm0, %v7018_v60, %v7026_v45  ;;  %v6858_v39 = vor.u32 %v6857_v2, %v6854_v37  ;;  %v11900_v40 = vld [vmem:[#allocation9 + $0x48] sm:$0xff]   ;;  %v4732_v24 = vld [vmem:[#allocation3 + $0x90] sm:$0xf8]  ;;  %v13478_v17 = vld [vmem:[#allocation3 + $0x98] sm:$0xf] }
 0x2df   : > { %10860 = vmatmul.mubr.bf16.gmra.mrb[28].mxu1 %v13453_v33  ;;  %v6866_v12 = vor.u32 %v6865_v11, %v6862_v21  ;;  %v5220_v44 = vshrl.u32 %v4732_v24, 16  ;;  %v5223_v28 = vshll.u32 %v4732_v24, 16  ;;  %v5231_v5 = vshll.u32 %v13478_v17, 16  ;;  %v11906_v2 = vld [vmem:[#allocation9 + $0x60] sm:$0xff]  }
 0x2e1   : > { %v6867_v43 = vsel %vm504_vm0, %v6858_v39, %v6866_v12  ;;  %v5222_v21 = vrot.slane %v5220_v44, 3  ;;  %v5225_v11 = vrot.slane %v5223_v28, 4  ;;  %v5448_v28 = vrot.slane %v13328_v8, 4 }
 0x2e2   : > { %10879 = vmatprep.mubr.bf16.mxu1 %v6867_v43  ;;  %v5233_v43 = vrot.slane %v5231_v5, 4  ;;  %v7563_v5 = vrot.slane %v13335_v7, 4  ;;  %v13533_v7 = vld [vmem:[#allocation3 + $0x40] sm:$0xf0] }
 0x2e4   : > { %10592 = vmatmul.mubr.bf16.vlgmr.msra.gmra.mrb[16].mxu0 %v13325_v63  ;;  %v11888_v63 = vld [vmem:[#allocation9 + $0x198] sm:$0xff]  }
 0x2e5   : > { %10595 = vmatprep.mubr.bf16.mxu0 %v13352_v57  ;;  %10608 = vmatpush3.bf16.msra.mxu0 %v11881_v6  ;;  %v11890_v6 = vld [vmem:[#allocation9 + $0x1a0] sm:$0xff]  }
 0x2e6   : > { %10609 = vmatprep.subr.bf16.mxu0 %v11883_v20 }
 0x2e7   : > { %10880 = vmatmul.mubr.bf16.vlgmr.msra.gmra.mrb[16].mxu1 %v13344_v15  ;;  %v11889_v15 = vld [vmem:[#allocation9 + $0x1a0] sm:$0xff]  }
 0x2e8   : > { %10883 = vmatprep.mubr.bf16.mxu1 %v13359_v18  ;;  %10896 = vmatpush3.bf16.msra.mxu1 %v11882_v56  ;;  %v11897_v56 = vld [vmem:[#allocation9 + $0x40] sm:$0xff]  }
 0x2e9   : > { %10897 = vmatprep.subr.bf16.mxu1 %v11884_v16  ;;  %10610 = vmatpush3.bf16.msra.mxu0 %v11883_v20 }
 0x2ea   : > { %10611 = vmatprep.subr.bf16.mxu0 %v11885_v36 }
 0x2ec   : > { %10898 = vmatpush3.bf16.msra.mxu1 %v11884_v16  ;;  %10596 = vmatmul.mubr.bf16.gmra.mrb[20].mxu0 %v13370_v47 }
 0x2ed   : > { %10899 = vmatprep.subr.bf16.mxu1 %v11886_v42  ;;  %10599 = vmatprep.mubr.bf16.mxu0 %v13385_v53 }
 0x2ee   : > { %10612 = vmatpush3.bf16.msra.mxu0 %v11885_v36  ;;  %v13489_v36 = vld [vmem:[#allocation3] sm:$0xf0] }
 0x2ef   : > { %10884 = vmatmul.mubr.bf16.gmra.mrb[20].mxu1 %v13378_v34  ;;  %10613 = vmatprep.subr.bf16.mxu0 %v11887_v41 }
 0x2f0   : > { %10887 = vmatprep.mubr.bf16.mxu1 %v13394_v27  ;;  %10900 = vmatpush3.bf16.msra.mxu1 %v11886_v42  ;;  %v11908_v42 = vld [vmem:[#allocation9 + $0x68] sm:$0xff]  }
 0x2f1   : > { %10901 = vmatprep.subr.bf16.mxu1 %v11888_v63 }
 0x2f2   : > { %10614 = vmatpush3.bf16.msra.mxu0 %v11887_v41  ;;  %v11909_v41 = vld [vmem:[#allocation9 + $0x70] sm:$0xff]  }
 0x2f3   : > { %10615 = vmatprep.subr.bf16.mxu0 %v11889_v15 }
 0x2f4   : > { %10902 = vmatpush3.bf16.msra.mxu1 %v11888_v63  ;;  %10600 = vmatmul.mubr.bf16.gmra.mrb[24].mxu0 %v13402_v49 }
 0x2f5   : > { %10903 = vmatprep.subr.bf16.mxu1 %v11890_v6  ;;  %10603 = vmatprep.mubr.bf16.mxu0 %v13417_v22 }
 0x2f6   : > { %10616 = vmatpush3.bf16.msra.mxu0 %v11889_v15  ;;  %v5441_v15 = vrot.slane %v13489_v36, 4 }
 0x2f7   : > { %10888 = vmatmul.mubr.bf16.gmra.mrb[24].mxu1 %v13408_v31  ;;  %10617 = vmatprep.subr.bf16.mxu0 %v11891_v23 }
 0x2f8   : > { %10891 = vmatprep.mubr.bf16.mxu1 %v13426_v58  ;;  %10904 = vmatpush3.bf16.msra.mxu1 %v11890_v6  ;;  %v11998_v6 = vld [vmem:[#allocation3 + $0x8] sm:$0xf] }
 0x2f9   : > { %10905 = vmatprep.subr.bf16.mxu1 %v11892_v25 }
 0x2fa   : > { %10618 = vmatpush3.bf16.msra.mxu0 %v11891_v23  ;;  %v5442_v23 = vrot.slane %v11998_v6, 4  ;;  %v11919_v6 = vld [vmem:[#allocation9 + $0x118] sm:$0xff]  }
 0x2fb   : > { %10619 = vmatprep.subr.bf16.mxu0 %v11893_v9 }
 0x2fc   : > { %10906 = vmatpush3.bf16.msra.mxu1 %v11892_v25  ;;  %10604 = vmatmul.mubr.bf16.gmra.mrb[28].mxu0 %v13434_v4  ;;  %v5226_v25 = vor.u32 %v5225_v11, %v5222_v21  ;;  %v11917_v21 = vld [vmem:[#allocation9 + $0x110] sm:$0xff]  }
 0x2fd   : > { %10907 = vmatprep.subr.bf16.mxu1 %v11894_v26  ;;  %10623 = vmatprep.mubr.bf16.mxu0 %v13352_v57  ;;  %v11901_v57 = vld [vmem:[#allocation9 + $0x50] sm:$0xff]  }
 0x2fe   : > { %10620 = vmatpush3.bf16.msra.mxu0 %v11893_v9  ;;  %v13539_v11 = vld [vmem:[#allocation3 + $0xb0] sm:$0xf0] }
 0x2ff   : > { %10892 = vmatmul.mubr.bf16.gmra.mrb[28].mxu1 %v13440_v55  ;;  %10621 = vmatprep.subr.bf16.mxu0 %v11895_v13 }
 0x300   : > { %10908 = vmatpush3.bf16.msra.mxu1 %v11894_v26  ;;  %10911 = vmatprep.mubr.bf16.mxu1 %v13359_v18  ;;  %v11902_v18 = vld [vmem:[#allocation9 + $0x50] sm:$0xff]   ;;  %v13496_v26 = vld [vmem:[#allocation3 + $0x80] sm:$0xf0] }
 0x301   : > { %10909 = vmatprep.subr.bf16.mxu1 %v11896_v54 }
 0x302   : > { %10622 = vmatpush3.bf16.msra.mxu0 %v11895_v13  ;;  %v7557_v13 = vrot.slane %v13437_v14, 4 }
 0x303   : > { %10639 = vmatprep.subr.bf16.mxu0 %v11897_v56 }
 0x304   : > { %10910 = vmatpush3.bf16.msra.mxu1 %v11896_v54  ;;  %v11911_v54 = vld [vmem:[#allocation9 + $0x78] sm:$0xff]  }
 0x305   : > { %10624 = vmatmul.mubr.bf16.vlgmr.msra.gmra.mrb[16].mxu0 %v13370_v47  ;;  %10927 = vmatprep.subr.bf16.mxu1 %v11898_v32  ;;  %v6849_v47 = vld [vmem:[#allocation3 + $0x110] sm:$0xf8] }
 0x306   : > { %10627 = vmatprep.mubr.bf16.mxu0 %v13385_v53  ;;  %10640 = vmatpush3.bf16.msra.mxu0 %v11897_v56  ;;  %v11904_v53 = vld [vmem:[#allocation9 + $0x58] sm:$0xff]   ;;  %v7336_v60 = vshrl.u32 %v6849_v47, 16  ;;  %v7339_v37 = vshll.u32 %v6849_v47, 16  ;;  %v5443_v56 = vsel %vm1212_vm1, %v5441_v15, %v5442_v23  ;;  %v5445_v47 = vrot.slane %v13308_v59, 4 }
 0x307   : > { %10912 = vmatmul.mubr.bf16.vlgmr.msra.gmra.mrb[16].mxu1 %v13378_v34  ;;  %10641 = vmatprep.subr.bf16.mxu0 %v11899_v52  ;;  %v13480_v34 = vld [vmem:[#allocation3 + $0x118] sm:$0xf]  ;;  %v7569_v15 = vrot.slane %v13367_v46, 4  ;;  %v13565_v46 = vld [vmem:[#allocation3 + $0x60] sm:$0xf0] }
 0x308   : > { %10915 = vmatprep.mubr.bf16.mxu1 %v13394_v27  ;;  %10928 = vmatpush3.bf16.msra.mxu1 %v11898_v32  ;;  %v11905_v27 = vld [vmem:[#allocation9 + $0x60] sm:$0xff]   ;;  %v7344_v45 = vshrl.u32 %v13480_v34, 16  ;;  %v7338_v39 = vrot.slane %v7336_v60, 3  ;;  %v7341_v12 = vrot.slane %v7339_v37, 4  ;;  %v7560_v37 = vrot.slane %v13321_v29, 4  ;;  %v11920_v23 = vld [vmem:[#allocation9 + $0x118] sm:$0xff]  }
 0x309   : > { %10929 = vmatprep.subr.bf16.mxu1 %v11900_v40 }
 0x30a   : > { %10642 = vmatpush3.bf16.msra.mxu0 %v11899_v52  ;;  %v7346_v20 = vrot.slane %v7344_v45, 3  ;;  %v7342_v63 = vor.u32 %v7341_v12, %v7338_v39  ;;  %v11912_v52 = vld [vmem:[#allocation9 + $0x78] sm:$0xff]   ;;  %v11915_v45 = vld [vmem:[#allocation9 + $0x108] sm:$0xff]   ;;  %v5451_v12 = vrot.slane %v13340_v38, 4 }
 0x30b   : > { %10643 = vmatprep.subr.bf16.mxu0 %v11901_v57 }
 0x30c   : > { %10930 = vmatpush3.bf16.msra.mxu1 %v11900_v40  ;;  %v13503_v40 = vld [vmem:[#allocation3 + $0x10] sm:$0xf0] }
 0x30d   : > { %10628 = vmatmul.mubr.bf16.gmra.mrb[20].mxu0 %v13402_v49  ;;  %10931 = vmatprep.subr.bf16.mxu1 %v11902_v18  ;;  %v5228_v49 = vshrl.u32 %v13478_v17, 16  ;;  %v5444_v24 = vrot.slane %v13503_v40, 4 }
 0x30e   : > { %10631 = vmatprep.mubr.bf16.mxu0 %v13417_v22  ;;  %10644 = vmatpush3.bf16.msra.mxu0 %v11901_v57  ;;  %v7347_v22 = vshll.u32 %v13480_v34, 16  ;;  %v13505_v57 = vld [vmem:[#allocation3 + $0x20] sm:$0xf0] }
 0x30f   : > { %10916 = vmatmul.mubr.bf16.gmra.mrb[20].mxu1 %v13408_v31  ;;  %10645 = vmatprep.subr.bf16.mxu0 %v11903_v0  ;;  %v11907_v31 = vld [vmem:[#allocation9 + $0x68] sm:$0xff]   ;;  %v5447_v44 = vrot.slane %v13505_v57, 4  ;;  %v13521_v59 = vsel %vm1212_vm1, %v5444_v24, %v5445_v47  ;;  %v7575_v24 = vrot.slane %v13399_v61, 4 }
 0x310   : > { %10919 = vmatprep.mubr.bf16.mxu1 %v13426_v58  ;;  %10932 = vmatpush3.bf16.msra.mxu1 %v11902_v18  ;;  %v5230_v58 = vrot.slane %v5228_v49, 3  ;;  %v7349_v16 = vrot.slane %v7347_v22, 4  ;;  %v11913_v18 = vld [vmem:[#allocation9 + $0x100] sm:$0xff]   ;;  %v11916_v22 = vld [vmem:[#allocation9 + $0x108] sm:$0xff]  }
 0x311   : > { %10933 = vmatprep.subr.bf16.mxu1 %v11904_v53  ;;  %v13525_v8 = vsel %vm1212_vm1, %v5447_v44, %v5448_v28  ;;  %v11923_v47 = vld [vmem:[#allocation9 + $0x128] sm:$0xff]   ;;  %v13591_v44 = vld [vmem:[#allocation3 + $0x70] sm:$0xf0] }
 0x312   : > { %10646 = vmatpush3.bf16.msra.mxu0 %v11903_v0  ;;  %v5234_v9 = vor.u32 %v5233_v43, %v5230_v58  ;;  %v13508_v0 = vld [vmem:[#allocation3 + $0x90] sm:$0xf0]  ;;  %v13544_v58 = vld [vmem:[#allocation3 + $0xc0] sm:$0xf0] }
 0x313   : > { %10647 = vmatprep.subr.bf16.mxu0 %v11905_v27  ;;  %v7559_v60 = vrot.slane %v13508_v0, 4  ;;  %v11918_v43 = vld [vmem:[#allocation9 + $0x110] sm:$0xff]  }
 0x314   : > { %10934 = vmatpush3.bf16.msra.mxu1 %v11904_v53  ;;  %v13512_v53 = vld [vmem:[#allocation3 + $0xa0] sm:$0xf0]  ;;  %v11925_v28 = vld [vmem:[#allocation9 + $0x130] sm:$0xff]  }
 0x315   : > { %10632 = vmatmul.mubr.bf16.gmra.mrb[24].mxu0 %v13434_v4  ;;  %10935 = vmatprep.subr.bf16.mxu1 %v11906_v2  ;;  %v7350_v4 = vor.u32 %v7349_v16, %v7346_v20  ;;  %v7562_v49 = vrot.slane %v13512_v53, 4  ;;  %v13530_v29 = vsel %vm1212_vm1, %v7559_v60, %v7560_v37  ;;  %v5453_v20 = vrot.slane %v13533_v7, 4  ;;  %v13601_v60 = vld [vmem:[#allocation3 + $0xf0] sm:$0xf0] }
 0x316   : > { %10635 = vmatprep.mubr.bf16.mxu0 %v13447_v51  ;;  %10648 = vmatpush3.bf16.msra.mxu0 %v11905_v27  ;;  %v11910_v51 = vld [vmem:[#allocation9 + $0x70] sm:$0xff]   ;;  %v11914_v27 = vld [vmem:[#allocation9 + $0x100] sm:$0xff]   ;;  %v5454_v16 = vrot.slane %v13356_v30, 4  ;;  %v5462_v37 = vrot.slane %v13591_v44, 4 }
 0x317   : > { %10920 = vmatmul.mubr.bf16.gmra.mrb[24].mxu1 %v13440_v55  ;;  %10649 = vmatprep.subr.bf16.mxu0 %v11907_v31  ;;  %v7556_v55 = vrot.slane %v13496_v26, 4  ;;  %v7351_v32 = vsel %vm504_vm0, %v7342_v63, %v7350_v4  ;;  %v7568_v63 = vrot.slane %v13544_v58, 4  ;;  %v11921_v4 = vld [vmem:[#allocation9 + $0x120] sm:$0xff]  }
 0x318   : > { %10923 = vmatprep.mubr.bf16.mxu1 %v13453_v33  ;;  %10936 = vmatpush3.bf16.msra.mxu1 %v11906_v2  ;;  %v5235_v33 = vsel %vm504_vm0, %v5226_v25, %v5234_v9  ;;  %v13527_v2 = vld [vmem:[#allocation3 + $0x30] sm:$0xf0]  ;;  %v13557_v30 = vsel %vm1212_vm1, %v5453_v20, %v5454_v16  ;;  %v11931_v20 = vld [vmem:[#allocation9 + $0x1c8] sm:$0xff]  }
 0x319   : > { %10937 = vmatprep.subr.bf16.mxu1 %v11908_v42  ;;  %v7558_v14 = vsel %vm1212_vm1, %v7556_v55, %v7557_v13  ;;  %v5450_v39 = vrot.slane %v13527_v2, 4  ;;  %v13559_v25 = vld [vmem:[#allocation3 + $0x50] sm:$0xf0]  ;;  %v13569_v9 = vsel %vm1212_vm1, %v7568_v63, %v7569_v15  ;;  %v5457_v13 = vrot.slane %v13373_v19, 4  ;;  %v11932_v16 = vld [vmem:[#allocation9 + $0x1c8] sm:$0xff]   ;;  %v11937_v63 = vld [vmem:[#allocation9 + $0x1e0] sm:$0xff]  }
 0x31a   : > { %10650 = vmatpush3.bf16.msra.mxu0 %v11907_v31  ;;  %v13537_v31 = vsel %vm1212_vm1, %v7562_v49, %v7563_v5  ;;  %v5456_v55 = vrot.slane %v13559_v25, 4  ;;  %v5463_v49 = vrot.slane %v13405_v3, 4  ;;  %v11926_v5 = vld [vmem:[#allocation9 + $0x130] sm:$0xff]   ;;  %v11929_v3 = vld [vmem:[#allocation9 + $0x1c0] sm:$0xff]  }
 0x31b   : > { %10651 = vmatprep.subr.bf16.mxu0 %v11909_v41  ;;  %v13553_v38 = vsel %vm1212_vm1, %v5450_v39, %v5451_v12  ;;  %v11928_v12 = vld [vmem:[#allocation9 + $0x138] sm:$0xff]   ;;  %v11938_v15 = vld [vmem:[#allocation9 + $0x1e0] sm:$0xff]  }
 0x31c   : > { %10938 = vmatpush3.bf16.msra.mxu1 %v11908_v42  ;;  %v7565_v42 = vrot.slane %v13539_v11, 4  ;;  %v13585_v19 = vsel %vm1212_vm1, %v5456_v55, %v5457_v13  ;;  %v13609_v39 = vsel %vm1212_vm1, %v5462_v37, %v5463_v49  ;;  %v11941_v55 = vld [vmem:[#allocation9 + $0x1f0] sm:$0xff]   ;;  %v13631_v13 = vld [vmem:[#allocation3 + $0x100] sm:$0xf0]  ;;  %v8131_v37 = vld [vmem:[#allocation3 + $0x88] sm:$0x1f] }
 0x31d   : > { %10636 = vmatmul.mubr.bf16.gmra.mrb[28].mxu0 %v5235_v33  ;;  %10939 = vmatprep.subr.bf16.mxu1 %v11910_v51  ;;  %v5459_v33 = vrot.slane %v13565_v46, 4  ;;  %v11948_v49 = vld [vmem:[#allocation9 + $0x88] sm:$0xff]  }
 0x31e   : > { %10652 = vmatpush3.bf16.msra.mxu0 %v11909_v41  ;;  %10655 = vmatprep.mubr.bf16.mxu0 %v5443_v56  ;;  %v7566_v41 = vrot.slane %v13348_v1, 4  ;;  %v11922_v56 = vld [vmem:[#allocation9 + $0x120] sm:$0xff]  }
 0x31f   : > { %10924 = vmatmul.mubr.bf16.gmra.mrb[28].mxu1 %v7351_v32  ;;  %10653 = vmatprep.subr.bf16.mxu0 %v11911_v54  ;;  %v5460_v32 = vrot.slane %v13391_v62, 4 }
 0x320   : > { %10940 = vmatpush3.bf16.msra.mxu1 %v11910_v51  ;;  %10943 = vmatprep.mubr.bf16.mxu1 %v7558_v14  ;;  %v13562_v1 = vsel %vm1212_vm1, %v7565_v42, %v7566_v41  ;;  %v13571_v51 = vld [vmem:[#allocation3 + $0xd0] sm:$0xf0]  ;;  %v7572_v14 = vrot.slane %v13382_v35, 4  ;;  %v11935_v42 = vld [vmem:[#allocation9 + $0x1d8] sm:$0xff]  }
 0x321   : > { %10941 = vmatprep.subr.bf16.mxu1 %v11912_v52  ;;  %v13589_v62 = vsel %vm1212_vm1, %v5459_v33, %v5460_v32  ;;  %v11936_v41 = vld [vmem:[#allocation9 + $0x1d8] sm:$0xff]   ;;  %v5654_v33 = vrot.slane %v13423_v10, 4  ;;  %v11942_v32 = vld [vmem:[#allocation9 + $0x1f0] sm:$0xff]   ;;  %v11945_v10 = vld [vmem:[#allocation9 + $0x80] sm:$0xff]  }
 0x322   : > { %10654 = vmatpush3.bf16.msra.mxu0 %v11911_v54  ;;  %v13576_v54 = vld [vmem:[#allocation3 + $0xe0] sm:$0xf0] }
 0x323   : > { %10671 = vmatprep.subr.bf16.mxu0 %v11913_v18 }
 0x324   : > { %10942 = vmatpush3.bf16.msra.mxu1 %v11912_v52  ;;  %v7571_v52 = vrot.slane %v13571_v51, 4 }
 0x325   : > { %10656 = vmatmul.mubr.bf16.vlgmr.msra.gmra.mrb[16].mxu0 %v13521_v59  ;;  %10959 = vmatprep.subr.bf16.mxu1 %v11914_v27 }
 0x326   : > { %10659 = vmatprep.mubr.bf16.mxu0 %v13525_v8  ;;  %10672 = vmatpush3.bf16.msra.mxu0 %v11913_v18  ;;  %v7574_v18 = vrot.slane %v13576_v54, 4  ;;  %v13594_v35 = vsel %vm1212_vm1, %v7571_v52, %v7572_v14  ;;  %v7767_v52 = vrot.slane %v13631_v13, 4  ;;  %v7768_v14 = vrot.slane %v13431_v48, 4  ;;  %v11946_v48 = vld [vmem:[#allocation9 + $0x80] sm:$0xff]  }
 0x327   : > { %10944 = vmatmul.mubr.bf16.vlgmr.msra.gmra.mrb[16].mxu1 %v13530_v29  ;;  %10673 = vmatprep.subr.bf16.mxu0 %v11915_v45 }
 0x328   : > { %10947 = vmatprep.mubr.bf16.mxu1 %v13537_v31  ;;  %10960 = vmatpush3.bf16.msra.mxu1 %v11914_v27  ;;  %v11924_v27 = vld [vmem:[#allocation9 + $0x128] sm:$0xff]   ;;  %v13599_v61 = vsel %vm1212_vm1, %v7574_v18, %v7575_v24  ;;  %v11943_v18 = vld [vmem:[#allocation9 + $0x1f8] sm:$0xff]  }
 0x329   : > { %10961 = vmatprep.subr.bf16.mxu1 %v11916_v22 }
 0x32a   : > { %10674 = vmatpush3.bf16.msra.mxu0 %v11915_v45  ;;  %v7577_v45 = vrot.slane %v13601_v60, 4 }
 0x32b   : > { %10675 = vmatprep.subr.bf16.mxu0 %v11917_v21 }
 0x32c   : > { %10962 = vmatpush3.bf16.msra.mxu1 %v11916_v22  ;;  %v7578_v22 = vrot.slane %v13414_v50, 4  ;;  %v11930_v50 = vld [vmem:[#allocation9 + $0x1c0] sm:$0xff]  }
 0x32d   : > { %10660 = vmatmul.mubr.bf16.gmra.mrb[20].mxu0 %v13553_v38  ;;  %10963 = vmatprep.subr.bf16.mxu1 %v11918_v43 }
 0x32e   : > { %10663 = vmatprep.mubr.bf16.mxu0 %v13557_v30  ;;  %10676 = vmatpush3.bf16.msra.mxu0 %v11917_v21  ;;  %v11927_v21 = vld [vmem:[#allocation9 + $0x138] sm:$0xff]  }
 0x32f   : > { %10948 = vmatmul.mubr.bf16.gmra.mrb[20].mxu1 %v13562_v1  ;;  %10677 = vmatprep.subr.bf16.mxu0 %v11919_v6 }
 0x330   : > { %10951 = vmatprep.mubr.bf16.mxu1 %v13569_v9  ;;  %10964 = vmatpush3.bf16.msra.mxu1 %v11918_v43  ;;  %v13613_v43 = vsel %vm1212_vm1, %v7577_v45, %v7578_v22  ;;  %v8150_v45 = vshrl.u32 %v8131_v37, 16  ;;  %v13654_v22 = vld [vmem:[#allocation3 + $0x90] sm:$0xf0] }
 0x331   : > { %10965 = vmatprep.subr.bf16.mxu1 %v11920_v23 }
 0x332   : > { %10678 = vmatpush3.bf16.msra.mxu0 %v11919_v6  ;;  %v11939_v6 = vld [vmem:[#allocation9 + $0x1e8] sm:$0xff]  }
 0x333   : > { %10679 = vmatprep.subr.bf16.mxu0 %v11921_v4 }
 0x334   : > { %10966 = vmatpush3.bf16.msra.mxu1 %v11920_v23  ;;  %v11940_v23 = vld [vmem:[#allocation9 + $0x1e8] sm:$0xff]  }
 0x335   : > { %10664 = vmatmul.mubr.bf16.gmra.mrb[24].mxu0 %v13585_v19  ;;  %10967 = vmatprep.subr.bf16.mxu1 %v11922_v56 }
 0x336   : > { %10667 = vmatprep.mubr.bf16.mxu0 %v13589_v62  ;;  %10680 = vmatpush3.bf16.msra.mxu0 %v11921_v4  ;;  %v13627_v4 = vld [vmem:[#allocation3 + $0x80] sm:$0xf0] }
 0x337   : > { %10952 = vmatmul.mubr.bf16.gmra.mrb[24].mxu1 %v13594_v35  ;;  %10681 = vmatprep.subr.bf16.mxu0 %v11923_v47 }
 0x338   : > { %10955 = vmatprep.mubr.bf16.mxu1 %v13599_v61  ;;  %10968 = vmatpush3.bf16.msra.mxu1 %v11922_v56  ;;  %v5653_v56 = vrot.slane %v13627_v4, 4 }
 0x339   : > { %10969 = vmatprep.subr.bf16.mxu1 %v11924_v27 }
 0x33a   : > { %10682 = vmatpush3.bf16.msra.mxu0 %v11923_v47  ;;  %v13639_v24 = vsel %vm1212_vm1, %v5653_v56, %v5654_v33  ;;  %v11944_v47 = vld [vmem:[#allocation9 + $0x1f8] sm:$0xff]   ;;  %v6064_v56 = vshrl.u32 %v13505_v57, 16 }
 0x33b   : > { %10683 = vmatprep.subr.bf16.mxu0 %v11925_v28 }
 0x33c   : > { %10970 = vmatpush3.bf16.msra.mxu1 %v11924_v27  ;;  %v13643_v27 = vsel %vm1212_vm1, %v7767_v52, %v7768_v14  ;;  %v6021_v52 = vld [vmem:[#allocation3 + $0x28] sm:$0x1f]  ;;  %v6030_v14 = vshrl.u32 %v13489_v36, 16 }
 0x33d   : > { %10668 = vmatmul.mubr.bf16.gmra.mrb[28].mxu0 %v13609_v39  ;;  %10971 = vmatprep.subr.bf16.mxu1 %v11926_v5 }
 0x33e   : > { %10684 = vmatpush3.bf16.msra.mxu0 %v11925_v28  ;;  %10687 = vmatprep.mubr.bf16.mxu0 %v13521_v59  ;;  %v11933_v59 = vld [vmem:[#allocation9 + $0x1d0] sm:$0xff]   ;;  %v11947_v28 = vld [vmem:[#allocation9 + $0x88] sm:$0xff]  }
 0x33f   : > { %10956 = vmatmul.mubr.bf16.gmra.mrb[28].mxu1 %v13613_v43  ;;  %10685 = vmatprep.subr.bf16.mxu0 %v11927_v21 }
 0x340   : > { %10972 = vmatpush3.bf16.msra.mxu1 %v11926_v5  ;;  %10975 = vmatprep.mubr.bf16.mxu1 %v13530_v29  ;;  %v11934_v29 = vld [vmem:[#allocation9 + $0x1d0] sm:$0xff]   ;;  %v8145_v5 = vshll.u32 %v13496_v26, 16 }
 0x341   : > { %10973 = vmatprep.subr.bf16.mxu1 %v11928_v12 }
 0x342   : > { %10686 = vmatpush3.bf16.msra.mxu0 %v11927_v21  ;;  %v11950_v21 = vld [vmem:[#allocation9 + $0x90] sm:$0xff]  }
 0x343   : > { %10703 = vmatprep.subr.bf16.mxu0 %v11929_v3 }
 0x344   : > { %10974 = vmatpush3.bf16.msra.mxu1 %v11928_v12  ;;  %v6020_v12 = vld [vmem:[#allocation3 + $0x18] sm:$0x1f] }
 0x345   : > { %10688 = vmatmul.mubr.bf16.vlgmr.msra.gmra.mrb[16].mxu0 %v13525_v8  ;;  %10991 = vmatprep.subr.bf16.mxu1 %v11930_v50 }
 0x346   : > { %10691 = vmatprep.mubr.bf16.mxu0 %v13553_v38  ;;  %10704 = vmatpush3.bf16.msra.mxu0 %v11929_v3  ;;  %v13658_v3 = vrot.slane %v8145_v5, 5  ;;  %v6072_v5 = vshrl.u32 %v6021_v52, 16 }
 0x347   : > { %10976 = vmatmul.mubr.bf16.vlgmr.msra.gmra.mrb[16].mxu1 %v13537_v31  ;;  %10705 = vmatprep.subr.bf16.mxu0 %v11931_v20 }
 0x348   : > { %10979 = vmatprep.mubr.bf16.mxu1 %v13562_v1  ;;  %10992 = vmatpush3.bf16.msra.mxu1 %v11930_v50  ;;  %v8132_v50 = vld [vmem:[#allocation3 + $0x98] sm:$0x1f] }
 0x349   : > { %10993 = vmatprep.subr.bf16.mxu1 %v11932_v16 }
 0x34a   : > { %10706 = vmatpush3.bf16.msra.mxu0 %v11931_v20  ;;  %v11951_v20 = vld [vmem:[#allocation9 + $0x98] sm:$0xff]  }
 0x34b   : > { %10707 = vmatprep.subr.bf16.mxu0 %v11933_v59 }
 0x34c   : > { %10994 = vmatpush3.bf16.msra.mxu1 %v11932_v16  ;;  %v5838_v16 = vrot.slane %v13478_v17, 4 }
 0x34d   : > { %10692 = vmatmul.mubr.bf16.gmra.mrb[20].mxu0 %v13557_v30  ;;  %10995 = vmatprep.subr.bf16.mxu1 %v11934_v29 }
 0x34e   : > { %10695 = vmatprep.mubr.bf16.mxu0 %v13585_v19  ;;  %10708 = vmatpush3.bf16.msra.mxu0 %v11933_v59  ;;  %v8152_v59 = vrot.slane %v8150_v45, 4  ;;  %v8133_v45 = vld [vmem:[#allocation3 + $0xa8] sm:$0x1f] }
 0x34f   : > { %10980 = vmatmul.mubr.bf16.gmra.mrb[20].mxu1 %v13569_v9  ;;  %10709 = vmatprep.subr.bf16.mxu0 %v11935_v42 }
 0x350   : > { %10983 = vmatprep.mubr.bf16.mxu1 %v13594_v35  ;;  %10996 = vmatpush3.bf16.msra.mxu1 %v11934_v29 }
 0x351   : > { %10997 = vmatprep.subr.bf16.mxu1 %v11936_v41 }
 0x352   : > { %10710 = vmatpush3.bf16.msra.mxu0 %v11935_v42  ;;  %v6019_v42 = vld [vmem:[#allocation3 + $0x8] sm:$0x1f] }
 0x353   : > { %10711 = vmatprep.subr.bf16.mxu0 %v11937_v63 }
 0x354   : > { %10998 = vmatpush3.bf16.msra.mxu1 %v11936_v41  ;;  %v6055_v41 = vshrl.u32 %v6020_v12, 16 }
 0x355   : > { %10696 = vmatmul.mubr.bf16.gmra.mrb[24].mxu0 %v13589_v62  ;;  %10999 = vmatprep.subr.bf16.mxu1 %v11938_v15 }
 0x356   : > { %10699 = vmatprep.mubr.bf16.mxu0 %v13609_v39  ;;  %10712 = vmatpush3.bf16.msra.mxu0 %v11937_v63  ;;  %v6058_v63 = vshll.u32 %v6020_v12, 16  ;;  %v6032_v12 = vrot.slane %v6030_v14, 4  ;;  %v11958_v14 = vld [vmem:[#allocation9 + $0xb0] sm:$0xff]  }
 0x357   : > { %10984 = vmatmul.mubr.bf16.gmra.mrb[24].mxu1 %v13599_v61  ;;  %10713 = vmatprep.subr.bf16.mxu0 %v11939_v6 }
 0x358   : > { %10987 = vmatprep.mubr.bf16.mxu1 %v13613_v43  ;;  %11000 = vmatpush3.bf16.msra.mxu1 %v11938_v15  ;;  %v8159_v15 = vshrl.u32 %v13508_v0, 16 }
 0x359   : > { %11001 = vmatprep.subr.bf16.mxu1 %v11940_v23 }
 0x35a   : > { %10714 = vmatpush3.bf16.msra.mxu0 %v11939_v6  ;;  %v11952_v6 = vld [vmem:[#allocation9 + $0x98] sm:$0xff]  }
 0x35b   : > { %10715 = vmatprep.subr.bf16.mxu0 %v11941_v55 }
 0x35c   : > { %11002 = vmatpush3.bf16.msra.mxu1 %v11940_v23  ;;  %v8167_v23 = vshrl.u32 %v8132_v50, 16 }
 0x35d   : > { %10700 = vmatmul.mubr.bf16.gmra.mrb[28].mxu0 %v13639_v24  ;;  %11003 = vmatprep.subr.bf16.mxu1 %v11942_v32 }
 0x35e   : > { %10716 = vmatpush3.bf16.msra.mxu0 %v11941_v55  ;;  %10719 = vmatprep.mubr.bf16.mxu0 %v13525_v8  ;;  %v8142_v8 = vshrl.u32 %v13496_v26, 16  ;;  %v6047_v26 = vshrl.u32 %v13503_v40, 16  ;;  %v8170_v55 = vshll.u32 %v8132_v50, 16 }
 0x35f   : > { %10988 = vmatmul.mubr.bf16.gmra.mrb[28].mxu1 %v13643_v27  ;;  %10717 = vmatprep.subr.bf16.mxu0 %v11943_v18 }
 0x360   : > { %11004 = vmatpush3.bf16.msra.mxu1 %v11942_v32  ;;  %11007 = vmatprep.mubr.bf16.mxu1 %v13537_v31  ;;  %v11949_v31 = vld [vmem:[#allocation9 + $0x90] sm:$0xff]   ;;  %v13671_v33 = vrot.slane %v6047_v26, 4 }
 0x361   : > { %11005 = vmatprep.subr.bf16.mxu1 %v11944_v47 }
 0x362   : > { %10718 = vmatpush3.bf16.msra.mxu0 %v11943_v18  ;;  %v6033_v18 = vshll.u32 %v13489_v36, 16  ;;  %v13692_v36 = vrot.slane %v6064_v56, 4 }
 0x363   : > { %10735 = vmatprep.subr.bf16.mxu0 %v11945_v10 }
 0x364   : > { %11006 = vmatpush3.bf16.msra.mxu1 %v11944_v47  ;;  %v6041_v47 = vshll.u32 %v6019_v42, 16 }
 0x365   : > { %10720 = vmatmul.mubr.bf16.vlgmr.msra.gmra.mrb[16].mxu0 %v13553_v38  ;;  %11023 = vmatprep.subr.bf16.mxu1 %v11946_v48  ;;  %v8153_v38 = vshll.u32 %v8131_v37, 16  ;;  %v13684_v37 = vrot.slane %v8159_v15, 4  ;;  %v8184_v15 = vshrl.u32 %v8133_v45, 16 }
 0x366   : > { %10723 = vmatprep.mubr.bf16.mxu0 %v13557_v30  ;;  %10736 = vmatpush3.bf16.msra.mxu0 %v11945_v10  ;;  %v13656_v30 = vrot.slane %v8142_v8, 4  ;;  %v13690_v8 = vrot.slane %v8170_v55, 5  ;;  %v6043_v26 = vrot.slane %v6041_v47, 5 }
 0x367   : > { %11008 = vmatmul.mubr.bf16.vlgmr.msra.gmra.mrb[16].mxu1 %v13562_v1  ;;  %10737 = vmatprep.subr.bf16.mxu0 %v11947_v28  ;;  %v6050_v1 = vshll.u32 %v13503_v40, 16  ;;  %v8155_v29 = vrot.slane %v8153_v38, 5  ;;  %v8162_v40 = vshll.u32 %v13508_v0, 16  ;;  %v11953_v0 = vld [vmem:[#allocation9 + $0xa0] sm:$0xff]   ;;  %v8176_v38 = vshrl.u32 %v13512_v53, 16 }
 0x368   : > { %11011 = vmatprep.mubr.bf16.mxu1 %v13569_v9  ;;  %11024 = vmatpush3.bf16.msra.mxu1 %v11946_v48  ;;  %v5837_v9 = vrot.slane %v13654_v22, 4  ;;  %v8148_v17 = vor.u32 %v13658_v3, %v13656_v30  ;;  %v13680_v48 = vrot.slane %v6055_v41, 4  ;;  %v6035_v30 = vrot.slane %v6033_v18, 5 }
 0x369   : > { %11025 = vmatprep.subr.bf16.mxu1 %v11948_v49  ;;  %v13673_v32 = vrot.slane %v6050_v1, 5  ;;  %v8156_v10 = vor.u32 %v8155_v29, %v8152_v59  ;;  %v11956_v59 = vld [vmem:[#allocation9 + $0xa8] sm:$0xff]   ;;  %v13704_v29 = vld [vmem:[#allocation3 + $0x110] sm:$0xf0]  ;;  %v6084_v18 = vshll.u32 %v13527_v2, 16 }
 0x36a   : > { %10738 = vmatpush3.bf16.msra.mxu0 %v11947_v28  ;;  %v13682_v28 = vrot.slane %v6058_v63, 5  ;;  %v5839_v1 = vsel %vm1212_vm1, %v5837_v9, %v5838_v16  ;;  %v8179_v63 = vshll.u32 %v13512_v53, 16  ;;  %v7951_v53 = vrot.slane %v13480_v34, 4  ;;  %v11959_v34 = vld [vmem:[#allocation9 + $0xb8] sm:$0xff]  }
 0x36b   : > { %10739 = vmatprep.subr.bf16.mxu0 %v11949_v31  ;;  %v13699_v50 = vsel %vm1801_vm2, %v8148_v17, %v8156_v10  ;;  %v13721_v17 = vrot.slane %v8176_v38, 4  ;;  %v8193_v10 = vshrl.u32 %v13539_v11, 16  ;;  %v6101_v38 = vshll.u32 %v13533_v7, 16 }
 0x36c   : > { %11026 = vmatpush3.bf16.msra.mxu1 %v11948_v49  ;;  %v13688_v49 = vrot.slane %v8167_v23, 4  ;;  %v6036_v23 = vor.u32 %v6035_v30, %v6032_v12 }
 0x36d   : > { %10724 = vmatmul.mubr.bf16.gmra.mrb[20].mxu0 %v13585_v19  ;;  %11027 = vmatprep.subr.bf16.mxu1 %v11950_v21  ;;  %v6067_v19 = vshll.u32 %v13505_v57, 16  ;;  %v11954_v57 = vld [vmem:[#allocation9 + $0xa0] sm:$0xff]  }
 0x36e   : > { %10727 = vmatprep.mubr.bf16.mxu0 %v13589_v62  ;;  %10740 = vmatpush3.bf16.msra.mxu0 %v11949_v31  ;;  %v6038_v62 = vshrl.u32 %v6019_v42, 16  ;;  %v6075_v31 = vshll.u32 %v6021_v52, 16  ;;  %v6061_v42 = vor.u32 %v13682_v28, %v13680_v48  ;;  %v7950_v52 = vrot.slane %v13704_v29, 4 }
 0x36f   : > { %11012 = vmatmul.mubr.bf16.gmra.mrb[20].mxu1 %v13594_v35  ;;  %10741 = vmatprep.subr.bf16.mxu0 %v11951_v20  ;;  %v13686_v35 = vrot.slane %v8162_v40, 5  ;;  %v11957_v40 = vld [vmem:[#allocation9 + $0xb0] sm:$0xff]  }
 0x370   : > { %11015 = vmatprep.mubr.bf16.mxu1 %v13599_v61  ;;  %11028 = vmatpush3.bf16.msra.mxu1 %v11950_v21  ;;  %v13694_v61 = vrot.slane %v6067_v19, 5  ;;  %v11955_v21 = vld [vmem:[#allocation9 + $0xa8] sm:$0xff]   ;;  %v6040_v3 = vrot.slane %v6038_v62, 4  ;;  %v13719_v56 = vrot.slane %v6075_v31, 5  ;;  %v8187_v19 = vshll.u32 %v8133_v45, 16 }
 0x371   : > { %11029 = vmatprep.subr.bf16.mxu1 %v11952_v6  ;;  %v6098_v31 = vshrl.u32 %v13533_v7, 16 }
 0x372   : > { %10742 = vmatpush3.bf16.msra.mxu0 %v11951_v20  ;;  %v6053_v20 = vor.u32 %v13673_v32, %v13671_v33  ;;  %v6044_v55 = vor.u32 %v6043_v26, %v6040_v3  ;;  %v8181_v3 = vrot.slane %v8179_v63, 5  ;;  %v8186_v26 = vrot.slane %v8184_v15, 4  ;;  %v11964_v32 = vld [vmem:[#allocation9 + $0x148] sm:$0xff]  }
 0x373   : > { %10743 = vmatprep.subr.bf16.mxu0 %v11953_v0  ;;  %v6100_v63 = vrot.slane %v6098_v31, 4  ;;  %v6103_v15 = vrot.slane %v6101_v38, 5 }
 0x374   : > { %11030 = vmatpush3.bf16.msra.mxu1 %v11952_v6  ;;  %v6022_v6 = vld [vmem:[#allocation3 + $0x38] sm:$0x1f]  ;;  %v6045_v45 = vsel %vm1801_vm2, %v6036_v23, %v6044_v55  ;;  %v8195_v23 = vrot.slane %v8193_v10, 4  ;;  %v8213_v10 = vshll.u32 %v13544_v58, 16 }
 0x375   : > { %10728 = vmatmul.mubr.bf16.gmra.mrb[24].mxu0 %v13609_v39  ;;  %11031 = vmatprep.subr.bf16.mxu1 %v11954_v57  ;;  %v13715_v39 = vrot.slane %v6072_v5, 4  ;;  %v6089_v62 = vshrl.u32 %v6022_v6, 16  ;;  %v6092_v47 = vshll.u32 %v6022_v6, 16  ;;  %v6104_v31 = vor.u32 %v6103_v15, %v6100_v63 }
 0x376   : > { %10731 = vmatprep.mubr.bf16.mxu0 %v13639_v24  ;;  %10744 = vmatpush3.bf16.msra.mxu0 %v11953_v0  ;;  %v8134_v24 = vld [vmem:[#allocation3 + $0xb8] sm:$0x1f]  ;;  %v6081_v0 = vshrl.u32 %v13527_v2, 16  ;;  %v7952_v2 = vsel %vm1212_vm1, %v7950_v52, %v7951_v53 }
 0x377   : > { %11016 = vmatmul.mubr.bf16.gmra.mrb[24].mxu1 %v13613_v43  ;;  %10745 = vmatprep.subr.bf16.mxu0 %v11955_v21  ;;  %v6023_v43 = vld [vmem:[#allocation3 + $0x48] sm:$0x1f]  ;;  %v8204_v5 = vshll.u32 %v8134_v24, 16  ;;  %v6091_v16 = vrot.slane %v6089_v62, 4  ;;  %v6094_v41 = vrot.slane %v6092_v47, 5  ;;  %v6078_v53 = vor.u32 %v13719_v56, %v13715_v39 }
 0x378   : > { %11019 = vmatprep.mubr.bf16.mxu1 %v13643_v27  ;;  %11032 = vmatpush3.bf16.msra.mxu1 %v11954_v57  ;;  %v8196_v27 = vshll.u32 %v13539_v11, 16  ;;  %v8201_v57 = vshrl.u32 %v8134_v24, 16  ;;  %v6106_v12 = vshrl.u32 %v6023_v43, 16  ;;  %v6109_v30 = vshll.u32 %v6023_v43, 16  ;;  %v11960_v11 = vld [vmem:[#allocation9 + $0xb8] sm:$0xff]  }
 0x379   : > { %11033 = vmatprep.subr.bf16.mxu1 %v11956_v59  ;;  %v6083_v6 = vrot.slane %v6081_v0, 4  ;;  %v6086_v24 = vrot.slane %v6084_v18, 5  ;;  %v8206_v9 = vrot.slane %v8204_v5, 5  ;;  %v8135_v43 = vld [vmem:[#allocation3 + $0xc8] sm:$0x1f]  ;;  %v11962_v0 = vld [vmem:[#allocation9 + $0x140] sm:$0xff]   ;;  %v6095_v62 = vor.u32 %v6094_v41, %v6091_v16 }
 0x37a   : > { %10746 = vmatpush3.bf16.msra.mxu0 %v11955_v21  ;;  %v8189_v21 = vrot.slane %v8187_v19, 5  ;;  %v8198_v55 = vrot.slane %v8196_v27, 5  ;;  %v8203_v7 = vrot.slane %v8201_v57, 4  ;;  %v6108_v52 = vrot.slane %v6106_v12, 4  ;;  %v6024_v56 = vld [vmem:[#allocation3 + $0x58] sm:$0x1f] }
 0x37b   : > { %10747 = vmatprep.subr.bf16.mxu0 %v11957_v40  ;;  %v6087_v18 = vor.u32 %v6086_v24, %v6083_v6  ;;  %v8210_v47 = vshrl.u32 %v13544_v58, 16  ;;  %v8221_v5 = vshll.u32 %v8135_v43, 16  ;;  %v13749_v58 = vsel %vm1801_vm2, %v6053_v20, %v6061_v42  ;;  %v6025_v42 = vld [vmem:[#allocation3 + $0x68] sm:$0x1f]  ;;  %v11966_v24 = vld [vmem:[#allocation9 + $0x150] sm:$0xff]  }
 0x37c   : > { %11034 = vmatpush3.bf16.msra.mxu1 %v11956_v59  ;;  %v11961_v59 = vld [vmem:[#allocation9 + $0x140] sm:$0xff]   ;;  %v8190_v19 = vor.u32 %v8189_v21, %v8186_v26  ;;  %v8199_v27 = vor.u32 %v8198_v55, %v8195_v23  ;;  %v8207_v57 = vor.u32 %v8206_v9, %v8203_v7  ;;  %v14126_v41 = vor.u32 %v13690_v8, %v13688_v49  ;;  %v8136_v49 = vld [vmem:[#allocation3 + $0xd8] sm:$0x1f]  ;;  %v8137_v6 = vld [vmem:[#allocation3 + $0xe8] sm:$0x1f] }
 0x37d   : > { %10732 = vmatmul.mubr.bf16.gmra.mrb[28].mxu0 %v5839_v1  ;;  %11035 = vmatprep.subr.bf16.mxu1 %v11958_v14  ;;  %v6111_v1 = vrot.slane %v6109_v30, 5  ;;  %v14127_v9 = vor.u32 %v13686_v35, %v13684_v37  ;;  %v13771_v28 = vsel %vm1801_vm2, %v6087_v18, %v6095_v62  ;;  %v8212_v37 = vrot.slane %v8210_v47, 4  ;;  %v6026_v47 = vld [vmem:[#allocation3 + $0x78] sm:$0x1f] }
 0x37e   : > { %10748 = vmatpush3.bf16.msra.mxu0 %v11957_v40  ;;  %10751 = vmatprep.mubr.bf16.mxu0 %v6045_v45  ;;  %v8182_v40 = vor.u32 %v8181_v3, %v13721_v17  ;;  %v6115_v17 = vshrl.u32 %v13559_v25, 16  ;;  %v6118_v45 = vshll.u32 %v13559_v25, 16  ;;  %v14128_v25 = vor.u32 %v13694_v61, %v13692_v36 }
 0x37f   : > { %11020 = vmatmul.mubr.bf16.gmra.mrb[28].mxu1 %v7952_v2  ;;  %10749 = vmatprep.subr.bf16.mxu0 %v11959_v34  ;;  %v6112_v39 = vor.u32 %v6111_v1, %v6108_v52  ;;  %v13758_v16 = vsel %vm1801_vm2, %v14127_v9, %v14126_v41  ;;  %v8215_v35 = vrot.slane %v8213_v10, 5  ;;  %v8223_v36 = vrot.slane %v8221_v5, 5  ;;  %v11967_v1 = vld [vmem:[#allocation9 + $0x158] sm:$0xff]  }
 0x380   : > { %11036 = vmatpush3.bf16.msra.mxu1 %v11958_v14  ;;  %11039 = vmatprep.mubr.bf16.mxu1 %v13699_v50  ;;  %v8218_v14 = vshrl.u32 %v8135_v43, 16  ;;  %v11963_v50 = vld [vmem:[#allocation9 + $0x148] sm:$0xff]   ;;  %v13764_v48 = vsel %vm1801_vm2, %v14128_v25, %v6078_v53  ;;  %v13768_v33 = vsel %vm1801_vm2, %v8182_v40, %v8190_v19  ;;  %v6123_v61 = vshrl.u32 %v6024_v56, 16  ;;  %v11968_v10 = vld [vmem:[#allocation9 + $0x158] sm:$0xff]  }
 0x381   : > { %11037 = vmatprep.subr.bf16.mxu1 %v11960_v11  ;;  %v6126_v20 = vshll.u32 %v6024_v56, 16  ;;  %v13776_v38 = vsel %vm1801_vm2, %v8199_v27, %v8207_v57  ;;  %v13779_v12 = vsel %vm1801_vm2, %v6104_v31, %v6112_v39  ;;  %v13781_v30 = vrot.slane %v6115_v17, 4  ;;  %v8138_v39 = vld [vmem:[#allocation3 + $0xf8] sm:$0x1f]  ;;  %v11969_v56 = vld [vmem:[#allocation9 + $0x160] sm:$0xff]  }
 0x382   : > { %10750 = vmatpush3.bf16.msra.mxu0 %v11959_v34  ;;  %v8220_v8 = vrot.slane %v8218_v14, 4  ;;  %v11965_v34 = vld [vmem:[#allocation9 + $0x150] sm:$0xff]   ;;  %v13783_v2 = vrot.slane %v6118_v45, 5  ;;  %v8227_v3 = vshrl.u32 %v13571_v51, 16  ;;  %v8230_v26 = vshll.u32 %v13571_v51, 16 }
 0x383   : > { %10767 = vmatprep.subr.bf16.mxu0 %v11961_v59  ;;  %v8235_v21 = vshrl.u32 %v8136_v49, 16  ;;  %v6132_v23 = vshrl.u32 %v13565_v46, 16  ;;  %v6135_v55 = vshll.u32 %v13565_v46, 16  ;;  %v6140_v7 = vshrl.u32 %v6025_v42, 16 }
 0x384   : > { %11038 = vmatpush3.bf16.msra.mxu1 %v11960_v11  ;;  %v8238_v11 = vshll.u32 %v8136_v49, 16  ;;  %v6143_v43 = vshll.u32 %v6025_v42, 16  ;;  %v8224_v63 = vor.u32 %v8223_v36, %v8220_v8  ;;  %v6125_v15 = vrot.slane %v6123_v61, 4  ;;  %v11970_v36 = vld [vmem:[#allocation9 + $0x160] sm:$0xff]  }
 0x385   : > { %10752 = vmatmul.mubr.bf16.vlgmr.msra.gmra.mrb[16].mxu0 %v13749_v58  ;;  %11055 = vmatprep.subr.bf16.mxu1 %v11962_v0  ;;  %v6128_v52 = vrot.slane %v6126_v20, 5  ;;  %v8244_v51 = vshrl.u32 %v13576_v54, 16  ;;  %v8247_v53 = vshll.u32 %v13576_v54, 16  ;;  %v8252_v40 = vshrl.u32 %v8137_v6, 16 }
 0x386   : > { %10755 = vmatprep.mubr.bf16.mxu0 %v13764_v48  ;;  %10768 = vmatpush3.bf16.msra.mxu0 %v11961_v59  ;;  %v8216_v59 = vor.u32 %v8215_v35, %v8212_v37  ;;  %v8255_v19 = vshll.u32 %v8137_v6, 16  ;;  %v8232_v18 = vrot.slane %v8230_v26, 5  ;;  %v8237_v62 = vrot.slane %v8235_v21, 4  ;;  %v11971_v21 = vld [vmem:[#allocation9 + $0x168] sm:$0xff]  }
 0x387   : > { %11040 = vmatmul.mubr.bf16.vlgmr.msra.gmra.mrb[16].mxu1 %v13758_v16  ;;  %10769 = vmatprep.subr.bf16.mxu0 %v11963_v50  ;;  %v8240_v46 = vrot.slane %v8238_v11, 5  ;;  %v6134_v27 = vrot.slane %v6132_v23, 4  ;;  %v6137_v57 = vrot.slane %v6135_v55, 5  ;;  %v6142_v14 = vrot.slane %v6140_v7, 4  ;;  %v11972_v7 = vld [vmem:[#allocation9 + $0x168] sm:$0xff]  }
 0x388   : > { %11043 = vmatprep.mubr.bf16.mxu1 %v13768_v33  ;;  %11056 = vmatpush3.bf16.msra.mxu1 %v11962_v0  ;;  %v8229_v0 = vrot.slane %v8227_v3, 4  ;;  %v6145_v5 = vrot.slane %v6143_v43, 5  ;;  %v13795_v54 = vsel %vm1801_vm2, %v8216_v59, %v8224_v63  ;;  %v6129_v31 = vor.u32 %v6128_v52, %v6125_v15 }
 0x389   : > { %11057 = vmatprep.subr.bf16.mxu1 %v11964_v32  ;;  %v8246_v17 = vrot.slane %v8244_v51, 4  ;;  %v8249_v45 = vrot.slane %v8247_v53, 5  ;;  %v8254_v41 = vrot.slane %v8252_v40, 4  ;;  %v8257_v9 = vrot.slane %v8255_v19, 5  ;;  %v11974_v40 = vld [vmem:[#allocation9 + $0x170] sm:$0xff]  }
 0x38a   : > { %10770 = vmatpush3.bf16.msra.mxu0 %v11963_v50  ;;  %v6121_v50 = vor.u32 %v13783_v2, %v13781_v30  ;;  %v6149_v25 = vshrl.u32 %v13591_v44, 16  ;;  %v6157_v37 = vshrl.u32 %v6026_v47, 16  ;;  %v6160_v35 = vshll.u32 %v6026_v47, 16 }
 0x38b   : > { %10771 = vmatprep.subr.bf16.mxu0 %v11965_v34  ;;  %v8233_v49 = vor.u32 %v8232_v18, %v8229_v0  ;;  %v8241_v8 = vor.u32 %v8240_v46, %v8237_v62  ;;  %v6138_v61 = vor.u32 %v6137_v57, %v6134_v27  ;;  %v6146_v20 = vor.u32 %v6145_v5, %v6142_v14  ;;  %v11975_v18 = vld [vmem:[#allocation9 + $0x178] sm:$0xff]   ;;  %v11978_v27 = vld [vmem:[#allocation9 + $0x200] sm:$0xff]   ;;  %v11979_v57 = vld [vmem:[#allocation9 + $0x208] sm:$0xff]  }
 0x38c   : > { %11058 = vmatpush3.bf16.msra.mxu1 %v11964_v32  ;;  %v6152_v32 = vshll.u32 %v13591_v44, 16  ;;  %v8261_v42 = vshrl.u32 %v13601_v60, 16  ;;  %v8269_v30 = vshrl.u32 %v8138_v39, 16  ;;  %v8272_v2 = vshll.u32 %v8138_v39, 16  ;;  %v11976_v46 = vld [vmem:[#allocation9 + $0x178] sm:$0xff]   ;;  %v11980_v14 = vld [vmem:[#allocation9 + $0x208] sm:$0xff]  }
 0x38d   : > { %10756 = vmatmul.mubr.bf16.gmra.mrb[20].mxu0 %v13771_v28  ;;  %11059 = vmatprep.subr.bf16.mxu1 %v11966_v24  ;;  %v13806_v3 = vsel %vm1801_vm2, %v6121_v50, %v6129_v31  ;;  %v8250_v44 = vor.u32 %v8249_v45, %v8246_v17  ;;  %v8258_v26 = vor.u32 %v8257_v9, %v8254_v41  ;;  %v6151_v11 = vrot.slane %v6149_v25, 4  ;;  %v11983_v5 = vld [vmem:[#allocation9 + $0x218] sm:$0xff]   ;;  %v6027_v31 = vld [vmem:[#allocation3 + $0x88] sm:$0x1f]  ;;  %v11985_v39 = vld [vmem:[#allocation9 + $0x220] sm:$0xff]  }
 0x38e   : > { %10759 = vmatprep.mubr.bf16.mxu0 %v13779_v12  ;;  %10772 = vmatpush3.bf16.msra.mxu0 %v11965_v34  ;;  %v8264_v34 = vshll.u32 %v13601_v60, 16  ;;  %v6154_v6 = vrot.slane %v6152_v32, 5  ;;  %v6162_v23 = vrot.slane %v6160_v35, 5  ;;  %v13810_v55 = vsel %vm1801_vm2, %v8233_v49, %v8241_v8  ;;  %v11984_v50 = vld [vmem:[#allocation9 + $0x218] sm:$0xff]   ;;  %v11986_v25 = vld [vmem:[#allocation9 + $0x220] sm:$0xff]   ;;  %v11987_v8 = vld [vmem:[#allocation9 + $0x228] sm:$0xff]  }
 0x38f   : > { %11044 = vmatmul.mubr.bf16.gmra.mrb[20].mxu1 %v13776_v38  ;;  %10773 = vmatprep.subr.bf16.mxu0 %v11967_v1  ;;  %v13813_v60 = vsel %vm1801_vm2, %v6138_v61, %v6146_v20  ;;  %v8263_v43 = vrot.slane %v8261_v42, 4  ;;  %v8271_v63 = vrot.slane %v8269_v30, 4  ;;  %v8274_v15 = vrot.slane %v8272_v2, 5 }
 0x390   : > { %11047 = vmatprep.mubr.bf16.mxu1 %v13795_v54  ;;  %11060 = vmatpush3.bf16.msra.mxu1 %v11966_v24  ;;  %v6159_v24 = vrot.slane %v6157_v37, 4  ;;  %v8266_v59 = vrot.slane %v8264_v34, 5  ;;  %v13818_v52 = vsel %vm1801_vm2, %v8250_v44, %v8258_v26  ;;  %v6155_v51 = vor.u32 %v6154_v6, %v6151_v11  ;;  %v11989_v44 = vld [vmem:[#allocation9 + $0x230] sm:$0xff]  }
 0x391   : > { %11061 = vmatprep.subr.bf16.mxu1 %v11968_v10  ;;  %v8275_v0 = vor.u32 %v8274_v15, %v8271_v63  ;;  %v6352_v17 = vshrl.u32 %v13627_v4, 16  ;;  %v6355_v45 = vshll.u32 %v13627_v4, 16  ;;  %v6360_v41 = vshrl.u32 %v6027_v31, 16  ;;  %v11988_v4 = vld [vmem:[#allocation9 + $0x228] sm:$0xff]   ;;  %v11990_v11 = vld [vmem:[#allocation9 + $0x230] sm:$0xff]  }
 0x392   : > { %10774 = vmatpush3.bf16.msra.mxu0 %v11967_v1  ;;  %v11973_v1 = vld [vmem:[#allocation9 + $0x170] sm:$0xff]   ;;  %v6163_v53 = vor.u32 %v6162_v23, %v6159_v24  ;;  %v8267_v19 = vor.u32 %v8266_v59, %v8263_v43  ;;  %v6363_v9 = vshll.u32 %v6027_v31, 16  ;;  %v8463_v32 = vshrl.u32 %v13631_v13, 16  ;;  %v11991_v23 = vld [vmem:[#allocation9 + $0x238] sm:$0xff]  }
 0x393   : > { %10775 = vmatprep.subr.bf16.mxu0 %v11969_v56  ;;  %v8466_v37 = vshll.u32 %v13631_v13, 16  ;;  %v6357_v61 = vrot.slane %v6355_v45, 5  ;;  %v6362_v20 = vrot.slane %v6360_v41, 4  ;;  %v11992_v43 = vld [vmem:[#allocation9 + $0x238] sm:$0xff]   ;;  %v6551_v15 = vshll.u32 %v13654_v22, 16 }
 0x394   : > { %11062 = vmatpush3.bf16.msra.mxu1 %v11968_v10  ;;  %v13822_v62 = vsel %vm1801_vm2, %v6155_v51, %v6163_v53  ;;  %v13826_v47 = vsel %vm1801_vm2, %v8267_v19, %v8275_v0  ;;  %v11977_v10 = vld [vmem:[#allocation9 + $0x200] sm:$0xff]   ;;  %v6365_v42 = vrot.slane %v6363_v9, 5  ;;  %v8465_v34 = vrot.slane %v8463_v32, 4  ;;  %v6028_v63 = vld [vmem:[#allocation3 + $0x98] sm:$0x1f] }
 0x395   : > { %10760 = vmatmul.mubr.bf16.gmra.mrb[24].mxu0 %v13806_v3  ;;  %11063 = vmatprep.subr.bf16.mxu1 %v11970_v36  ;;  %v8468_v30 = vrot.slane %v8466_v37, 5  ;;  %v6553_v53 = vrot.slane %v6551_v15, 5  ;;  %v9352_v9 = vld [vmem:[%s12376_s6 + $0x80] sm:$0xff]  ;;  %v6767_v37 = vld [vmem:[%s12376_s6 + $0x8] sm:$0xff] }
 0x396   : > { %10763 = vmatprep.mubr.bf16.mxu0 %v13813_v60  ;;  %10776 = vmatpush3.bf16.msra.mxu0 %v11969_v56  ;;  %v8139_v56 = vld [vmem:[#allocation3 + $0x108] sm:$0x1f] }
 0x397   : > { %11048 = vmatmul.mubr.bf16.gmra.mrb[24].mxu1 %v13810_v55  ;;  %10777 = vmatprep.subr.bf16.mxu0 %v11971_v21  ;;  %v8471_v35 = vshrl.u32 %v8139_v56, 16  ;;  %v8474_v49 = vshll.u32 %v8139_v56, 16  ;;  %v8469_v6 = vor.u32 %v8468_v30, %v8465_v34  ;;  %v6769_v56 = vld [vmem:[%s12376_s6 + $0x18] sm:$0xff] }
 0x398   : > { %11051 = vmatprep.mubr.bf16.mxu1 %v13818_v52  ;;  %11064 = vmatpush3.bf16.msra.mxu1 %v11970_v36  ;;  %v6354_v36 = vrot.slane %v6352_v17, 4 }
 0x399   : > { %11065 = vmatprep.subr.bf16.mxu1 %v11972_v7  ;;  %v8473_v2 = vrot.slane %v8471_v35, 4  ;;  %v8476_v13 = vrot.slane %v8474_v49, 5 }
 0x39a   : > { %10778 = vmatpush3.bf16.msra.mxu0 %v11971_v21  ;;  %v6358_v26 = vor.u32 %v6357_v61, %v6354_v36  ;;  %v6366_v21 = vor.u32 %v6365_v42, %v6362_v20  ;;  %v9355_v36 = vld [vmem:[%s12376_s6 + $0x98] sm:$0xff] }
 0x39b   : > { %10779 = vmatprep.subr.bf16.mxu0 %v11973_v1  ;;  %v8477_v24 = vor.u32 %v8476_v13, %v8473_v2  ;;  %v9353_v2 = vld [vmem:[%s12376_s6 + $0x88] sm:$0xff] }
 0x39c   : > { %11066 = vmatpush3.bf16.msra.mxu1 %v11972_v7  ;;  %v6367_v7 = vsel %vm1801_vm2, %v6358_v26, %v6366_v21 }
 0x39d   : > { %10764 = vmatmul.mubr.bf16.gmra.mrb[28].mxu0 %v13822_v62  ;;  %11067 = vmatprep.subr.bf16.mxu1 %v11974_v40  ;;  %v8478_v59 = vsel %vm1801_vm2, %v8469_v6, %v8477_v24 }
 0x39e   : > { %10780 = vmatpush3.bf16.msra.mxu0 %v11973_v1  ;;  %10783 = vmatprep.mubr.bf16.mxu0 %v13749_v58  ;;  %v11981_v58 = vld [vmem:[#allocation9 + $0x210] sm:$0xff]   ;;  %v6556_v1 = vshrl.u32 %v6028_v63, 16 }
 0x39f   : > { %11052 = vmatmul.mubr.bf16.gmra.mrb[28].mxu1 %v13826_v47  ;;  %10781 = vmatprep.subr.bf16.mxu0 %v11975_v18 }
 0x3a0   : > { %11068 = vmatpush3.bf16.msra.mxu1 %v11974_v40  ;;  %11071 = vmatprep.mubr.bf16.mxu1 %v13758_v16  ;;  %v11982_v16 = vld [vmem:[#allocation9 + $0x210] sm:$0xff]   ;;  %v6558_v40 = vrot.slane %v6556_v1, 4  ;;  %v6770_v1 = vld [vmem:[%s12376_s6 + $0x20] sm:$0xff] }
 0x3a1   : > { %11069 = vmatprep.subr.bf16.mxu1 %v11976_v46 }
 0x3a2   : > { %10782 = vmatpush3.bf16.msra.mxu0 %v11975_v18 }
 0x3a3   : > { %10799 = vmatprep.subr.bf16.mxu0 %v11977_v10 }
 0x3a4   : > { %11070 = vmatpush3.bf16.msra.mxu1 %v11976_v46 }
 0x3a5   : > { %10784 = vmatmul.mubr.bf16.vlgmr.msra.gmra.mrb[16].mxu0 %v13764_v48  ;;  %11087 = vmatprep.subr.bf16.mxu1 %v11978_v27 }
 0x3a6   : > { %10787 = vmatprep.mubr.bf16.mxu0 %v13771_v28  ;;  %10800 = vmatpush3.bf16.msra.mxu0 %v11977_v10 }
 0x3a7   : > { %11072 = vmatmul.mubr.bf16.vlgmr.msra.gmra.mrb[16].mxu1 %v13768_v33  ;;  %10801 = vmatprep.subr.bf16.mxu0 %v11979_v57 }
 0x3a8   : > { %11075 = vmatprep.mubr.bf16.mxu1 %v13776_v38  ;;  %11088 = vmatpush3.bf16.msra.mxu1 %v11978_v27 }
 0x3a9   : > { %11089 = vmatprep.subr.bf16.mxu1 %v11980_v14 }
 0x3aa   : > { %10802 = vmatpush3.bf16.msra.mxu0 %v11979_v57  ;;  %v6768_v57 = vld [vmem:[%s12376_s6 + $0x10] sm:$0xff] }
 0x3ab   : > { %10803 = vmatprep.subr.bf16.mxu0 %v11981_v58 }
 0x3ac   : > { %11090 = vmatpush3.bf16.msra.mxu1 %v11980_v14 }
 0x3ad   : > { %10788 = vmatmul.mubr.bf16.gmra.mrb[20].mxu0 %v13779_v12  ;;  %11091 = vmatprep.subr.bf16.mxu1 %v11982_v16 }
 0x3ae   : > { %10791 = vmatprep.mubr.bf16.mxu0 %v13806_v3  ;;  %10804 = vmatpush3.bf16.msra.mxu0 %v11981_v58 }
 0x3af   : > { %11076 = vmatmul.mubr.bf16.gmra.mrb[20].mxu1 %v13795_v54  ;;  %10805 = vmatprep.subr.bf16.mxu0 %v11983_v5 }
 0x3b0   : > { %11079 = vmatprep.mubr.bf16.mxu1 %v13810_v55  ;;  %11092 = vmatpush3.bf16.msra.mxu1 %v11982_v16  ;;  %v6766_v16 = vld [vmem:[%s12376_s6] sm:$0xff] }
 0x3b1   : > { %11093 = vmatprep.subr.bf16.mxu1 %v11984_v50 }
 0x3b2   : > { %10806 = vmatpush3.bf16.msra.mxu0 %v11983_v5 }
 0x3b3   : > { %10807 = vmatprep.subr.bf16.mxu0 %v11985_v39 }
 0x3b4   : > { %11094 = vmatpush3.bf16.msra.mxu1 %v11984_v50  ;;  %v9354_v50 = vld [vmem:[%s12376_s6 + $0x90] sm:$0xff] }
 0x3b5   : > { %10792 = vmatmul.mubr.bf16.gmra.mrb[24].mxu0 %v13813_v60  ;;  %11095 = vmatprep.subr.bf16.mxu1 %v11986_v25 }
 0x3b6   : > { %10795 = vmatprep.mubr.bf16.mxu0 %v13822_v62  ;;  %10808 = vmatpush3.bf16.msra.mxu0 %v11985_v39 }
 0x3b7   : > { %11080 = vmatmul.mubr.bf16.gmra.mrb[24].mxu1 %v13818_v52  ;;  %10809 = vmatprep.subr.bf16.mxu0 %v11987_v8 }
 0x3b8   : > { %11083 = vmatprep.mubr.bf16.mxu1 %v13826_v47  ;;  %11096 = vmatpush3.bf16.msra.mxu1 %v11986_v25 }
 0x3b9   : > { %11097 = vmatprep.subr.bf16.mxu1 %v11988_v4 }
 0x3ba   : > { %10810 = vmatpush3.bf16.msra.mxu0 %v11987_v8 }
 0x3bb   : > { %10811 = vmatprep.subr.bf16.mxu0 %v11989_v44 }
 0x3bc   : > { %11098 = vmatpush3.bf16.msra.mxu1 %v11988_v4 }
 0x3bd   : > { %10796 = vmatmul.mubr.bf16.gmra.mrb[28].mxu0 %v6367_v7  ;;  %11099 = vmatprep.subr.bf16.mxu1 %v11990_v11 }
 0x3be   : > { %10812 = vmatpush3.bf16.msra.mxu0 %v11989_v44  ;;  %10815 = vmatprep.mubr.bf16.mxu0 %v13764_v48  ;;  %v8140_v48 = vld [vmem:[#allocation3 + $0x118] sm:$0x1f] }
 0x3bf   : > { %11084 = vmatmul.mubr.bf16.gmra.mrb[28].mxu1 %v8478_v59  ;;  %10813 = vmatprep.subr.bf16.mxu0 %v11991_v23  ;;  %v8669_v51 = vshll.u32 %v8140_v48, 16 }
 0x3c0   : > { %11100 = vmatpush3.bf16.msra.mxu1 %v11990_v11  ;;  %11103 = vmatprep.mubr.bf16.mxu1 %v13768_v33  ;;  %v6548_v33 = vshrl.u32 %v13654_v22, 16 }
 0x3c1   : > { %11101 = vmatprep.subr.bf16.mxu1 %v11992_v43  ;;  %v8671_v18 = vrot.slane %v8669_v51, 5 }
 0x3c2   : > { %10814 = vmatpush3.bf16.msra.mxu0 %v11991_v23 }
 0x3c4   : > { %11102 = vmatpush3.bf16.msra.mxu1 %v11992_v43 }
 0x3c5   : > { %10816 = vmatmul.mubr.bf16.vlgmr.msra.gmra.mrb[16].mxu0 %v13771_v28  ;;  %v6559_v28 = vshll.u32 %v6028_v63, 16  ;;  %v6772_v63 = vld [vmem:[%s12376_s6 + $0x30] sm:$0xff] }
 0x3c6   : > { %10819 = vmatprep.mubr.bf16.mxu0 %v13779_v12  ;;  %v8661_v12 = vshll.u32 %v13704_v29, 16 }
 0x3c7   : > { %11104 = vmatmul.mubr.bf16.vlgmr.msra.gmra.mrb[16].mxu1 %v13776_v38  ;;  %v8658_v38 = vshrl.u32 %v13704_v29, 16 }
 0x3c8   : > { %11107 = vmatprep.mubr.bf16.mxu1 %v13795_v54  ;;  %v8666_v54 = vshrl.u32 %v8140_v48, 16 }
 0x3c9   : > { %v8660_v19 = vrot.slane %v8658_v38, 4 }
 0x3ca   : > { %v8668_v0 = vrot.slane %v8666_v54, 4 }
 0x3cc   : > { %v8672_v46 = vor.u32 %v8671_v18, %v8668_v0  ;;  %v6771_v18 = vld [vmem:[%s12376_s6 + $0x28] sm:$0xff] }
 0x3cd   : > { %10820 = vmatmul.mubr.bf16.gmra.mrb[20].mxu0 %v13806_v3  ;;  %v6550_v3 = vrot.slane %v6548_v33, 4 }
 0x3ce   : > { %10823 = vmatprep.mubr.bf16.mxu0 %v13813_v60  ;;  %v6561_v60 = vrot.slane %v6559_v28, 5 }
 0x3cf   : > { %11108 = vmatmul.mubr.bf16.gmra.mrb[20].mxu1 %v13810_v55  ;;  %v8663_v55 = vrot.slane %v8661_v12, 5  ;;  %v6554_v22 = vor.u32 %v6553_v53, %v6550_v3  ;;  %v9358_v12 = vld [vmem:[%s12376_s6 + $0xb0] sm:$0xff]  ;;  %v6773_v3 = vld [vmem:[%s12376_s6 + $0x38] sm:$0xff] }
 0x3d0   : > { %11111 = vmatprep.mubr.bf16.mxu1 %v13818_v52  ;;  %v6562_v29 = vor.u32 %v6561_v60, %v6558_v40 }
 0x3d1   : > { %v8664_v52 = vor.u32 %v8663_v55, %v8660_v19  ;;  %v9356_v19 = vld [vmem:[%s12376_s6 + $0xa0] sm:$0xff] }
 0x3d2   : > { %v6563_v10 = vsel %vm1801_vm2, %v6554_v22, %v6562_v29 }
 0x3d3   : > { %v8673_v27 = vsel %vm1801_vm2, %v8664_v52, %v8672_v46  ;;  %v9359_v46 = vld [vmem:[%s12376_s6 + $0xb8] sm:$0xff] }
 0x3d5   : > { %10824 = vmatmul.mubr.bf16.gmra.mrb[24].mxu0 %v13822_v62  ;;  %v13870_v62 = vld [vmem:[%s14027_s4] ss:$0 sm:$0xff] }
 0x3d6   : > { %10827 = vmatprep.mubr.bf16.mxu0 %v6367_v7 }
 0x3d7   : > { %11112 = vmatmul.mubr.bf16.gmra.mrb[24].mxu1 %v13826_v47 }
 0x3d8   : > { %11115 = vmatprep.mubr.bf16.mxu1 %v8478_v59 }
 0x3dd   : > { %10828 = vmatmul.mubr.bf16.gmra.mrb[28].mxu0 %v6563_v10 }
 0x3df   : > { %11116 = vmatmul.mubr.bf16.gmra.mrb[28].mxu1 %v8673_v27 }
 0x498   : > { %v10817_v47 = vpop.f32.mrb[16].mxu0 }
 0x499   : > { %v6752_v14 = vadd.f32 %v10817_v47, %v13870_v62  ;;  %v6664_v58 = vpop.f32.mrb[17].mxu0 }
 0x49a   : > { %v11105_v5 = vpop.f32.mrb[16].mxu1  ;;  %v6750_v31 = vadd.f32 %v13870_v62, %v6664_v58  ;;  %v10818_v39 = vpop.f32.mrb[18].mxu0 }
 0x49b   : > { %v6784_v17 = vadd.f32 %v6768_v57, %v6752_v14  ;;  %v8861_v45 = vadd.f32 %v11105_v5, %v13870_v62  ;;  %v8773_v41 = vpop.f32.mrb[17].mxu1  ;;  %v6753_v25 = vadd.f32 %v10818_v39, %v13870_v62  ;;  %v6667_v32 = vpop.f32.mrb[19].mxu0 }
 0x49c   : > { %v6782_v35 = vadd.f32 %v6766_v16, %v6750_v31  ;;  %v8859_v49 = vadd.f32 %v13870_v62, %v8773_v41  ;;  %v11106_v8 = vpop.f32.mrb[18].mxu1  ;;  %v6751_v61 = vadd.f32 %v13870_v62, %v6667_v32  ;;  %v9357_v16 = vld [vmem:[%s12376_s6 + $0xa8] sm:$0xff] }
 0x49d   : > { %v6800_v20 = vmax.f32 %v6784_v17, 0.0  ;;  %v8894_v42 = vadd.f32 %v9354_v50, %v8861_v45  ;;  %v6785_v4 = vadd.f32 %v6769_v56, %v6753_v25  ;;  %v8862_v34 = vadd.f32 %v11106_v8, %v13870_v62  ;;  %v8776_v30 = vpop.f32.mrb[19].mxu1 }
 0x49e   : > { %v6798_v13 = vmax.f32 %v6782_v35, 0.0  ;;  %v8892_v44 = vadd.f32 %v9352_v9, %v8859_v49  ;;  %v6783_v26 = vadd.f32 %v6767_v37, %v6751_v61  ;;  %v8860_v21 = vadd.f32 %v13870_v62, %v8776_v30  ;;  %v6776_v37 = vld [vmem:[%s12376_s6 + $0x50] sm:$0xff]  ;;  %v6777_v30 = vld [vmem:[%s12376_s6 + $0x58] sm:$0xff] }
 0x49f   : > { %6816 = vst [vmem:[%s13890_s11 + $0x10] sm:$0xff] %v6800_v20  ;;  %v8910_v11 = vmax.f32 %v8894_v42, 0.0  ;;  %v6801_v6 = vmax.f32 %v6785_v4, 0.0  ;;  %v8895_v24 = vadd.f32 %v9355_v36, %v8862_v34  ;;  %v6774_v36 = vld [vmem:[%s12376_s6 + $0x40] sm:$0xff]  ;;  %v9362_v42 = vld [vmem:[%s12376_s6 + $0xd0] sm:$0xff] }
 0x4a0   : > { %6814 = vst [vmem:[%s13890_s11] sm:$0xff] %v6798_v13  ;;  %v8908_v23 = vmax.f32 %v8892_v44, 0.0  ;;  %v6799_v7 = vmax.f32 %v6783_v26, 0.0  ;;  %v8893_v43 = vadd.f32 %v9353_v2, %v8860_v21  ;;  %v10821_v59 = vpop.f32.mrb[20].mxu0  ;;  %v9360_v26 = vld [vmem:[%s12376_s6 + $0xc0] sm:$0xff] }
 0x4a1   : > { %9370 = vst [vmem:[%s13890_s11 + $0x90] sm:$0xff] %v8910_v11  ;;  %6817 = vst [vmem:[%s13890_s11 + $0x18] sm:$0xff] %v6801_v6  ;;  %v8911_v48 = vmax.f32 %v8895_v24, 0.0  ;;  %v6756_v33 = vadd.f32 %v10821_v59, %v13870_v62  ;;  %v6680_v15 = vpop.f32.mrb[21].mxu0  ;;  %v6775_v6 = vld [vmem:[%s12376_s6 + $0x48] sm:$0xff] }
 0x4a2   : > { %9368 = vst [vmem:[%s13890_s11 + $0x80] sm:$0xff] %v8908_v23  ;;  %6815 = vst [vmem:[%s13890_s11 + $0x8] sm:$0xff] %v6799_v7  ;;  %v8909_v28 = vmax.f32 %v8893_v43, 0.0  ;;  %v11109_v38 = vpop.f32.mrb[20].mxu1  ;;  %v6754_v54 = vadd.f32 %v13870_v62, %v6680_v15  ;;  %v10822_v51 = vpop.f32.mrb[22].mxu0  ;;  %v9363_v43 = vld [vmem:[%s12376_s6 + $0xd8] sm:$0xff] }
 0x4a3   : > { %9371 = vst [vmem:[%s13890_s11 + $0x98] sm:$0xff] %v8911_v48  ;;  %v6788_v53 = vadd.f32 %v6772_v63, %v6756_v33  ;;  %v8865_v40 = vadd.f32 %v11109_v38, %v13870_v62  ;;  %v8789_v60 = vpop.f32.mrb[21].mxu1  ;;  %v6757_v55 = vadd.f32 %v10822_v51, %v13870_v62  ;;  %v6683_v0 = vpop.f32.mrb[23].mxu0 }
 0x4a4   : > { %9369 = vst [vmem:[%s13890_s11 + $0x88] sm:$0xff] %v8909_v28  ;;  %v6786_v22 = vadd.f32 %v6770_v1, %v6754_v54  ;;  %v8863_v29 = vadd.f32 %v13870_v62, %v8789_v60  ;;  %v11110_v52 = vpop.f32.mrb[22].mxu1  ;;  %v6755_v10 = vadd.f32 %v13870_v62, %v6683_v0  ;;  %v9361_v28 = vld [vmem:[%s12376_s6 + $0xc8] sm:$0xff] }
 0x4a5   : > { %v6804_v27 = vmax.f32 %v6788_v53, 0.0  ;;  %v8898_v47 = vadd.f32 %v9358_v12, %v8865_v40  ;;  %v6789_v57 = vadd.f32 %v6773_v3, %v6757_v55  ;;  %v8866_v14 = vadd.f32 %v11110_v52, %v13870_v62  ;;  %v8792_v58 = vpop.f32.mrb[23].mxu1 }
 0x4a6   : > { %v6802_v5 = vmax.f32 %v6786_v22, 0.0  ;;  %v8896_v50 = vadd.f32 %v9356_v19, %v8863_v29  ;;  %v6787_v31 = vadd.f32 %v6771_v18, %v6755_v10  ;;  %v8864_v39 = vadd.f32 %v13870_v62, %v8792_v58  ;;  %v6780_v18 = vld [vmem:[%s12376_s6 + $0x70] sm:$0xff]  ;;  %v6781_v58 = vld [vmem:[%s12376_s6 + $0x78] sm:$0xff] }
 0x4a7   : > { %6820 = vst [vmem:[%s13890_s11 + $0x30] sm:$0xff] %v6804_v27  ;;  %v8914_v56 = vmax.f32 %v8898_v47, 0.0  ;;  %v6805_v17 = vmax.f32 %v6789_v57, 0.0  ;;  %v8899_v45 = vadd.f32 %v9359_v46, %v8866_v14  ;;  %v6778_v46 = vld [vmem:[%s12376_s6 + $0x60] sm:$0xff]  ;;  %v9366_v47 = vld [vmem:[%s12376_s6 + $0xf0] sm:$0xff] }
 0x4a8   : > { %6818 = vst [vmem:[%s13890_s11 + $0x20] sm:$0xff] %v6802_v5  ;;  %v8912_v41 = vmax.f32 %v8896_v50, 0.0  ;;  %v6803_v9 = vmax.f32 %v6787_v31, 0.0  ;;  %v8897_v25 = vadd.f32 %v9357_v16, %v8864_v39  ;;  %v10825_v32 = vpop.f32.mrb[24].mxu0  ;;  %v9364_v31 = vld [vmem:[%s12376_s6 + $0xe0] sm:$0xff] }
 0x4a9   : > { %9374 = vst [vmem:[%s13890_s11 + $0xb0] sm:$0xff] %v8914_v56  ;;  %6821 = vst [vmem:[%s13890_s11 + $0x38] sm:$0xff] %v6805_v17  ;;  %v8915_v35 = vmax.f32 %v8899_v45, 0.0  ;;  %v6760_v49 = vadd.f32 %v10825_v32, %v13870_v62  ;;  %v6696_v8 = vpop.f32.mrb[25].mxu0  ;;  %v6779_v17 = vld [vmem:[%s12376_s6 + $0x68] sm:$0xff] }
 0x4aa   : > { %9372 = vst [vmem:[%s13890_s11 + $0xa0] sm:$0xff] %v8912_v41  ;;  %6819 = vst [vmem:[%s13890_s11 + $0x28] sm:$0xff] %v6803_v9  ;;  %v8913_v61 = vmax.f32 %v8897_v25, 0.0  ;;  %v11113_v20 = vpop.f32.mrb[24].mxu1  ;;  %v6758_v4 = vadd.f32 %v13870_v62, %v6696_v8  ;;  %v10826_v34 = vpop.f32.mrb[26].mxu0  ;;  %v9367_v25 = vld [vmem:[%s12376_s6 + $0xf8] sm:$0xff] }
 0x4ab   : > { %9375 = vst [vmem:[%s13890_s11 + $0xb8] sm:$0xff] %v8915_v35  ;;  %v6792_v2 = vadd.f32 %v6776_v37, %v6760_v49  ;;  %v8869_v13 = vadd.f32 %v11113_v20, %v13870_v62  ;;  %v8805_v44 = vpop.f32.mrb[25].mxu1  ;;  %v6761_v21 = vadd.f32 %v10826_v34, %v13870_v62  ;;  %v6699_v11 = vpop.f32.mrb[27].mxu0 }
 0x4ac   : > { %9373 = vst [vmem:[%s13890_s11 + $0xa8] sm:$0xff] %v8913_v61  ;;  %v6790_v24 = vadd.f32 %v6774_v36, %v6758_v4  ;;  %v8867_v23 = vadd.f32 %v13870_v62, %v8805_v44  ;;  %v11114_v7 = vpop.f32.mrb[26].mxu1  ;;  %v6759_v59 = vadd.f32 %v13870_v62, %v6699_v11  ;;  %v9365_v61 = vld [vmem:[%s12376_s6 + $0xe8] sm:$0xff] }
 0x4ad   : > { %v6808_v63 = vmax.f32 %v6792_v2, 0.0  ;;  %v8902_v48 = vadd.f32 %v9362_v42, %v8869_v13  ;;  %v6793_v33 = vadd.f32 %v6777_v30, %v6761_v21  ;;  %v8870_v15 = vadd.f32 %v11114_v7, %v13870_v62  ;;  %v8808_v1 = vpop.f32.mrb[27].mxu1 }
 0x4ae   : > { %v6806_v38 = vmax.f32 %v6790_v24, 0.0  ;;  %v8900_v12 = vadd.f32 %v9360_v26, %v8867_v23  ;;  %v6791_v54 = vadd.f32 %v6775_v6, %v6759_v59  ;;  %v8868_v51 = vadd.f32 %v13870_v62, %v8808_v1 }
 0x4af   : > { %6824 = vst [vmem:[%s13890_s11 + $0x50] sm:$0xff] %v6808_v63  ;;  %v8918_v3 = vmax.f32 %v8902_v48, 0.0  ;;  %v6809_v53 = vmax.f32 %v6793_v33, 0.0  ;;  %v8903_v40 = vadd.f32 %v9363_v43, %v8870_v15 }
 0x4b0   : > { %6822 = vst [vmem:[%s13890_s11 + $0x40] sm:$0xff] %v6806_v38  ;;  %v8916_v60 = vmax.f32 %v8900_v12, 0.0  ;;  %v6807_v19 = vmax.f32 %v6791_v54, 0.0  ;;  %v8901_v55 = vadd.f32 %v9361_v28, %v8868_v51  ;;  %v10829_v0 = vpop.f32.mrb[28].mxu0 }
 0x4b1   : > { %9378 = vst [vmem:[%s13890_s11 + $0xd0] sm:$0xff] %v8918_v3  ;;  %6825 = vst [vmem:[%s13890_s11 + $0x58] sm:$0xff] %v6809_v53  ;;  %v8919_v22 = vmax.f32 %v8903_v40, 0.0  ;;  %v6764_v29 = vadd.f32 %v10829_v0, %v13870_v62  ;;  %v6712_v52 = vpop.f32.mrb[29].mxu0 }
 0x4b2   : > { %9376 = vst [vmem:[%s13890_s11 + $0xc0] sm:$0xff] %v8916_v60  ;;  %6823 = vst [vmem:[%s13890_s11 + $0x48] sm:$0xff] %v6807_v19  ;;  %v8917_v10 = vmax.f32 %v8901_v55, 0.0  ;;  %v11117_v27 = vpop.f32.mrb[28].mxu1  ;;  %v6762_v57 = vadd.f32 %v13870_v62, %v6712_v52  ;;  %v10830_v14 = vpop.f32.mrb[30].mxu0 }
 0x4b3   : > { %9379 = vst [vmem:[%s13890_s11 + $0xd8] sm:$0xff] %v8919_v22  ;;  %v6796_v16 = vadd.f32 %v6780_v18, %v6764_v29  ;;  %v8873_v5 = vadd.f32 %v11117_v27, %v13870_v62  ;;  %v8821_v50 = vpop.f32.mrb[29].mxu1  ;;  %v6765_v39 = vadd.f32 %v10830_v14, %v13870_v62  ;;  %v6715_v56 = vpop.f32.mrb[31].mxu0 }
 0x4b4   : > { %9377 = vst [vmem:[%s13890_s11 + $0xc8] sm:$0xff] %v8917_v10  ;;  %v6794_v45 = vadd.f32 %v6778_v46, %v6762_v57  ;;  %v8871_v41 = vadd.f32 %v13870_v62, %v8821_v50  ;;  %v11118_v9 = vpop.f32.mrb[30].mxu1  ;;  %v6763_v32 = vadd.f32 %v13870_v62, %v6715_v56 }
 0x4b5   : > { %v6812_v37 = vmax.f32 %v6796_v16, 0.0  ;;  %v8906_v35 = vadd.f32 %v9366_v47, %v8873_v5  ;;  %v6797_v49 = vadd.f32 %v6781_v58, %v6765_v39  ;;  %v8874_v8 = vadd.f32 %v11118_v9, %v13870_v62  ;;  %v8824_v36 = vpop.f32.mrb[31].mxu1 }
 0x4b6   : > { %v6810_v20 = vmax.f32 %v6794_v45, 0.0  ;;  %v8904_v42 = vadd.f32 %v9364_v31, %v8871_v41  ;;  %v6795_v4 = vadd.f32 %v6779_v17, %v6763_v32  ;;  %v8872_v34 = vadd.f32 %v13870_v62, %v8824_v36 }
 0x4b7   : > { %6828 = vst [vmem:[%s13890_s11 + $0x70] sm:$0xff] %v6812_v37  ;;  %v8922_v30 = vmax.f32 %v8906_v35, 0.0  ;;  %v6813_v2 = vmax.f32 %v6797_v49, 0.0  ;;  %v8907_v13 = vadd.f32 %v9367_v25, %v8874_v8 }
 0x4b8   : > { %6826 = vst [vmem:[%s13890_s11 + $0x60] sm:$0xff] %v6810_v20  ;;  %v8920_v44 = vmax.f32 %v8904_v42, 0.0  ;;  %v6811_v26 = vmax.f32 %v6795_v4, 0.0  ;;  %v8905_v21 = vadd.f32 %v9365_v61, %v8872_v34 }
 0x4b9   : > { %9382 = vst [vmem:[%s13890_s11 + $0xf0] sm:$0xff] %v8922_v30  ;;  %6829 = vst [vmem:[%s13890_s11 + $0x78] sm:$0xff] %v6813_v2  ;;  %v8923_v11 = vmax.f32 %v8907_v13, 0.0 }
 0x4ba   : > { %9380 = vst [vmem:[%s13890_s11 + $0xe0] sm:$0xff] %v8920_v44  ;;  %6827 = vst [vmem:[%s13890_s11 + $0x68] sm:$0xff] %v6811_v26  ;;  %v8921_v62 = vmax.f32 %v8905_v21, 0.0 }
 0x4bb   : > { %9383 = vst [vmem:[%s13890_s11 + $0xf8] sm:$0xff] %v8923_v11 }
 0x4bc   : > { %9381 = vst [vmem:[%s13890_s11 + $0xe8] sm:$0xff] %v8921_v62 }
 0x4bd   : > { %12098 = shalt.err (!%p12095_p2)
}
 0x4be   : > { %s12099_s6 = scalar_lea.hbm %s13973_s22, 4096  ;;  %s12103_s8 = scalar_lea.hbm %s14028_s5, 8192 }
 0x4bf   : > { %p12100_p13 = scmp.ne.s32.totalorder %s13973_s22, %s12099_s6  ;;  %p12104_p4 = scmp.lt.u32.totalorder %s13973_s22, %s14028_s5 }
 0x4c0   : > { %p12105_p5 = scmp.lt.u32.totalorder %s12103_s8, %s12099_s6  ;;  %p12107_p11 = scmp.lt.u32.totalorder %s12099_s6, %s13973_s22 }
 0x4c1   : > { %p12101_p6 = pnand %p12100_p13, %p14129_p0 }
 0x4c2   : > { %p12106_p8 = por %p12105_p5, %p12104_p4 }
 0x4c3   : > { %p12102_p10 = pneg %p12101_p6 }
 0x4c4   : > { %p12108_p1 = por %p12107_p11, %p12106_p8 }
 0x4c6   : > { %p12109_p3 = pnand %p12108_p1, %p12102_p10 }
 0x4c8   : > { %12112 = shalt.err (!%p12109_p3)
}
 0x4c9   : > { %s12166_s28 = smov 128   ;;  %s12167_s15 = smov 8  }
 0x4ca   : > { %11641 = dma.vmem_to_hbm [thread:$0]  (%p14129_p0), %s13975_s30, 4096, %s13973_s22, %s8942_s9, %s12166_s28, %s12166_s28, %s12167_s15  }
 0x4cb PF: > { %s8970_s16 = sand.u32 1, %s12143_s18   ;;  %p14130_p7 = scmp.ne.s32.totalorder %s14033_s25, 0 }
 0x4cc   : > { %p14131_p9 = scmp.ge.s32.totalorder %s12155_s21, 2  ;;  %s8971_s12 = scalar_lea.sflag [#allocation6], %s8970_s16 }
 0x4ce   : > { %p11655_p12 = pnand %p14131_p9, %p14130_p7 }
 0x4d0   : > { %12138 = dma.done.wait (!%p11655_p12), %s8971_s12, 4096  }
 0x4d1   : > { %12140 = vsyncadd (!%p11655_p12), %s8971_s12, 4294963200  ;;  %p19_p2 = scmp.ge.s32.totalorder %s12308_s14, 4   ;;  %s14132_s18 = smov %s12147_s19 }
 0x4d2   : > { %s14133_s19 = smov %s12151_s20  ;;  %s14134_s20 = smov %s12324_s27 }
 0x4d3   : > { %s14135_s21 = smov %s12308_s14  ;;  %21 = sbr.rel (!%p19_p2) target bundleno = 6 (0x6), region = 118 }
 0x4da   :  { %8976 = vsyncpa [#allocation5], 1 }
 0x4db   :  { %8978 = vsyncpa [#allocation5 + $0x1], 1 }
 0x4dc   :  { %8979 = vsyncpa [#allocation8], 1 }
 0x4dd   :  { %8980 = vsyncpa [#allocation6], 1 }
 0x4de   :  { %8982 = vsyncpa [#allocation6 + $0x1], 1 }

</bundles_post_ra>
